<compile_context>
chip_gen: v7x
topology: tpu7x:2x2x1
jax: 0.10.0
libtpu: 0.0.40
codegen_flags: <defaults>
</compile_context>

<pallas_src>
import functools
import numpy as np
import jax
import jax.numpy as jnp
from jax.experimental import pallas as pl
from jax.experimental.pallas import tpu as pltpu

BN_EPS = 1e-5  # BatchNorm2d(eps=1e-5), gamma=1, beta=0, running_mean=0, running_var=1


def _layout_dims(C, F):
    cin_pad = ((C + 7) // 8) * 8            # x rows as stored in the padded input array
    xslot = ((C + 15) // 16) * 16           # x rows inside a tap chunk (16-aligned for bf16)
    chunk = xslot + F                       # rows per 3x3 tap in the stack
    k_rows = 9 * chunk + 16                 # + 16-row bias block (row 0 = ones)
    cr = (C + F) // 8                       # CBAM reduction (reduction_ratio = 8)
    return cin_pad, xslot, chunk, k_rows, cr


def _convlstm_kernel(C, CIN_PAD, XSLOT, F, W, HW, S, chunk,
                     x_ref, w1_ref, b1_ref, w2_ref, b2_ref, swc_ref, m3_ref, wall_ref,
                     out_ref, xh_ref, c_ref, taps_ref):
    KB = 9 * chunk                                   # bias block start in the tap stack

    # ---------------- per-batch init (scratch persists across grid; re-init every b) ----------
    xh_ref[CIN_PAD:, :] = jnp.zeros((chunk - CIN_PAD, HW), jnp.float32)   # pad rows + h0 = 0
    c_ref[...] = jnp.zeros((F, HW), jnp.float32)
    taps_ref[KB:, :] = jnp.where(
        jax.lax.broadcasted_iota(jnp.int32, (16, HW), 0) == 0, 1.0, 0.0
    ).astype(taps_ref.dtype)                                              # conv-bias ones row

    # ---------------- loop-invariant helpers (hoisted out of the time loop) -------------------
    rowv = jax.lax.broadcasted_iota(jnp.int32, (chunk, 1), 0)
    valid = jnp.logical_or(rowv < C, rowv >= XSLOT)     # real (non-padding) channel rows
    col4 = jax.lax.broadcasted_iota(jnp.int32, (1, 4), 1)
    row2 = jax.lax.broadcasted_iota(jnp.int32, (2, HW), 0)

    amts7 = [(-(dh * W + dw)) % HW for dh in range(-3, 4) for dw in range(-3, 4)]
    amts3 = [(-(dh * W + dw)) % HW for dh in (-1, 0, 1) for dw in (-1, 0, 1)]

    def step(t, carry):
        # fresh x for this timestep; rows CIN_PAD..chunk hold [zero pad | h_{t-1}] already
        xh_ref[0:CIN_PAD, :] = x_ref[0, t, :, :]
        xh = xh_ref[...]                 # (chunk, HW) = [x | zero pad | h]
        c = c_ref[...]                   # (F, HW)

        # -------- CBAM ChannelGate (4 pools, shared MLP; merged across pools and x|h) --------
        avg = jnp.mean(xh, axis=1, keepdims=True)
        mx = jnp.max(xh, axis=1, keepdims=True)
        lp = jnp.sqrt(jnp.sum(xh * xh, axis=1, keepdims=True))           # F.lp_pool2d(p=2)
        lse = mx + jnp.log(jnp.sum(jnp.exp(xh - mx), axis=1, keepdims=True))
        pstack = jnp.where(col4 == 0, avg, 0.0)
        for k, v in ((1, mx), (2, lp), (3, lse)):
            pstack = pstack + jnp.where(col4 == k, v, 0.0)               # (chunk, 4)
        hid = jnp.maximum(
            jnp.dot(w1_ref[...], pstack, preferred_element_type=jnp.float32) + b1_ref[...],
            0.0)                                                          # (CR, 4)
        # sum over the 4 pools happens after ReLU; second Linear is linear -> one small dot,
        # its bias is applied once per pool -> +4*b2
        att = (jnp.dot(w2_ref[...], jnp.sum(hid, axis=1, keepdims=True),
                       preferred_element_type=jnp.float32)
               + 4.0 * b2_ref[...])                                       # (chunk, 1)
        xhc = xh * jax.nn.sigmoid(att)            # padded rows stay exactly 0

        # -------- CBAM SpatialGate: 7x7 conv as 49 lane-rolls of the stacked [cmax; cmean] ----
        cmax = jnp.max(jnp.where(valid, xhc, -jnp.inf), axis=0, keepdims=True)   # (1, HW)
        cmean = jnp.sum(xhc, axis=0, keepdims=True) * (1.0 / (C + F))            # (1, HW)
        cm2 = jnp.where(row2 == 0, cmax, cmean)                                  # (2, HW)
        accs = []                               # 4 independent partial sums (short dep chains)
        for i, amt in enumerate(amts7):
            r = cm2 if amt == 0 else pltpu.roll(cm2, amt, axis=1)
            p = r * swc_ref[i]                  # swc rows = boundary-mask * weight * BN scale
            if i < 4:
                accs.append(p)
            else:
                accs[i % 4] = accs[i % 4] + p
        sacc = (accs[0] + accs[1]) + (accs[2] + accs[3])                          # (2, HW)
        sg = jax.nn.sigmoid(jnp.sum(sacc, axis=0, keepdims=True))                 # (1, HW)
        xhg = xhc * sg                                                            # (chunk, HW)

        # -------- main 3x3 conv (pad=1): bf16 tap stack + ONE bf16 MXU matmul (bias folded) ---
        for ti, amt in enumerate(amts3):
            r = xhg if amt == 0 else pltpu.roll(xhg, amt, axis=1)
            taps_ref[ti * chunk:(ti + 1) * chunk, :] = (
                r * m3_ref[ti:ti + 1, :]).astype(taps_ref.dtype)
        gates = jnp.dot(wall_ref[...], taps_ref[...],
                        preferred_element_type=jnp.float32)               # (4F, HW) f32

        ingate = jax.nn.sigmoid(gates[0:F])
        forgetgate = jax.nn.sigmoid(gates[F:2 * F])
        cellgate = gates[2 * F:3 * F]          # NOTE: reference applies no tanh to cellgate
        outgate = jax.nn.sigmoid(gates[3 * F:4 * F])

        cy = forgetgate * c + ingate * cellgate
        hy = outgate * jnp.tanh(cy)

        out_ref[0, t, :, :] = hy
        xh_ref[XSLOT:, :] = hy                 # h feeds the next step
        c_ref[...] = cy
        return carry

    jax.lax.fori_loop(0, S, step, 0)


def _boundary_masks(H, W, r):
    """(2r+1)^2 validity masks over the flattened H*W grid, tap order (dh, dw) row-major."""
    HW = H * W
    hh = np.arange(HW) // W
    ww = np.arange(HW) % W
    rows = []
    for dh in range(-r, r + 1):
        for dw in range(-r, r + 1):
            rows.append(((hh + dh >= 0) & (hh + dh < H) &
                         (ww + dw >= 0) & (ww + dw < W)).astype(np.float32))
    return np.stack(rows)      # ((2r+1)^2, HW)


def init_params(key, C, F, H, W):
    """Deterministic synthetic parameters matching the module's __init__ shapes,
    pre-laid-out for the channels-on-sublanes kernel."""
    Cin = C + F
    G = 4 * F
    HW = H * W
    _, XSLOT, chunk, K, CR = _layout_dims(C, F)

    ks = jax.random.split(key, 7)
    s = 0.1
    w1 = jax.random.normal(ks[0], (CR, Cin), jnp.float32) * s       # Linear(Cin, CR).weight
    b1 = jax.random.normal(ks[1], (CR,), jnp.float32) * s
    w2 = jax.random.normal(ks[2], (Cin, CR), jnp.float32) * s       # Linear(CR, Cin).weight
    b2 = jax.random.normal(ks[3], (Cin,), jnp.float32) * s
    w7 = jax.random.normal(ks[4], (7, 7, 2), jnp.float32) * s       # SpatialGate 7x7, bias=False
    wc = jax.random.normal(ks[5], (3, 3, Cin, G), jnp.float32) * s  # Conv2d(Cin, 4F, 3) HWIO
    bc = jax.random.normal(ks[6], (G,), jnp.float32) * s

    # fused channel-MLP weights over the combined [x | zero pad | h] row layout
    w1f = jnp.zeros((CR, chunk), jnp.float32).at[:, :C].set(w1[:, :C]).at[:, XSLOT:].set(w1[:, C:])
    w2f = jnp.zeros((chunk, CR), jnp.float32).at[:C, :].set(w2[:C, :]).at[XSLOT:, :].set(w2[C:, :])
    b2f = jnp.zeros((chunk, 1), jnp.float32).at[:C, 0].set(b2[:C]).at[XSLOT:, 0].set(b2[C:])

    # spatial-gate 7x7 conv folded with boundary masks and eval-mode BatchNorm scale,
    # pre-stacked per tap as (49, 2, HW): row 0 weights cmax, row 1 weights cmean.
    mask7 = _boundary_masks(H, W, 3)                    # (49, HW)
    mask3 = _boundary_masks(H, W, 1)                    # (9, HW)
    bn_scale = 1.0 / np.sqrt(1.0 + BN_EPS)
    w7f = np.asarray(w7).reshape(49, 2)
    swc = np.stack([mask7 * w7f[:, :1] * bn_scale,
                    mask7 * w7f[:, 1:2] * bn_scale], axis=1).astype(np.float32)   # (49, 2, HW)

    # fused 3x3 conv weight (4F, K), bf16: per-tap [x-cols | zero pad | h-cols] + bias column
    wall = np.zeros((G, K), np.float32)
    wcn = np.asarray(wc)
    for kh in range(3):
        for kw in range(3):
            ti = kh * 3 + kw
            wall[:, ti * chunk: ti * chunk + C] = wcn[kh, kw, :C, :].T
            wall[:, ti * chunk + XSLOT: ti * chunk + chunk] = wcn[kh, kw, C:, :].T
    wall[:, 9 * chunk] = np.asarray(bc)

    return dict(
        w1f=w1f, b1=b1.reshape(CR, 1), w2f=w2f, b2f=b2f,
        swc=jnp.asarray(swc),
        mask3=jnp.asarray(mask3, jnp.float32),
        wall=jnp.asarray(wall, jnp.bfloat16),
    )


def conv_lstm_block(inputs, params, *, num_features):
    """inputs: (B, S, C, H, W) float32 -> (B, S, num_features, H, W) float32."""
    B, S, C, H, W = inputs.shape
    F = num_features
    HW = H * W
    assert HW % 128 == 0 and F % 16 == 0, "lane / bf16-sublane alignment"
    CIN_PAD, XSLOT, chunk, K, CR = _layout_dims(C, F)
    assert CR >= 1

    x = inputs.reshape(B, S, C, HW).astype(jnp.float32)
    if CIN_PAD > C:
        x = jnp.concatenate(
            [x, jnp.zeros((B, S, CIN_PAD - C, HW), jnp.float32)], axis=2)

    kernel = functools.partial(_convlstm_kernel, C, CIN_PAD, XSLOT, F, W, HW, S, chunk)

    def full_spec(shape):
        return pl.BlockSpec(shape, lambda b: (0,) * len(shape))

    grid_spec = pltpu.PrefetchScalarGridSpec(
        num_scalar_prefetch=0,
        grid=(B,),                               # whole S-recurrence runs inside the kernel
        in_specs=[
            pl.BlockSpec((1, S, CIN_PAD, HW), lambda b: (b, 0, 0, 0)),
            full_spec((CR, chunk)), full_spec((CR, 1)),
            full_spec((chunk, CR)), full_spec((chunk, 1)),
            full_spec((49, 2, HW)), full_spec((9, HW)),
            full_spec((4 * F, K)),
        ],
        out_specs=pl.BlockSpec((1, S, F, HW), lambda b: (b, 0, 0, 0)),
        scratch_shapes=[pltpu.VMEM((chunk, HW), jnp.float32),       # combined [x | pad | h]
                        pltpu.VMEM((F, HW), jnp.float32),           # cell state
                        pltpu.VMEM((K, HW), jnp.bfloat16)],         # bf16 fused-conv tap stack
    )

    out = pl.pallas_call(
        kernel,
        out_shape=jax.ShapeDtypeStruct((B, S, F, HW), jnp.float32),
        grid_spec=grid_spec,
        compiler_params=pltpu.CompilerParams(
            dimension_semantics=("parallel",)),   # batch axis: safe, state re-init per batch
    )(x, params["w1f"], params["b1"], params["w2f"], params["b2f"],
      params["swc"], params["mask3"], params["wall"])

    return out.reshape(B, S, F, H, W)


if __name__ == "__main__":
    B, S, C, H, W = 2, 8, 4, 16, 16
    NUM_FEATURES = 32

    key = jax.random.PRNGKey(0)
    k_in, k_p = jax.random.split(key)
    inputs = jax.random.normal(k_in, (B, S, C, H, W), jnp.float32)
    params = init_params(k_p, C, NUM_FEATURES, H, W)

    fwd = jax.jit(functools.partial(conv_lstm_block, num_features=NUM_FEATURES))
    out = jax.block_until_ready(fwd(inputs, params))

    assert out.shape == (B, S, NUM_FEATURES, H, W), out.shape
    assert bool(jnp.isfinite(out).all())
    print("KERNEL_OK")
</pallas_src>

<mosaic_0001>
module attributes {stable_mosaic.version = 11 : i64} {
  func.func @_convlstm_kernel(%arg0: i32, %arg1: memref<1x8x8x256xf32, #tpu.memory_space<vmem>>, %arg2: memref<4x48xf32, #tpu.memory_space<vmem>>, %arg3: memref<4x1xf32, #tpu.memory_space<vmem>>, %arg4: memref<48x4xf32, #tpu.memory_space<vmem>>, %arg5: memref<48x1xf32, #tpu.memory_space<vmem>>, %arg6: memref<49x2x256xf32, #tpu.memory_space<vmem>>, %arg7: memref<9x256xf32, #tpu.memory_space<vmem>>, %arg8: memref<128x448xbf16, #tpu.memory_space<vmem>>, %arg9: memref<1x8x32x256xf32, #tpu.memory_space<vmem>>, %arg10: memref<48x256xf32, #tpu.memory_space<vmem>>, %arg11: memref<32x256xf32, #tpu.memory_space<vmem>>, %arg12: memref<448x256xbf16, #tpu.memory_space<vmem>>) attributes {dimension_semantics = [#tpu.dimension_semantics<parallel>], iteration_bounds = array<i64: 2>, scalar_prefetch = 0 : i64, scratch_operands = 3 : i64, tpu.core_type = #tpu.core_type<tc>, window_params = [{transform_indices = @transform_0, window_bounds = array<i64: 1, 8, 8, 256>}, {pipeline_mode = #tpu.pipeline_mode<synchronous>, transform_indices = @transform_1, window_bounds = array<i64: 4, 48>}, {pipeline_mode = #tpu.pipeline_mode<synchronous>, transform_indices = @transform_2, window_bounds = array<i64: 4, 1>}, {pipeline_mode = #tpu.pipeline_mode<synchronous>, transform_indices = @transform_3, window_bounds = array<i64: 48, 4>}, {pipeline_mode = #tpu.pipeline_mode<synchronous>, transform_indices = @transform_4, window_bounds = array<i64: 48, 1>}, {pipeline_mode = #tpu.pipeline_mode<synchronous>, transform_indices = @transform_5, window_bounds = array<i64: 49, 2, 256>}, {pipeline_mode = #tpu.pipeline_mode<synchronous>, transform_indices = @transform_6, window_bounds = array<i64: 9, 256>}, {pipeline_mode = #tpu.pipeline_mode<synchronous>, transform_indices = @transform_7, window_bounds = array<i64: 128, 448>}, {transform_indices = @transform_8, window_bounds = array<i64: 1, 8, 32, 256>}]} {
    %cst = arith.constant 0.000000e+00 : f32
    %0 = vector.broadcast %cst : f32 to vector<40x256xf32>
    %c8 = arith.constant 8 : index
    %c0 = arith.constant 0 : index
    %1 = vector.load %arg10[%c8, %c0] : memref<48x256xf32, #tpu.memory_space<vmem>>, vector<40x256xf32>
    tpu.vector_store %arg10[%c8, %c0], %0 {strides = array<i32>} : memref<48x256xf32, #tpu.memory_space<vmem>>, vector<40x256xf32>,
    %cst_0 = arith.constant 0.000000e+00 : f32
    %2 = vector.broadcast %cst_0 : f32 to vector<32x256xf32>
    %c0_1 = arith.constant 0 : index
    %c0_2 = arith.constant 0 : index
    %3 = vector.load %arg11[%c0_1, %c0_2] : memref<32x256xf32, #tpu.memory_space<vmem>>, vector<32x256xf32>
    tpu.vector_store %arg11[%c0_1, %c0_2], %2 {strides = array<i32>} : memref<32x256xf32, #tpu.memory_space<vmem>>, vector<32x256xf32>,
    %4 = tpu.iota {dimensions = array<i32: 0>} : vector<16x256xi32>
    %c0_i32 = arith.constant 0 : i32
    %5 = vector.broadcast %c0_i32 : i32 to vector<16x256xi32>
    %6 = arith.cmpi eq, %4, %5 : vector<16x256xi32>
    %cst_3 = arith.constant 1.000000e+00 : f32
    %cst_4 = arith.constant 0.000000e+00 : f32
    %7 = vector.broadcast %cst_3 : f32 to vector<16x256xf32>
    %8 = vector.broadcast %cst_4 : f32 to vector<16x256xf32>
    %9 = arith.select %6, %7, %8 : vector<16x256xi1>, vector<16x256xf32>
    %10 = arith.truncf %9 : vector<16x256xf32> to vector<16x256xbf16>
    %c432 = arith.constant 432 : index
    %c0_5 = arith.constant 0 : index
    %11 = vector.load %arg12[%c432, %c0_5] : memref<448x256xbf16, #tpu.memory_space<vmem>>, vector<16x256xbf16>
    tpu.vector_store %arg12[%c432, %c0_5], %10 {strides = array<i32>} : memref<448x256xbf16, #tpu.memory_space<vmem>>, vector<16x256xbf16>,
    %12 = tpu.iota {dimensions = array<i32: 0>} : vector<48x1xi32>
    %c4_i32 = arith.constant 4 : i32
    %13 = vector.broadcast %c4_i32 : i32 to vector<48x1xi32>
    %14 = arith.cmpi slt, %12, %13 : vector<48x1xi32>
    %c16_i32 = arith.constant 16 : i32
    %15 = vector.broadcast %c16_i32 : i32 to vector<48x1xi32>
    %16 = arith.cmpi sge, %12, %15 : vector<48x1xi32>
    %17 = arith.ori %14, %16 : vector<48x1xi1>
    %18 = tpu.iota {dimensions = array<i32: 1>} : vector<1x4xi32>
    %19 = tpu.iota {dimensions = array<i32: 0>} : vector<2x256xi32>
    %c0_i32_6 = arith.constant 0 : i32
    %c8_i32 = arith.constant 8 : i32
    %20 = arith.addi %c0_i32_6, %c8_i32 : i32
    %c1_i32 = arith.constant 1 : i32
    scf.for %arg13 = %c0_i32_6 to %20 step %c1_i32  : i32 {
      %c0_8 = arith.constant 0 : index
      %21 = arith.index_cast %arg13 : i32 to index
      %c0_9 = arith.constant 0 : index
      %c0_10 = arith.constant 0 : index
      %22 = vector.load %arg1[%c0_8, %21, %c0_9, %c0_10] : memref<1x8x8x256xf32, #tpu.memory_space<vmem>>, vector<1x1x8x256xf32>
      %23 = vector.shape_cast %22 : vector<1x1x8x256xf32> to vector<8x256xf32>
      %c0_11 = arith.constant 0 : index
      %c0_12 = arith.constant 0 : index
      %24 = vector.load %arg10[%c0_11, %c0_12] : memref<48x256xf32, #tpu.memory_space<vmem>>, vector<8x256xf32>
      tpu.vector_store %arg10[%c0_11, %c0_12], %23 {strides = array<i32>} : memref<48x256xf32, #tpu.memory_space<vmem>>, vector<8x256xf32>,
      %c0_13 = arith.constant 0 : index
      %c0_14 = arith.constant 0 : index
      %25 = vector.load %arg10[%c0_13, %c0_14] : memref<48x256xf32, #tpu.memory_space<vmem>>, vector<48x256xf32>
      %c0_15 = arith.constant 0 : index
      %c0_16 = arith.constant 0 : index
      %26 = vector.load %arg11[%c0_15, %c0_16] : memref<32x256xf32, #tpu.memory_space<vmem>>, vector<32x256xf32>
      %cst_17 = arith.constant dense<0.000000e+00> : vector<48xf32>
      %27 = vector.multi_reduction <add>, %25, %cst_17 [1] : vector<48x256xf32> to vector<48xf32>
      %28 = vector.shape_cast %27 : vector<48xf32> to vector<48x1xf32>
      %cst_18 = arith.constant 2.560000e+02 : f32
      %29 = vector.broadcast %cst_18 : f32 to vector<48x1xf32>
      %30 = arith.divf %28, %29 : vector<48x1xf32>
      %cst_19 = arith.constant dense<0xFF800000> : vector<48xf32>
      %31 = vector.multi_reduction <maximumf>, %25, %cst_19 [1] : vector<48x256xf32> to vector<48xf32>
      %32 = vector.shape_cast %31 : vector<48xf32> to vector<48x1xf32>
      %33 = arith.mulf %25, %25 : vector<48x256xf32>
      %cst_20 = arith.constant dense<0.000000e+00> : vector<48xf32>
      %34 = vector.multi_reduction <add>, %33, %cst_20 [1] : vector<48x256xf32> to vector<48xf32>
      %35 = vector.shape_cast %34 : vector<48xf32> to vector<48x1xf32>
      %36 = math.sqrt %35 : vector<48x1xf32>
      %37 = vector.broadcast %32 : vector<48x1xf32> to vector<48x256xf32>
      %38 = arith.subf %25, %37 : vector<48x256xf32>
      %39 = math.exp %38 : vector<48x256xf32>
      %cst_21 = arith.constant dense<0.000000e+00> : vector<48xf32>
      %40 = vector.multi_reduction <add>, %39, %cst_21 [1] : vector<48x256xf32> to vector<48xf32>
      %41 = vector.shape_cast %40 : vector<48xf32> to vector<48x1xf32>
      %42 = math.log %41 : vector<48x1xf32>
      %43 = arith.addf %32, %42 : vector<48x1xf32>
      %c0_i32_22 = arith.constant 0 : i32
      %44 = vector.broadcast %c0_i32_22 : i32 to vector<1x4xi32>
      %45 = arith.cmpi eq, %18, %44 : vector<1x4xi32>
      %cst_23 = arith.constant 0.000000e+00 : f32
      %46 = vector.shape_cast %45 : vector<1x4xi1> to vector<1x4xi1>
      %47 = vector.broadcast %46 : vector<1x4xi1> to vector<48x4xi1>
      %48 = vector.shape_cast %30 : vector<48x1xf32> to vector<48x1xf32>
      %49 = vector.broadcast %48 : vector<48x1xf32> to vector<48x4xf32>
      %50 = vector.broadcast %cst_23 : f32 to vector<48x4xf32>
      %51 = arith.select %47, %49, %50 : vector<48x4xi1>, vector<48x4xf32>
      %c1_i32_24 = arith.constant 1 : i32
      %52 = vector.broadcast %c1_i32_24 : i32 to vector<1x4xi32>
      %53 = arith.cmpi eq, %18, %52 : vector<1x4xi32>
      %cst_25 = arith.constant 0.000000e+00 : f32
      %54 = vector.shape_cast %53 : vector<1x4xi1> to vector<1x4xi1>
      %55 = vector.broadcast %54 : vector<1x4xi1> to vector<48x4xi1>
      %56 = vector.shape_cast %32 : vector<48x1xf32> to vector<48x1xf32>
      %57 = vector.broadcast %56 : vector<48x1xf32> to vector<48x4xf32>
      %58 = vector.broadcast %cst_25 : f32 to vector<48x4xf32>
      %59 = arith.select %55, %57, %58 : vector<48x4xi1>, vector<48x4xf32>
      %60 = arith.addf %51, %59 : vector<48x4xf32>
      %c2_i32 = arith.constant 2 : i32
      %61 = vector.broadcast %c2_i32 : i32 to vector<1x4xi32>
      %62 = arith.cmpi eq, %18, %61 : vector<1x4xi32>
      %cst_26 = arith.constant 0.000000e+00 : f32
      %63 = vector.shape_cast %62 : vector<1x4xi1> to vector<1x4xi1>
      %64 = vector.broadcast %63 : vector<1x4xi1> to vector<48x4xi1>
      %65 = vector.shape_cast %36 : vector<48x1xf32> to vector<48x1xf32>
      %66 = vector.broadcast %65 : vector<48x1xf32> to vector<48x4xf32>
      %67 = vector.broadcast %cst_26 : f32 to vector<48x4xf32>
      %68 = arith.select %64, %66, %67 : vector<48x4xi1>, vector<48x4xf32>
      %69 = arith.addf %60, %68 : vector<48x4xf32>
      %c3_i32 = arith.constant 3 : i32
      %70 = vector.broadcast %c3_i32 : i32 to vector<1x4xi32>
      %71 = arith.cmpi eq, %18, %70 : vector<1x4xi32>
      %cst_27 = arith.constant 0.000000e+00 : f32
      %72 = vector.shape_cast %71 : vector<1x4xi1> to vector<1x4xi1>
      %73 = vector.broadcast %72 : vector<1x4xi1> to vector<48x4xi1>
      %74 = vector.shape_cast %43 : vector<48x1xf32> to vector<48x1xf32>
      %75 = vector.broadcast %74 : vector<48x1xf32> to vector<48x4xf32>
      %76 = vector.broadcast %cst_27 : f32 to vector<48x4xf32>
      %77 = arith.select %73, %75, %76 : vector<48x4xi1>, vector<48x4xf32>
      %78 = arith.addf %69, %77 : vector<48x4xf32>
      %c0_28 = arith.constant 0 : index
      %c0_29 = arith.constant 0 : index
      %79 = vector.load %arg2[%c0_28, %c0_29] : memref<4x48xf32, #tpu.memory_space<vmem>>, vector<4x48xf32>
      %cst_30 = arith.constant dense<0.000000e+00> : vector<4x4xf32>
      %80 = tpu.matmul %79, %78, %cst_30 {dimension_numbers = #tpu.dot_dimension_numbers<[1], [0], [0], [1], [0, 0, 1, 1], [], []>} : vector<4x48xf32>, vector<48x4xf32>, vector<4x4xf32> -> vector<4x4xf32>
      %c0_31 = arith.constant 0 : index
      %c0_32 = arith.constant 0 : index
      %81 = vector.load %arg3[%c0_31, %c0_32] : memref<4x1xf32, #tpu.memory_space<vmem>>, vector<4x1xf32>
      %82 = vector.broadcast %81 : vector<4x1xf32> to vector<4x4xf32>
      %83 = arith.addf %80, %82 : vector<4x4xf32>
      %cst_33 = arith.constant 0.000000e+00 : f32
      %84 = vector.broadcast %cst_33 : f32 to vector<4x4xf32>
      %85 = arith.maximumf %83, %84 : vector<4x4xf32>
      %c0_34 = arith.constant 0 : index
      %c0_35 = arith.constant 0 : index
      %86 = vector.load %arg4[%c0_34, %c0_35] : memref<48x4xf32, #tpu.memory_space<vmem>>, vector<48x4xf32>
      %cst_36 = arith.constant dense<0.000000e+00> : vector<4xf32>
      %87 = vector.multi_reduction <add>, %85, %cst_36 [1] : vector<4x4xf32> to vector<4xf32>
      %88 = vector.shape_cast %87 : vector<4xf32> to vector<4x1xf32>
      %cst_37 = arith.constant dense<0.000000e+00> : vector<48x1xf32>
      %89 = tpu.matmul %86, %88, %cst_37 {dimension_numbers = #tpu.dot_dimension_numbers<[1], [0], [0], [1], [0, 0, 1, 1], [], []>} : vector<48x4xf32>, vector<4x1xf32>, vector<48x1xf32> -> vector<48x1xf32>
      %c0_38 = arith.constant 0 : index
      %c0_39 = arith.constant 0 : index
      %90 = vector.load %arg5[%c0_38, %c0_39] : memref<48x1xf32, #tpu.memory_space<vmem>>, vector<48x1xf32>
      %cst_40 = arith.constant 4.000000e+00 : f32
      %91 = vector.broadcast %cst_40 : f32 to vector<48x1xf32>
      %92 = arith.mulf %91, %90 : vector<48x1xf32>
      %93 = arith.addf %89, %92 : vector<48x1xf32>
      %94 = arith.negf %93 : vector<48x1xf32>
      %95 = math.exp %94 : vector<48x1xf32>
      %cst_41 = arith.constant 1.000000e+00 : f32
      %96 = vector.broadcast %cst_41 : f32 to vector<48x1xf32>
      %97 = arith.addf %96, %95 : vector<48x1xf32>
      %98 = arith.divf %96, %97 : vector<48x1xf32>
      %99 = vector.broadcast %98 : vector<48x1xf32> to vector<48x256xf32>
      %100 = arith.mulf %25, %99 : vector<48x256xf32>
      %cst_42 = arith.constant 0xFF800000 : f32
      %101 = vector.shape_cast %17 : vector<48x1xi1> to vector<48x1xi1>
      %102 = vector.broadcast %101 : vector<48x1xi1> to vector<48x256xi1>
      %103 = vector.broadcast %cst_42 : f32 to vector<48x256xf32>
      %104 = arith.select %102, %100, %103 : vector<48x256xi1>, vector<48x256xf32>
      %cst_43 = arith.constant dense<0xFF800000> : vector<256xf32>
      %105 = vector.multi_reduction <maximumf>, %104, %cst_43 [0] : vector<48x256xf32> to vector<256xf32>
      %106 = vector.shape_cast %105 : vector<256xf32> to vector<1x256xf32>
      %cst_44 = arith.constant dense<0.000000e+00> : vector<256xf32>
      %107 = vector.multi_reduction <add>, %100, %cst_44 [0] : vector<48x256xf32> to vector<256xf32>
      %108 = vector.shape_cast %107 : vector<256xf32> to vector<1x256xf32>
      %cst_45 = arith.constant 0.027777778 : f32
      %109 = vector.broadcast %cst_45 : f32 to vector<1x256xf32>
      %110 = arith.mulf %108, %109 : vector<1x256xf32>
      %c0_i32_46 = arith.constant 0 : i32
      %111 = vector.broadcast %c0_i32_46 : i32 to vector<2x256xi32>
      %112 = arith.cmpi eq, %19, %111 : vector<2x256xi32>
      %113 = vector.shape_cast %106 : vector<1x256xf32> to vector<1x256xf32>
      %114 = vector.broadcast %113 : vector<1x256xf32> to vector<2x256xf32>
      %115 = vector.shape_cast %110 : vector<1x256xf32> to vector<1x256xf32>
      %116 = vector.broadcast %115 : vector<1x256xf32> to vector<2x256xf32>
      %117 = arith.select %112, %114, %116 : vector<2x256xi1>, vector<2x256xf32>
      %c51_i32 = arith.constant 51 : i32
      %118 = tpu.dynamic_rotate %117 by %c51_i32 dim 1 : vector<2x256xf32>, i32 -> vector<2x256xf32>
      %c0_47 = arith.constant 0 : index
      %c0_48 = arith.constant 0 : index
      %c0_49 = arith.constant 0 : index
      %119 = vector.load %arg6[%c0_47, %c0_48, %c0_49] : memref<49x2x256xf32, #tpu.memory_space<vmem>>, vector<1x2x256xf32>
      %120 = vector.shape_cast %119 : vector<1x2x256xf32> to vector<2x256xf32>
      %121 = arith.mulf %118, %120 : vector<2x256xf32>
      %c50_i32 = arith.constant 50 : i32
      %122 = tpu.dynamic_rotate %117 by %c50_i32 dim 1 : vector<2x256xf32>, i32 -> vector<2x256xf32>
      %c1 = arith.constant 1 : index
      %c0_50 = arith.constant 0 : index
      %c0_51 = arith.constant 0 : index
      %123 = vector.load %arg6[%c1, %c0_50, %c0_51] : memref<49x2x256xf32, #tpu.memory_space<vmem>>, vector<1x2x256xf32>
      %124 = vector.shape_cast %123 : vector<1x2x256xf32> to vector<2x256xf32>
      %125 = arith.mulf %122, %124 : vector<2x256xf32>
      %c49_i32 = arith.constant 49 : i32
      %126 = tpu.dynamic_rotate %117 by %c49_i32 dim 1 : vector<2x256xf32>, i32 -> vector<2x256xf32>
      %c2 = arith.constant 2 : index
      %c0_52 = arith.constant 0 : index
      %c0_53 = arith.constant 0 : index
      %127 = vector.load %arg6[%c2, %c0_52, %c0_53] : memref<49x2x256xf32, #tpu.memory_space<vmem>>, vector<1x2x256xf32>
      %128 = vector.shape_cast %127 : vector<1x2x256xf32> to vector<2x256xf32>
      %129 = arith.mulf %126, %128 : vector<2x256xf32>
      %c48_i32 = arith.constant 48 : i32
      %130 = tpu.dynamic_rotate %117 by %c48_i32 dim 1 : vector<2x256xf32>, i32 -> vector<2x256xf32>
      %c3 = arith.constant 3 : index
      %c0_54 = arith.constant 0 : index
      %c0_55 = arith.constant 0 : index
      %131 = vector.load %arg6[%c3, %c0_54, %c0_55] : memref<49x2x256xf32, #tpu.memory_space<vmem>>, vector<1x2x256xf32>
      %132 = vector.shape_cast %131 : vector<1x2x256xf32> to vector<2x256xf32>
      %133 = arith.mulf %130, %132 : vector<2x256xf32>
      %c47_i32 = arith.constant 47 : i32
      %134 = tpu.dynamic_rotate %117 by %c47_i32 dim 1 : vector<2x256xf32>, i32 -> vector<2x256xf32>
      %c4 = arith.constant 4 : index
      %c0_56 = arith.constant 0 : index
      %c0_57 = arith.constant 0 : index
      %135 = vector.load %arg6[%c4, %c0_56, %c0_57] : memref<49x2x256xf32, #tpu.memory_space<vmem>>, vector<1x2x256xf32>
      %136 = vector.shape_cast %135 : vector<1x2x256xf32> to vector<2x256xf32>
      %137 = arith.mulf %134, %136 : vector<2x256xf32>
      %138 = arith.addf %121, %137 : vector<2x256xf32>
      %c46_i32 = arith.constant 46 : i32
      %139 = tpu.dynamic_rotate %117 by %c46_i32 dim 1 : vector<2x256xf32>, i32 -> vector<2x256xf32>
      %c5 = arith.constant 5 : index
      %c0_58 = arith.constant 0 : index
      %c0_59 = arith.constant 0 : index
      %140 = vector.load %arg6[%c5, %c0_58, %c0_59] : memref<49x2x256xf32, #tpu.memory_space<vmem>>, vector<1x2x256xf32>
      %141 = vector.shape_cast %140 : vector<1x2x256xf32> to vector<2x256xf32>
      %142 = arith.mulf %139, %141 : vector<2x256xf32>
      %143 = arith.addf %125, %142 : vector<2x256xf32>
      %c45_i32 = arith.constant 45 : i32
      %144 = tpu.dynamic_rotate %117 by %c45_i32 dim 1 : vector<2x256xf32>, i32 -> vector<2x256xf32>
      %c6 = arith.constant 6 : index
      %c0_60 = arith.constant 0 : index
      %c0_61 = arith.constant 0 : index
      %145 = vector.load %arg6[%c6, %c0_60, %c0_61] : memref<49x2x256xf32, #tpu.memory_space<vmem>>, vector<1x2x256xf32>
      %146 = vector.shape_cast %145 : vector<1x2x256xf32> to vector<2x256xf32>
      %147 = arith.mulf %144, %146 : vector<2x256xf32>
      %148 = arith.addf %129, %147 : vector<2x256xf32>
      %c35_i32 = arith.constant 35 : i32
      %149 = tpu.dynamic_rotate %117 by %c35_i32 dim 1 : vector<2x256xf32>, i32 -> vector<2x256xf32>
      %c7 = arith.constant 7 : index
      %c0_62 = arith.constant 0 : index
      %c0_63 = arith.constant 0 : index
      %150 = vector.load %arg6[%c7, %c0_62, %c0_63] : memref<49x2x256xf32, #tpu.memory_space<vmem>>, vector<1x2x256xf32>
      %151 = vector.shape_cast %150 : vector<1x2x256xf32> to vector<2x256xf32>
      %152 = arith.mulf %149, %151 : vector<2x256xf32>
      %153 = arith.addf %133, %152 : vector<2x256xf32>
      %c34_i32 = arith.constant 34 : i32
      %154 = tpu.dynamic_rotate %117 by %c34_i32 dim 1 : vector<2x256xf32>, i32 -> vector<2x256xf32>
      %c8_64 = arith.constant 8 : index
      %c0_65 = arith.constant 0 : index
      %c0_66 = arith.constant 0 : index
      %155 = vector.load %arg6[%c8_64, %c0_65, %c0_66] : memref<49x2x256xf32, #tpu.memory_space<vmem>>, vector<1x2x256xf32>
      %156 = vector.shape_cast %155 : vector<1x2x256xf32> to vector<2x256xf32>
      %157 = arith.mulf %154, %156 : vector<2x256xf32>
      %158 = arith.addf %138, %157 : vector<2x256xf32>
      %c33_i32 = arith.constant 33 : i32
      %159 = tpu.dynamic_rotate %117 by %c33_i32 dim 1 : vector<2x256xf32>, i32 -> vector<2x256xf32>
      %c9 = arith.constant 9 : index
      %c0_67 = arith.constant 0 : index
      %c0_68 = arith.constant 0 : index
      %160 = vector.load %arg6[%c9, %c0_67, %c0_68] : memref<49x2x256xf32, #tpu.memory_space<vmem>>, vector<1x2x256xf32>
      %161 = vector.shape_cast %160 : vector<1x2x256xf32> to vector<2x256xf32>
      %162 = arith.mulf %159, %161 : vector<2x256xf32>
      %163 = arith.addf %143, %162 : vector<2x256xf32>
      %c32_i32 = arith.constant 32 : i32
      %164 = tpu.dynamic_rotate %117 by %c32_i32 dim 1 : vector<2x256xf32>, i32 -> vector<2x256xf32>
      %c10 = arith.constant 10 : index
      %c0_69 = arith.constant 0 : index
      %c0_70 = arith.constant 0 : index
      %165 = vector.load %arg6[%c10, %c0_69, %c0_70] : memref<49x2x256xf32, #tpu.memory_space<vmem>>, vector<1x2x256xf32>
      %166 = vector.shape_cast %165 : vector<1x2x256xf32> to vector<2x256xf32>
      %167 = arith.mulf %164, %166 : vector<2x256xf32>
      %168 = arith.addf %148, %167 : vector<2x256xf32>
      %c31_i32 = arith.constant 31 : i32
      %169 = tpu.dynamic_rotate %117 by %c31_i32 dim 1 : vector<2x256xf32>, i32 -> vector<2x256xf32>
      %c11 = arith.constant 11 : index
      %c0_71 = arith.constant 0 : index
      %c0_72 = arith.constant 0 : index
      %170 = vector.load %arg6[%c11, %c0_71, %c0_72] : memref<49x2x256xf32, #tpu.memory_space<vmem>>, vector<1x2x256xf32>
      %171 = vector.shape_cast %170 : vector<1x2x256xf32> to vector<2x256xf32>
      %172 = arith.mulf %169, %171 : vector<2x256xf32>
      %173 = arith.addf %153, %172 : vector<2x256xf32>
      %c30_i32 = arith.constant 30 : i32
      %174 = tpu.dynamic_rotate %117 by %c30_i32 dim 1 : vector<2x256xf32>, i32 -> vector<2x256xf32>
      %c12 = arith.constant 12 : index
      %c0_73 = arith.constant 0 : index
      %c0_74 = arith.constant 0 : index
      %175 = vector.load %arg6[%c12, %c0_73, %c0_74] : memref<49x2x256xf32, #tpu.memory_space<vmem>>, vector<1x2x256xf32>
      %176 = vector.shape_cast %175 : vector<1x2x256xf32> to vector<2x256xf32>
      %177 = arith.mulf %174, %176 : vector<2x256xf32>
      %178 = arith.addf %158, %177 : vector<2x256xf32>
      %c29_i32 = arith.constant 29 : i32
      %179 = tpu.dynamic_rotate %117 by %c29_i32 dim 1 : vector<2x256xf32>, i32 -> vector<2x256xf32>
      %c13 = arith.constant 13 : index
      %c0_75 = arith.constant 0 : index
      %c0_76 = arith.constant 0 : index
      %180 = vector.load %arg6[%c13, %c0_75, %c0_76] : memref<49x2x256xf32, #tpu.memory_space<vmem>>, vector<1x2x256xf32>
      %181 = vector.shape_cast %180 : vector<1x2x256xf32> to vector<2x256xf32>
      %182 = arith.mulf %179, %181 : vector<2x256xf32>
      %183 = arith.addf %163, %182 : vector<2x256xf32>
      %c19_i32 = arith.constant 19 : i32
      %184 = tpu.dynamic_rotate %117 by %c19_i32 dim 1 : vector<2x256xf32>, i32 -> vector<2x256xf32>
      %c14 = arith.constant 14 : index
      %c0_77 = arith.constant 0 : index
      %c0_78 = arith.constant 0 : index
      %185 = vector.load %arg6[%c14, %c0_77, %c0_78] : memref<49x2x256xf32, #tpu.memory_space<vmem>>, vector<1x2x256xf32>
      %186 = vector.shape_cast %185 : vector<1x2x256xf32> to vector<2x256xf32>
      %187 = arith.mulf %184, %186 : vector<2x256xf32>
      %188 = arith.addf %168, %187 : vector<2x256xf32>
      %c18_i32 = arith.constant 18 : i32
      %189 = tpu.dynamic_rotate %117 by %c18_i32 dim 1 : vector<2x256xf32>, i32 -> vector<2x256xf32>
      %c15 = arith.constant 15 : index
      %c0_79 = arith.constant 0 : index
      %c0_80 = arith.constant 0 : index
      %190 = vector.load %arg6[%c15, %c0_79, %c0_80] : memref<49x2x256xf32, #tpu.memory_space<vmem>>, vector<1x2x256xf32>
      %191 = vector.shape_cast %190 : vector<1x2x256xf32> to vector<2x256xf32>
      %192 = arith.mulf %189, %191 : vector<2x256xf32>
      %193 = arith.addf %173, %192 : vector<2x256xf32>
      %c17_i32 = arith.constant 17 : i32
      %194 = tpu.dynamic_rotate %117 by %c17_i32 dim 1 : vector<2x256xf32>, i32 -> vector<2x256xf32>
      %c16 = arith.constant 16 : index
      %c0_81 = arith.constant 0 : index
      %c0_82 = arith.constant 0 : index
      %195 = vector.load %arg6[%c16, %c0_81, %c0_82] : memref<49x2x256xf32, #tpu.memory_space<vmem>>, vector<1x2x256xf32>
      %196 = vector.shape_cast %195 : vector<1x2x256xf32> to vector<2x256xf32>
      %197 = arith.mulf %194, %196 : vector<2x256xf32>
      %198 = arith.addf %178, %197 : vector<2x256xf32>
      %c16_i32_83 = arith.constant 16 : i32
      %199 = tpu.dynamic_rotate %117 by %c16_i32_83 dim 1 : vector<2x256xf32>, i32 -> vector<2x256xf32>
      %c17 = arith.constant 17 : index
      %c0_84 = arith.constant 0 : index
      %c0_85 = arith.constant 0 : index
      %200 = vector.load %arg6[%c17, %c0_84, %c0_85] : memref<49x2x256xf32, #tpu.memory_space<vmem>>, vector<1x2x256xf32>
      %201 = vector.shape_cast %200 : vector<1x2x256xf32> to vector<2x256xf32>
      %202 = arith.mulf %199, %201 : vector<2x256xf32>
      %203 = arith.addf %183, %202 : vector<2x256xf32>
      %c15_i32 = arith.constant 15 : i32
      %204 = tpu.dynamic_rotate %117 by %c15_i32 dim 1 : vector<2x256xf32>, i32 -> vector<2x256xf32>
      %c18 = arith.constant 18 : index
      %c0_86 = arith.constant 0 : index
      %c0_87 = arith.constant 0 : index
      %205 = vector.load %arg6[%c18, %c0_86, %c0_87] : memref<49x2x256xf32, #tpu.memory_space<vmem>>, vector<1x2x256xf32>
      %206 = vector.shape_cast %205 : vector<1x2x256xf32> to vector<2x256xf32>
      %207 = arith.mulf %204, %206 : vector<2x256xf32>
      %208 = arith.addf %188, %207 : vector<2x256xf32>
      %c14_i32 = arith.constant 14 : i32
      %209 = tpu.dynamic_rotate %117 by %c14_i32 dim 1 : vector<2x256xf32>, i32 -> vector<2x256xf32>
      %c19 = arith.constant 19 : index
      %c0_88 = arith.constant 0 : index
      %c0_89 = arith.constant 0 : index
      %210 = vector.load %arg6[%c19, %c0_88, %c0_89] : memref<49x2x256xf32, #tpu.memory_space<vmem>>, vector<1x2x256xf32>
      %211 = vector.shape_cast %210 : vector<1x2x256xf32> to vector<2x256xf32>
      %212 = arith.mulf %209, %211 : vector<2x256xf32>
      %213 = arith.addf %193, %212 : vector<2x256xf32>
      %c13_i32 = arith.constant 13 : i32
      %214 = tpu.dynamic_rotate %117 by %c13_i32 dim 1 : vector<2x256xf32>, i32 -> vector<2x256xf32>
      %c20 = arith.constant 20 : index
      %c0_90 = arith.constant 0 : index
      %c0_91 = arith.constant 0 : index
      %215 = vector.load %arg6[%c20, %c0_90, %c0_91] : memref<49x2x256xf32, #tpu.memory_space<vmem>>, vector<1x2x256xf32>
      %216 = vector.shape_cast %215 : vector<1x2x256xf32> to vector<2x256xf32>
      %217 = arith.mulf %214, %216 : vector<2x256xf32>
      %218 = arith.addf %198, %217 : vector<2x256xf32>
      %c3_i32_92 = arith.constant 3 : i32
      %219 = tpu.dynamic_rotate %117 by %c3_i32_92 dim 1 : vector<2x256xf32>, i32 -> vector<2x256xf32>
      %c21 = arith.constant 21 : index
      %c0_93 = arith.constant 0 : index
      %c0_94 = arith.constant 0 : index
      %220 = vector.load %arg6[%c21, %c0_93, %c0_94] : memref<49x2x256xf32, #tpu.memory_space<vmem>>, vector<1x2x256xf32>
      %221 = vector.shape_cast %220 : vector<1x2x256xf32> to vector<2x256xf32>
      %222 = arith.mulf %219, %221 : vector<2x256xf32>
      %223 = arith.addf %203, %222 : vector<2x256xf32>
      %c2_i32_95 = arith.constant 2 : i32
      %224 = tpu.dynamic_rotate %117 by %c2_i32_95 dim 1 : vector<2x256xf32>, i32 -> vector<2x256xf32>
      %c22 = arith.constant 22 : index
      %c0_96 = arith.constant 0 : index
      %c0_97 = arith.constant 0 : index
      %225 = vector.load %arg6[%c22, %c0_96, %c0_97] : memref<49x2x256xf32, #tpu.memory_space<vmem>>, vector<1x2x256xf32>
      %226 = vector.shape_cast %225 : vector<1x2x256xf32> to vector<2x256xf32>
      %227 = arith.mulf %224, %226 : vector<2x256xf32>
      %228 = arith.addf %208, %227 : vector<2x256xf32>
      %c1_i32_98 = arith.constant 1 : i32
      %229 = tpu.dynamic_rotate %117 by %c1_i32_98 dim 1 : vector<2x256xf32>, i32 -> vector<2x256xf32>
      %c23 = arith.constant 23 : index
      %c0_99 = arith.constant 0 : index
      %c0_100 = arith.constant 0 : index
      %230 = vector.load %arg6[%c23, %c0_99, %c0_100] : memref<49x2x256xf32, #tpu.memory_space<vmem>>, vector<1x2x256xf32>
      %231 = vector.shape_cast %230 : vector<1x2x256xf32> to vector<2x256xf32>
      %232 = arith.mulf %229, %231 : vector<2x256xf32>
      %233 = arith.addf %213, %232 : vector<2x256xf32>
      %c24 = arith.constant 24 : index
      %c0_101 = arith.constant 0 : index
      %c0_102 = arith.constant 0 : index
      %234 = vector.load %arg6[%c24, %c0_101, %c0_102] : memref<49x2x256xf32, #tpu.memory_space<vmem>>, vector<1x2x256xf32>
      %235 = vector.shape_cast %234 : vector<1x2x256xf32> to vector<2x256xf32>
      %236 = arith.mulf %117, %235 : vector<2x256xf32>
      %237 = arith.addf %218, %236 : vector<2x256xf32>
      %c255_i32 = arith.constant 255 : i32
      %238 = tpu.dynamic_rotate %117 by %c255_i32 dim 1 : vector<2x256xf32>, i32 -> vector<2x256xf32>
      %c25 = arith.constant 25 : index
      %c0_103 = arith.constant 0 : index
      %c0_104 = arith.constant 0 : index
      %239 = vector.load %arg6[%c25, %c0_103, %c0_104] : memref<49x2x256xf32, #tpu.memory_space<vmem>>, vector<1x2x256xf32>
      %240 = vector.shape_cast %239 : vector<1x2x256xf32> to vector<2x256xf32>
      %241 = arith.mulf %238, %240 : vector<2x256xf32>
      %242 = arith.addf %223, %241 : vector<2x256xf32>
      %c254_i32 = arith.constant 254 : i32
      %243 = tpu.dynamic_rotate %117 by %c254_i32 dim 1 : vector<2x256xf32>, i32 -> vector<2x256xf32>
      %c26 = arith.constant 26 : index
      %c0_105 = arith.constant 0 : index
      %c0_106 = arith.constant 0 : index
      %244 = vector.load %arg6[%c26, %c0_105, %c0_106] : memref<49x2x256xf32, #tpu.memory_space<vmem>>, vector<1x2x256xf32>
      %245 = vector.shape_cast %244 : vector<1x2x256xf32> to vector<2x256xf32>
      %246 = arith.mulf %243, %245 : vector<2x256xf32>
      %247 = arith.addf %228, %246 : vector<2x256xf32>
      %c253_i32 = arith.constant 253 : i32
      %248 = tpu.dynamic_rotate %117 by %c253_i32 dim 1 : vector<2x256xf32>, i32 -> vector<2x256xf32>
      %c27 = arith.constant 27 : index
      %c0_107 = arith.constant 0 : index
      %c0_108 = arith.constant 0 : index
      %249 = vector.load %arg6[%c27, %c0_107, %c0_108] : memref<49x2x256xf32, #tpu.memory_space<vmem>>, vector<1x2x256xf32>
      %250 = vector.shape_cast %249 : vector<1x2x256xf32> to vector<2x256xf32>
      %251 = arith.mulf %248, %250 : vector<2x256xf32>
      %252 = arith.addf %233, %251 : vector<2x256xf32>
      %c243_i32 = arith.constant 243 : i32
      %253 = tpu.dynamic_rotate %117 by %c243_i32 dim 1 : vector<2x256xf32>, i32 -> vector<2x256xf32>
      %c28 = arith.constant 28 : index
      %c0_109 = arith.constant 0 : index
      %c0_110 = arith.constant 0 : index
      %254 = vector.load %arg6[%c28, %c0_109, %c0_110] : memref<49x2x256xf32, #tpu.memory_space<vmem>>, vector<1x2x256xf32>
      %255 = vector.shape_cast %254 : vector<1x2x256xf32> to vector<2x256xf32>
      %256 = arith.mulf %253, %255 : vector<2x256xf32>
      %257 = arith.addf %237, %256 : vector<2x256xf32>
      %c242_i32 = arith.constant 242 : i32
      %258 = tpu.dynamic_rotate %117 by %c242_i32 dim 1 : vector<2x256xf32>, i32 -> vector<2x256xf32>
      %c29 = arith.constant 29 : index
      %c0_111 = arith.constant 0 : index
      %c0_112 = arith.constant 0 : index
      %259 = vector.load %arg6[%c29, %c0_111, %c0_112] : memref<49x2x256xf32, #tpu.memory_space<vmem>>, vector<1x2x256xf32>
      %260 = vector.shape_cast %259 : vector<1x2x256xf32> to vector<2x256xf32>
      %261 = arith.mulf %258, %260 : vector<2x256xf32>
      %262 = arith.addf %242, %261 : vector<2x256xf32>
      %c241_i32 = arith.constant 241 : i32
      %263 = tpu.dynamic_rotate %117 by %c241_i32 dim 1 : vector<2x256xf32>, i32 -> vector<2x256xf32>
      %c30 = arith.constant 30 : index
      %c0_113 = arith.constant 0 : index
      %c0_114 = arith.constant 0 : index
      %264 = vector.load %arg6[%c30, %c0_113, %c0_114] : memref<49x2x256xf32, #tpu.memory_space<vmem>>, vector<1x2x256xf32>
      %265 = vector.shape_cast %264 : vector<1x2x256xf32> to vector<2x256xf32>
      %266 = arith.mulf %263, %265 : vector<2x256xf32>
      %267 = arith.addf %247, %266 : vector<2x256xf32>
      %c240_i32 = arith.constant 240 : i32
      %268 = tpu.dynamic_rotate %117 by %c240_i32 dim 1 : vector<2x256xf32>, i32 -> vector<2x256xf32>
      %c31 = arith.constant 31 : index
      %c0_115 = arith.constant 0 : index
      %c0_116 = arith.constant 0 : index
      %269 = vector.load %arg6[%c31, %c0_115, %c0_116] : memref<49x2x256xf32, #tpu.memory_space<vmem>>, vector<1x2x256xf32>
      %270 = vector.shape_cast %269 : vector<1x2x256xf32> to vector<2x256xf32>
      %271 = arith.mulf %268, %270 : vector<2x256xf32>
      %272 = arith.addf %252, %271 : vector<2x256xf32>
      %c239_i32 = arith.constant 239 : i32
      %273 = tpu.dynamic_rotate %117 by %c239_i32 dim 1 : vector<2x256xf32>, i32 -> vector<2x256xf32>
      %c32 = arith.constant 32 : index
      %c0_117 = arith.constant 0 : index
      %c0_118 = arith.constant 0 : index
      %274 = vector.load %arg6[%c32, %c0_117, %c0_118] : memref<49x2x256xf32, #tpu.memory_space<vmem>>, vector<1x2x256xf32>
      %275 = vector.shape_cast %274 : vector<1x2x256xf32> to vector<2x256xf32>
      %276 = arith.mulf %273, %275 : vector<2x256xf32>
      %277 = arith.addf %257, %276 : vector<2x256xf32>
      %c238_i32 = arith.constant 238 : i32
      %278 = tpu.dynamic_rotate %117 by %c238_i32 dim 1 : vector<2x256xf32>, i32 -> vector<2x256xf32>
      %c33 = arith.constant 33 : index
      %c0_119 = arith.constant 0 : index
      %c0_120 = arith.constant 0 : index
      %279 = vector.load %arg6[%c33, %c0_119, %c0_120] : memref<49x2x256xf32, #tpu.memory_space<vmem>>, vector<1x2x256xf32>
      %280 = vector.shape_cast %279 : vector<1x2x256xf32> to vector<2x256xf32>
      %281 = arith.mulf %278, %280 : vector<2x256xf32>
      %282 = arith.addf %262, %281 : vector<2x256xf32>
      %c237_i32 = arith.constant 237 : i32
      %283 = tpu.dynamic_rotate %117 by %c237_i32 dim 1 : vector<2x256xf32>, i32 -> vector<2x256xf32>
      %c34 = arith.constant 34 : index
      %c0_121 = arith.constant 0 : index
      %c0_122 = arith.constant 0 : index
      %284 = vector.load %arg6[%c34, %c0_121, %c0_122] : memref<49x2x256xf32, #tpu.memory_space<vmem>>, vector<1x2x256xf32>
      %285 = vector.shape_cast %284 : vector<1x2x256xf32> to vector<2x256xf32>
      %286 = arith.mulf %283, %285 : vector<2x256xf32>
      %287 = arith.addf %267, %286 : vector<2x256xf32>
      %c227_i32 = arith.constant 227 : i32
      %288 = tpu.dynamic_rotate %117 by %c227_i32 dim 1 : vector<2x256xf32>, i32 -> vector<2x256xf32>
      %c35 = arith.constant 35 : index
      %c0_123 = arith.constant 0 : index
      %c0_124 = arith.constant 0 : index
      %289 = vector.load %arg6[%c35, %c0_123, %c0_124] : memref<49x2x256xf32, #tpu.memory_space<vmem>>, vector<1x2x256xf32>
      %290 = vector.shape_cast %289 : vector<1x2x256xf32> to vector<2x256xf32>
      %291 = arith.mulf %288, %290 : vector<2x256xf32>
      %292 = arith.addf %272, %291 : vector<2x256xf32>
      %c226_i32 = arith.constant 226 : i32
      %293 = tpu.dynamic_rotate %117 by %c226_i32 dim 1 : vector<2x256xf32>, i32 -> vector<2x256xf32>
      %c36 = arith.constant 36 : index
      %c0_125 = arith.constant 0 : index
      %c0_126 = arith.constant 0 : index
      %294 = vector.load %arg6[%c36, %c0_125, %c0_126] : memref<49x2x256xf32, #tpu.memory_space<vmem>>, vector<1x2x256xf32>
      %295 = vector.shape_cast %294 : vector<1x2x256xf32> to vector<2x256xf32>
      %296 = arith.mulf %293, %295 : vector<2x256xf32>
      %297 = arith.addf %277, %296 : vector<2x256xf32>
      %c225_i32 = arith.constant 225 : i32
      %298 = tpu.dynamic_rotate %117 by %c225_i32 dim 1 : vector<2x256xf32>, i32 -> vector<2x256xf32>
      %c37 = arith.constant 37 : index
      %c0_127 = arith.constant 0 : index
      %c0_128 = arith.constant 0 : index
      %299 = vector.load %arg6[%c37, %c0_127, %c0_128] : memref<49x2x256xf32, #tpu.memory_space<vmem>>, vector<1x2x256xf32>
      %300 = vector.shape_cast %299 : vector<1x2x256xf32> to vector<2x256xf32>
      %301 = arith.mulf %298, %300 : vector<2x256xf32>
      %302 = arith.addf %282, %301 : vector<2x256xf32>
      %c224_i32 = arith.constant 224 : i32
      %303 = tpu.dynamic_rotate %117 by %c224_i32 dim 1 : vector<2x256xf32>, i32 -> vector<2x256xf32>
      %c38 = arith.constant 38 : index
      %c0_129 = arith.constant 0 : index
      %c0_130 = arith.constant 0 : index
      %304 = vector.load %arg6[%c38, %c0_129, %c0_130] : memref<49x2x256xf32, #tpu.memory_space<vmem>>, vector<1x2x256xf32>
      %305 = vector.shape_cast %304 : vector<1x2x256xf32> to vector<2x256xf32>
      %306 = arith.mulf %303, %305 : vector<2x256xf32>
      %307 = arith.addf %287, %306 : vector<2x256xf32>
      %c223_i32 = arith.constant 223 : i32
      %308 = tpu.dynamic_rotate %117 by %c223_i32 dim 1 : vector<2x256xf32>, i32 -> vector<2x256xf32>
      %c39 = arith.constant 39 : index
      %c0_131 = arith.constant 0 : index
      %c0_132 = arith.constant 0 : index
      %309 = vector.load %arg6[%c39, %c0_131, %c0_132] : memref<49x2x256xf32, #tpu.memory_space<vmem>>, vector<1x2x256xf32>
      %310 = vector.shape_cast %309 : vector<1x2x256xf32> to vector<2x256xf32>
      %311 = arith.mulf %308, %310 : vector<2x256xf32>
      %312 = arith.addf %292, %311 : vector<2x256xf32>
      %c222_i32 = arith.constant 222 : i32
      %313 = tpu.dynamic_rotate %117 by %c222_i32 dim 1 : vector<2x256xf32>, i32 -> vector<2x256xf32>
      %c40 = arith.constant 40 : index
      %c0_133 = arith.constant 0 : index
      %c0_134 = arith.constant 0 : index
      %314 = vector.load %arg6[%c40, %c0_133, %c0_134] : memref<49x2x256xf32, #tpu.memory_space<vmem>>, vector<1x2x256xf32>
      %315 = vector.shape_cast %314 : vector<1x2x256xf32> to vector<2x256xf32>
      %316 = arith.mulf %313, %315 : vector<2x256xf32>
      %317 = arith.addf %297, %316 : vector<2x256xf32>
      %c221_i32 = arith.constant 221 : i32
      %318 = tpu.dynamic_rotate %117 by %c221_i32 dim 1 : vector<2x256xf32>, i32 -> vector<2x256xf32>
      %c41 = arith.constant 41 : index
      %c0_135 = arith.constant 0 : index
      %c0_136 = arith.constant 0 : index
      %319 = vector.load %arg6[%c41, %c0_135, %c0_136] : memref<49x2x256xf32, #tpu.memory_space<vmem>>, vector<1x2x256xf32>
      %320 = vector.shape_cast %319 : vector<1x2x256xf32> to vector<2x256xf32>
      %321 = arith.mulf %318, %320 : vector<2x256xf32>
      %322 = arith.addf %302, %321 : vector<2x256xf32>
      %c211_i32 = arith.constant 211 : i32
      %323 = tpu.dynamic_rotate %117 by %c211_i32 dim 1 : vector<2x256xf32>, i32 -> vector<2x256xf32>
      %c42 = arith.constant 42 : index
      %c0_137 = arith.constant 0 : index
      %c0_138 = arith.constant 0 : index
      %324 = vector.load %arg6[%c42, %c0_137, %c0_138] : memref<49x2x256xf32, #tpu.memory_space<vmem>>, vector<1x2x256xf32>
      %325 = vector.shape_cast %324 : vector<1x2x256xf32> to vector<2x256xf32>
      %326 = arith.mulf %323, %325 : vector<2x256xf32>
      %327 = arith.addf %307, %326 : vector<2x256xf32>
      %c210_i32 = arith.constant 210 : i32
      %328 = tpu.dynamic_rotate %117 by %c210_i32 dim 1 : vector<2x256xf32>, i32 -> vector<2x256xf32>
      %c43 = arith.constant 43 : index
      %c0_139 = arith.constant 0 : index
      %c0_140 = arith.constant 0 : index
      %329 = vector.load %arg6[%c43, %c0_139, %c0_140] : memref<49x2x256xf32, #tpu.memory_space<vmem>>, vector<1x2x256xf32>
      %330 = vector.shape_cast %329 : vector<1x2x256xf32> to vector<2x256xf32>
      %331 = arith.mulf %328, %330 : vector<2x256xf32>
      %332 = arith.addf %312, %331 : vector<2x256xf32>
      %c209_i32 = arith.constant 209 : i32
      %333 = tpu.dynamic_rotate %117 by %c209_i32 dim 1 : vector<2x256xf32>, i32 -> vector<2x256xf32>
      %c44 = arith.constant 44 : index
      %c0_141 = arith.constant 0 : index
      %c0_142 = arith.constant 0 : index
      %334 = vector.load %arg6[%c44, %c0_141, %c0_142] : memref<49x2x256xf32, #tpu.memory_space<vmem>>, vector<1x2x256xf32>
      %335 = vector.shape_cast %334 : vector<1x2x256xf32> to vector<2x256xf32>
      %336 = arith.mulf %333, %335 : vector<2x256xf32>
      %337 = arith.addf %317, %336 : vector<2x256xf32>
      %c208_i32 = arith.constant 208 : i32
      %338 = tpu.dynamic_rotate %117 by %c208_i32 dim 1 : vector<2x256xf32>, i32 -> vector<2x256xf32>
      %c45 = arith.constant 45 : index
      %c0_143 = arith.constant 0 : index
      %c0_144 = arith.constant 0 : index
      %339 = vector.load %arg6[%c45, %c0_143, %c0_144] : memref<49x2x256xf32, #tpu.memory_space<vmem>>, vector<1x2x256xf32>
      %340 = vector.shape_cast %339 : vector<1x2x256xf32> to vector<2x256xf32>
      %341 = arith.mulf %338, %340 : vector<2x256xf32>
      %342 = arith.addf %322, %341 : vector<2x256xf32>
      %c207_i32 = arith.constant 207 : i32
      %343 = tpu.dynamic_rotate %117 by %c207_i32 dim 1 : vector<2x256xf32>, i32 -> vector<2x256xf32>
      %c46 = arith.constant 46 : index
      %c0_145 = arith.constant 0 : index
      %c0_146 = arith.constant 0 : index
      %344 = vector.load %arg6[%c46, %c0_145, %c0_146] : memref<49x2x256xf32, #tpu.memory_space<vmem>>, vector<1x2x256xf32>
      %345 = vector.shape_cast %344 : vector<1x2x256xf32> to vector<2x256xf32>
      %346 = arith.mulf %343, %345 : vector<2x256xf32>
      %347 = arith.addf %327, %346 : vector<2x256xf32>
      %c206_i32 = arith.constant 206 : i32
      %348 = tpu.dynamic_rotate %117 by %c206_i32 dim 1 : vector<2x256xf32>, i32 -> vector<2x256xf32>
      %c47 = arith.constant 47 : index
      %c0_147 = arith.constant 0 : index
      %c0_148 = arith.constant 0 : index
      %349 = vector.load %arg6[%c47, %c0_147, %c0_148] : memref<49x2x256xf32, #tpu.memory_space<vmem>>, vector<1x2x256xf32>
      %350 = vector.shape_cast %349 : vector<1x2x256xf32> to vector<2x256xf32>
      %351 = arith.mulf %348, %350 : vector<2x256xf32>
      %352 = arith.addf %332, %351 : vector<2x256xf32>
      %c205_i32 = arith.constant 205 : i32
      %353 = tpu.dynamic_rotate %117 by %c205_i32 dim 1 : vector<2x256xf32>, i32 -> vector<2x256xf32>
      %c48 = arith.constant 48 : index
      %c0_149 = arith.constant 0 : index
      %c0_150 = arith.constant 0 : index
      %354 = vector.load %arg6[%c48, %c0_149, %c0_150] : memref<49x2x256xf32, #tpu.memory_space<vmem>>, vector<1x2x256xf32>
      %355 = vector.shape_cast %354 : vector<1x2x256xf32> to vector<2x256xf32>
      %356 = arith.mulf %353, %355 : vector<2x256xf32>
      %357 = arith.addf %337, %356 : vector<2x256xf32>
      %358 = arith.addf %357, %342 : vector<2x256xf32>
      %359 = arith.addf %347, %352 : vector<2x256xf32>
      %360 = arith.addf %358, %359 : vector<2x256xf32>
      %cst_151 = arith.constant dense<0.000000e+00> : vector<256xf32>
      %361 = vector.multi_reduction <add>, %360, %cst_151 [0] : vector<2x256xf32> to vector<256xf32>
      %362 = vector.shape_cast %361 : vector<256xf32> to vector<1x256xf32>
      %363 = arith.negf %362 : vector<1x256xf32>
      %364 = math.exp %363 : vector<1x256xf32>
      %cst_152 = arith.constant 1.000000e+00 : f32
      %365 = vector.broadcast %cst_152 : f32 to vector<1x256xf32>
      %366 = arith.addf %365, %364 : vector<1x256xf32>
      %367 = arith.divf %365, %366 : vector<1x256xf32>
      %368 = vector.broadcast %367 : vector<1x256xf32> to vector<48x256xf32>
      %369 = arith.mulf %100, %368 : vector<48x256xf32>
      %c17_i32_153 = arith.constant 17 : i32
      %370 = tpu.dynamic_rotate %369 by %c17_i32_153 dim 1 : vector<48x256xf32>, i32 -> vector<48x256xf32>
      %c0_154 = arith.constant 0 : index
      %c0_155 = arith.constant 0 : index
      %371 = vector.load %arg7[%c0_154, %c0_155] : memref<9x256xf32, #tpu.memory_space<vmem>>, vector<1x256xf32>
      %372 = vector.broadcast %371 : vector<1x256xf32> to vector<48x256xf32>
      %373 = arith.mulf %370, %372 : vector<48x256xf32>
      %374 = arith.truncf %373 : vector<48x256xf32> to vector<48x256xbf16>
      %c0_156 = arith.constant 0 : index
      %c0_157 = arith.constant 0 : index
      %375 = vector.load %arg12[%c0_156, %c0_157] : memref<448x256xbf16, #tpu.memory_space<vmem>>, vector<48x256xbf16>
      tpu.vector_store %arg12[%c0_156, %c0_157], %374 {strides = array<i32>} : memref<448x256xbf16, #tpu.memory_space<vmem>>, vector<48x256xbf16>,
      %c16_i32_158 = arith.constant 16 : i32
      %376 = tpu.dynamic_rotate %369 by %c16_i32_158 dim 1 : vector<48x256xf32>, i32 -> vector<48x256xf32>
      %c1_159 = arith.constant 1 : index
      %c0_160 = arith.constant 0 : index
      %377 = vector.load %arg7[%c1_159, %c0_160] : memref<9x256xf32, #tpu.memory_space<vmem>>, vector<1x256xf32>
      %378 = vector.broadcast %377 : vector<1x256xf32> to vector<48x256xf32>
      %379 = arith.mulf %376, %378 : vector<48x256xf32>
      %380 = arith.truncf %379 : vector<48x256xf32> to vector<48x256xbf16>
      %c48_161 = arith.constant 48 : index
      %c0_162 = arith.constant 0 : index
      %381 = vector.load %arg12[%c48_161, %c0_162] : memref<448x256xbf16, #tpu.memory_space<vmem>>, vector<48x256xbf16>
      tpu.vector_store %arg12[%c48_161, %c0_162], %380 {strides = array<i32>} : memref<448x256xbf16, #tpu.memory_space<vmem>>, vector<48x256xbf16>,
      %c15_i32_163 = arith.constant 15 : i32
      %382 = tpu.dynamic_rotate %369 by %c15_i32_163 dim 1 : vector<48x256xf32>, i32 -> vector<48x256xf32>
      %c2_164 = arith.constant 2 : index
      %c0_165 = arith.constant 0 : index
      %383 = vector.load %arg7[%c2_164, %c0_165] : memref<9x256xf32, #tpu.memory_space<vmem>>, vector<1x256xf32>
      %384 = vector.broadcast %383 : vector<1x256xf32> to vector<48x256xf32>
      %385 = arith.mulf %382, %384 : vector<48x256xf32>
      %386 = arith.truncf %385 : vector<48x256xf32> to vector<48x256xbf16>
      %c96 = arith.constant 96 : index
      %c0_166 = arith.constant 0 : index
      %387 = vector.load %arg12[%c96, %c0_166] : memref<448x256xbf16, #tpu.memory_space<vmem>>, vector<48x256xbf16>
      tpu.vector_store %arg12[%c96, %c0_166], %386 {strides = array<i32>} : memref<448x256xbf16, #tpu.memory_space<vmem>>, vector<48x256xbf16>,
      %c1_i32_167 = arith.constant 1 : i32
      %388 = tpu.dynamic_rotate %369 by %c1_i32_167 dim 1 : vector<48x256xf32>, i32 -> vector<48x256xf32>
      %c3_168 = arith.constant 3 : index
      %c0_169 = arith.constant 0 : index
      %389 = vector.load %arg7[%c3_168, %c0_169] : memref<9x256xf32, #tpu.memory_space<vmem>>, vector<1x256xf32>
      %390 = vector.broadcast %389 : vector<1x256xf32> to vector<48x256xf32>
      %391 = arith.mulf %388, %390 : vector<48x256xf32>
      %392 = arith.truncf %391 : vector<48x256xf32> to vector<48x256xbf16>
      %c144 = arith.constant 144 : index
      %c0_170 = arith.constant 0 : index
      %393 = vector.load %arg12[%c144, %c0_170] : memref<448x256xbf16, #tpu.memory_space<vmem>>, vector<48x256xbf16>
      tpu.vector_store %arg12[%c144, %c0_170], %392 {strides = array<i32>} : memref<448x256xbf16, #tpu.memory_space<vmem>>, vector<48x256xbf16>,
      %c4_171 = arith.constant 4 : index
      %c0_172 = arith.constant 0 : index
      %394 = vector.load %arg7[%c4_171, %c0_172] : memref<9x256xf32, #tpu.memory_space<vmem>>, vector<1x256xf32>
      %395 = vector.broadcast %394 : vector<1x256xf32> to vector<48x256xf32>
      %396 = arith.mulf %369, %395 : vector<48x256xf32>
      %397 = arith.truncf %396 : vector<48x256xf32> to vector<48x256xbf16>
      %c192 = arith.constant 192 : index
      %c0_173 = arith.constant 0 : index
      %398 = vector.load %arg12[%c192, %c0_173] : memref<448x256xbf16, #tpu.memory_space<vmem>>, vector<48x256xbf16>
      tpu.vector_store %arg12[%c192, %c0_173], %397 {strides = array<i32>} : memref<448x256xbf16, #tpu.memory_space<vmem>>, vector<48x256xbf16>,
      %c255_i32_174 = arith.constant 255 : i32
      %399 = tpu.dynamic_rotate %369 by %c255_i32_174 dim 1 : vector<48x256xf32>, i32 -> vector<48x256xf32>
      %c5_175 = arith.constant 5 : index
      %c0_176 = arith.constant 0 : index
      %400 = vector.load %arg7[%c5_175, %c0_176] : memref<9x256xf32, #tpu.memory_space<vmem>>, vector<1x256xf32>
      %401 = vector.broadcast %400 : vector<1x256xf32> to vector<48x256xf32>
      %402 = arith.mulf %399, %401 : vector<48x256xf32>
      %403 = arith.truncf %402 : vector<48x256xf32> to vector<48x256xbf16>
      %c240 = arith.constant 240 : index
      %c0_177 = arith.constant 0 : index
      %404 = vector.load %arg12[%c240, %c0_177] : memref<448x256xbf16, #tpu.memory_space<vmem>>, vector<48x256xbf16>
      tpu.vector_store %arg12[%c240, %c0_177], %403 {strides = array<i32>} : memref<448x256xbf16, #tpu.memory_space<vmem>>, vector<48x256xbf16>,
      %c241_i32_178 = arith.constant 241 : i32
      %405 = tpu.dynamic_rotate %369 by %c241_i32_178 dim 1 : vector<48x256xf32>, i32 -> vector<48x256xf32>
      %c6_179 = arith.constant 6 : index
      %c0_180 = arith.constant 0 : index
      %406 = vector.load %arg7[%c6_179, %c0_180] : memref<9x256xf32, #tpu.memory_space<vmem>>, vector<1x256xf32>
      %407 = vector.broadcast %406 : vector<1x256xf32> to vector<48x256xf32>
      %408 = arith.mulf %405, %407 : vector<48x256xf32>
      %409 = arith.truncf %408 : vector<48x256xf32> to vector<48x256xbf16>
      %c288 = arith.constant 288 : index
      %c0_181 = arith.constant 0 : index
      %410 = vector.load %arg12[%c288, %c0_181] : memref<448x256xbf16, #tpu.memory_space<vmem>>, vector<48x256xbf16>
      tpu.vector_store %arg12[%c288, %c0_181], %409 {strides = array<i32>} : memref<448x256xbf16, #tpu.memory_space<vmem>>, vector<48x256xbf16>,
      %c240_i32_182 = arith.constant 240 : i32
      %411 = tpu.dynamic_rotate %369 by %c240_i32_182 dim 1 : vector<48x256xf32>, i32 -> vector<48x256xf32>
      %c7_183 = arith.constant 7 : index
      %c0_184 = arith.constant 0 : index
      %412 = vector.load %arg7[%c7_183, %c0_184] : memref<9x256xf32, #tpu.memory_space<vmem>>, vector<1x256xf32>
      %413 = vector.broadcast %412 : vector<1x256xf32> to vector<48x256xf32>
      %414 = arith.mulf %411, %413 : vector<48x256xf32>
      %415 = arith.truncf %414 : vector<48x256xf32> to vector<48x256xbf16>
      %c336 = arith.constant 336 : index
      %c0_185 = arith.constant 0 : index
      %416 = vector.load %arg12[%c336, %c0_185] : memref<448x256xbf16, #tpu.memory_space<vmem>>, vector<48x256xbf16>
      tpu.vector_store %arg12[%c336, %c0_185], %415 {strides = array<i32>} : memref<448x256xbf16, #tpu.memory_space<vmem>>, vector<48x256xbf16>,
      %c239_i32_186 = arith.constant 239 : i32
      %417 = tpu.dynamic_rotate %369 by %c239_i32_186 dim 1 : vector<48x256xf32>, i32 -> vector<48x256xf32>
      %c8_187 = arith.constant 8 : index
      %c0_188 = arith.constant 0 : index
      %418 = vector.load %arg7[%c8_187, %c0_188] : memref<9x256xf32, #tpu.memory_space<vmem>>, vector<1x256xf32>
      %419 = vector.broadcast %418 : vector<1x256xf32> to vector<48x256xf32>
      %420 = arith.mulf %417, %419 : vector<48x256xf32>
      %421 = arith.truncf %420 : vector<48x256xf32> to vector<48x256xbf16>
      %c384 = arith.constant 384 : index
      %c0_189 = arith.constant 0 : index
      %422 = vector.load %arg12[%c384, %c0_189] : memref<448x256xbf16, #tpu.memory_space<vmem>>, vector<48x256xbf16>
      tpu.vector_store %arg12[%c384, %c0_189], %421 {strides = array<i32>} : memref<448x256xbf16, #tpu.memory_space<vmem>>, vector<48x256xbf16>,
      %c0_190 = arith.constant 0 : index
      %c0_191 = arith.constant 0 : index
      %423 = vector.load %arg8[%c0_190, %c0_191] : memref<128x448xbf16, #tpu.memory_space<vmem>>, vector<128x448xbf16>
      %c0_192 = arith.constant 0 : index
      %c0_193 = arith.constant 0 : index
      %424 = vector.load %arg12[%c0_192, %c0_193] : memref<448x256xbf16, #tpu.memory_space<vmem>>, vector<448x256xbf16>
      %cst_194 = arith.constant dense<0.000000e+00> : vector<128x256xf32>
      %425 = tpu.matmul %423, %424, %cst_194 {dimension_numbers = #tpu.dot_dimension_numbers<[1], [0], [0], [1], [0, 0, 1, 1], [], []>} : vector<128x448xbf16>, vector<448x256xbf16>, vector<128x256xf32> -> vector<128x256xf32>
      %426 = vector.extract_strided_slice %425 {offsets = [0, 0], sizes = [32, 256], strides = [1, 1]} : vector<128x256xf32> to vector<32x256xf32>
      %427 = arith.negf %426 : vector<32x256xf32>
      %428 = math.exp %427 : vector<32x256xf32>
      %cst_195 = arith.constant 1.000000e+00 : f32
      %429 = vector.broadcast %cst_195 : f32 to vector<32x256xf32>
      %430 = arith.addf %429, %428 : vector<32x256xf32>
      %431 = arith.divf %429, %430 : vector<32x256xf32>
      %432 = vector.extract_strided_slice %425 {offsets = [32, 0], sizes = [32, 256], strides = [1, 1]} : vector<128x256xf32> to vector<32x256xf32>
      %433 = arith.negf %432 : vector<32x256xf32>
      %434 = math.exp %433 : vector<32x256xf32>
      %cst_196 = arith.constant 1.000000e+00 : f32
      %435 = vector.broadcast %cst_196 : f32 to vector<32x256xf32>
      %436 = arith.addf %435, %434 : vector<32x256xf32>
      %437 = arith.divf %435, %436 : vector<32x256xf32>
      %438 = vector.extract_strided_slice %425 {offsets = [64, 0], sizes = [32, 256], strides = [1, 1]} : vector<128x256xf32> to vector<32x256xf32>
      %439 = vector.extract_strided_slice %425 {offsets = [96, 0], sizes = [32, 256], strides = [1, 1]} : vector<128x256xf32> to vector<32x256xf32>
      %440 = arith.negf %439 : vector<32x256xf32>
      %441 = math.exp %440 : vector<32x256xf32>
      %cst_197 = arith.constant 1.000000e+00 : f32
      %442 = vector.broadcast %cst_197 : f32 to vector<32x256xf32>
      %443 = arith.addf %442, %441 : vector<32x256xf32>
      %444 = arith.divf %442, %443 : vector<32x256xf32>
      %445 = arith.mulf %437, %26 : vector<32x256xf32>
      %446 = arith.mulf %431, %438 : vector<32x256xf32>
      %447 = arith.addf %445, %446 : vector<32x256xf32>
      %448 = math.tanh %447 : vector<32x256xf32>
      %449 = arith.mulf %444, %448 : vector<32x256xf32>
      %c0_198 = arith.constant 0 : index
      %450 = arith.index_cast %arg13 : i32 to index
      %c0_199 = arith.constant 0 : index
      %c0_200 = arith.constant 0 : index
      %451 = vector.load %arg9[%c0_198, %450, %c0_199, %c0_200] : memref<1x8x32x256xf32, #tpu.memory_space<vmem>>, vector<1x1x32x256xf32>
      %452 = vector.shape_cast %451 : vector<1x1x32x256xf32> to vector<32x256xf32>
      %453 = vector.shape_cast %449 : vector<32x256xf32> to vector<1x1x32x256xf32>
      tpu.vector_store %arg9[%c0_198, %450, %c0_199, %c0_200], %453 {strides = array<i32>} : memref<1x8x32x256xf32, #tpu.memory_space<vmem>>, vector<1x1x32x256xf32>,
      %c16_201 = arith.constant 16 : index
      %c0_202 = arith.constant 0 : index
      %454 = vector.load %arg10[%c16_201, %c0_202] : memref<48x256xf32, #tpu.memory_space<vmem>>, vector<32x256xf32>
      tpu.vector_store %arg10[%c16_201, %c0_202], %449 {strides = array<i32>} : memref<48x256xf32, #tpu.memory_space<vmem>>, vector<32x256xf32>,
      %c0_203 = arith.constant 0 : index
      %c0_204 = arith.constant 0 : index
      %455 = vector.load %arg11[%c0_203, %c0_204] : memref<32x256xf32, #tpu.memory_space<vmem>>, vector<32x256xf32>
      tpu.vector_store %arg11[%c0_203, %c0_204], %447 {strides = array<i32>} : memref<32x256xf32, #tpu.memory_space<vmem>>, vector<32x256xf32>,
    }
    %c8_i32_7 = arith.constant 8 : i32
    return
  }
  func.func @transform_0(%arg0: i32) -> (i32, i32, i32, i32) {
    %c0_i32 = arith.constant 0 : i32
    %c0_i32_0 = arith.constant 0 : i32
    %c0_i32_1 = arith.constant 0 : i32
    %c0_i32_2 = arith.constant 0 : i32
    return %arg0, %c0_i32, %c0_i32_0, %c0_i32_1 : i32, i32, i32, i32
  }
  func.func @transform_1(%arg0: i32) -> (i32, i32) {
    %c0_i32 = arith.constant 0 : i32
    %c0_i32_0 = arith.constant 0 : i32
    %c0_i32_1 = arith.constant 0 : i32
    return %c0_i32, %c0_i32_0 : i32, i32
  }
  func.func @transform_2(%arg0: i32) -> (i32, i32) {
    %c0_i32 = arith.constant 0 : i32
    %c0_i32_0 = arith.constant 0 : i32
    %c0_i32_1 = arith.constant 0 : i32
    return %c0_i32, %c0_i32_0 : i32, i32
  }
  func.func @transform_3(%arg0: i32) -> (i32, i32) {
    %c0_i32 = arith.constant 0 : i32
    %c0_i32_0 = arith.constant 0 : i32
    %c0_i32_1 = arith.constant 0 : i32
    return %c0_i32, %c0_i32_0 : i32, i32
  }
  func.func @transform_4(%arg0: i32) -> (i32, i32) {
    %c0_i32 = arith.constant 0 : i32
    %c0_i32_0 = arith.constant 0 : i32
    %c0_i32_1 = arith.constant 0 : i32
    return %c0_i32, %c0_i32_0 : i32, i32
  }
  func.func @transform_5(%arg0: i32) -> (i32, i32, i32) {
    %c0_i32 = arith.constant 0 : i32
    %c0_i32_0 = arith.constant 0 : i32
    %c0_i32_1 = arith.constant 0 : i32
    %c0_i32_2 = arith.constant 0 : i32
    return %c0_i32, %c0_i32_0, %c0_i32_1 : i32, i32, i32
  }
  func.func @transform_6(%arg0: i32) -> (i32, i32) {
    %c0_i32 = arith.constant 0 : i32
    %c0_i32_0 = arith.constant 0 : i32
    %c0_i32_1 = arith.constant 0 : i32
    return %c0_i32, %c0_i32_0 : i32, i32
  }
  func.func @transform_7(%arg0: i32) -> (i32, i32) {
    %c0_i32 = arith.constant 0 : i32
    %c0_i32_0 = arith.constant 0 : i32
    %c0_i32_1 = arith.constant 0 : i32
    return %c0_i32, %c0_i32_0 : i32, i32
  }
  func.func @transform_8(%arg0: i32) -> (i32, i32, i32, i32) {
    %c0_i32 = arith.constant 0 : i32
    %c0_i32_0 = arith.constant 0 : i32
    %c0_i32_1 = arith.constant 0 : i32
    %c0_i32_2 = arith.constant 0 : i32
    return %arg0, %c0_i32, %c0_i32_0, %c0_i32_1 : i32, i32, i32, i32
  }
}

</mosaic_0001>

<bundles_post_ra>
// kernel: conv_lstm_block.1
= control target key start
LH: loop header
LB: loop body
LE: loop exit
PB: predicated region body
PF: predicated region fallthrough
CT: control target
= control target key end

     0   :  { %13 = vsyncpa [#allocation6], 0  ;;  %s6770_s0 = inlined_call_operand.vmem [shape: f32[2,8,8,256], index: 0, kind: input, shape index: {}]   ;;  %s6771_s1 = inlined_call_operand.hbm [shape: f32[4,48], index: 1, kind: input, shape index: {}]   ;;  %s6772_s2 = inlined_call_operand.vmem [shape: f32[4,1], index: 2, kind: input, shape index: {}]   ;;  %s6773_s3 = inlined_call_operand.vmem [shape: f32[48,4], index: 3, kind: input, shape index: {}]   ;;  %s6774_s4 = inlined_call_operand.vmem [shape: f32[48,1], index: 4, kind: input, shape index: {}]   ;;  %s6775_s5 = inlined_call_operand.hbm [shape: f32[49,2,256], index: 5, kind: input, shape index: {}]   ;;  %s6776_s6 = inlined_call_operand.hbm [shape: f32[9,256], index: 6, kind: input, shape index: {}]   ;;  %s6777_s7 = inlined_call_operand.vmem [shape: bf16[128,448], index: 7, kind: input, shape index: {}]   ;;  %s6778_s8 = inlined_call_operand.vmem [shape: f32[2,8,32,256], index: 8, kind: output, shape index: {}]  }
   0x1   :  { %14 = vsyncpa [#allocation8], 0  ;;  %s4463_s27 = smov 0  }
   0x2 LB: > { %s4358_s28 = smov [#allocation7]   ;;  %s4469_s30 = sadd.s32 4294967295, %s4352_s27   ;;  %s4352_s27 = sphi %s4463_s27, %s20_s27  }
   0x3   : > { %s256_s29 = sshll.u32 %s4358_s28, 4  ;;  %p3671_p0 = scmp.ge.s32.totalorder %s4352_s27, 1  ;;  %s4474_s29 = int_to_ptr.vmem [resolvable:$true] %s256_s29 }
   0x4   : > { %p224_p1 = scmp.lt.s32.totalorder %s4352_s27, 3  ;;  %p3926_p2 = scmp.eq.s32.totalorder %s4469_s30, 0 }
   0x5   : > { %s4359_s10 = smov [#allocation5]   ;;  %s4360_s13 = smov [#allocation9]  }
   0x6   : > { %p4476_p3 = pnand %p3671_p0, %p224_p1  ;;  %s237_s11 = sshll.u32 %s4359_s10, 4  ;;  %s4482_s11 = int_to_ptr.vmem [resolvable:$true] %s237_s11 }
   0x7   : > { %s269_s14 = sshll.u32 %s4360_s13, 4  ;;  %s4250_s17 = scalar_lea.hbm %s6775_s5, 3136  ;;  %s4490_s14 = int_to_ptr.vmem [resolvable:$true] %s269_s14 }
   0x8   : > { %p3916_p4 = pneg %p4476_p3  ;;  %p4251_p6 = scmp.ne.s32.totalorder %s6775_s5, %s4250_s17 }
   0x9   : > { %p4257_p10 = scmp.lt.u32.totalorder %s4250_s17, %s6775_s5 }
   0xa   : > { %p4486_p5 = pnand %p3926_p2, %p3916_p4 }
   0xc   : > { %p4500_p7 = pneg %p4486_p5 }
   0xe   : > { %p4253_p8 = pnand %p4500_p7, %p4251_p6 }
  0x10   : > { %p4254_p9 = pneg %p4253_p8 }
  0x12   : > { %p4259_p11 = pnand %p4257_p10, %p4254_p9 }
  0x14   : > { %4262 = shalt.err (!%p4259_p11)
}
  0x15   : > { %s4263_s23 = scalar_lea.vmem %s4474_s29, 3136  ;;  %p4271_p1 = scmp.lt.s32.totalorder %s4474_s29, %s4474_s29 }
  0x16   : > { %p4264_p12 = scmp.ne.s32.totalorder %s4474_s29, %s4263_s23  ;;  %p4272_p4 = scmp.lt.s32.totalorder %s4263_s23, %s4263_s23 }
  0x18   : > { %p4266_p13 = pnand %p4264_p12, %p4500_p7  ;;  %p4273_p6 = por %p4272_p4, %p4271_p1 }
  0x1a   : > { %p4267_p0 = pneg %p4266_p13 }
  0x1c   : > { %p4274_p8 = pnand %p4273_p6, %p4267_p0 }
  0x1e   : > { %4277 = shalt.err (!%p4274_p8)
}
  0x1f   : > { %s4361_s24 = smov 64   ;;  %s4362_s25 = smov 4  }
  0x20   : > { %3922 = dma.hbm_to_vmem [thread:$0]  (!%p4486_p5), %s6775_s5, 3136, %s4474_s29, [#allocation8], %s4361_s24, %s4361_s24, %s4362_s25  }
  0x21   : > { %s4278_s15 = scalar_lea.hbm %s6771_s1, 64 }
  0x22   : > { %p4279_p9 = scmp.ne.s32.totalorder %s6771_s1, %s4278_s15  ;;  %p4285_p12 = scmp.lt.u32.totalorder %s4278_s15, %s6771_s1 }
  0x24   : > { %p4281_p10 = pnand %p4279_p9, %p4500_p7 }
  0x26   : > { %p4282_p11 = pneg %p4281_p10 }
  0x28   : > { %p4287_p13 = pnand %p4285_p12, %p4282_p11 }
  0x2a   : > { %4290 = shalt.err (!%p4287_p13)
}
  0x2b   : > { %s4291_s29 = scalar_lea.vmem %s4482_s11, 64  ;;  %p4299_p6 = scmp.lt.s32.totalorder %s4482_s11, %s4482_s11 }
  0x2c   : > { %p4292_p0 = scmp.ne.s32.totalorder %s4482_s11, %s4291_s29  ;;  %p4300_p8 = scmp.lt.s32.totalorder %s4291_s29, %s4291_s29 }
  0x2e   : > { %p4294_p1 = pnand %p4292_p0, %p4500_p7  ;;  %p4301_p9 = por %p4300_p8, %p4299_p6 }
  0x30   : > { %p4295_p4 = pneg %p4294_p1 }
  0x32   : > { %p4302_p10 = pnand %p4301_p9, %p4295_p4 }
  0x34   : > { %4305 = shalt.err (!%p4302_p10)
}
  0x35   : > { %3919 = dma.hbm_to_vmem [thread:$0]  (!%p4486_p5), %s6771_s1, 64, %s4482_s11, [#allocation6]  }
  0x36   : > { %s4306_s25 = scalar_lea.hbm %s6776_s6, 512 }
  0x37   : > { %p4307_p11 = scmp.ne.s32.totalorder %s6776_s6, %s4306_s25  ;;  %p4313_p0 = scmp.lt.u32.totalorder %s4306_s25, %s6776_s6 }
  0x39   : > { %p4309_p12 = pnand %p4307_p11, %p4500_p7 }
  0x3b   : > { %p4310_p13 = pneg %p4309_p12 }
  0x3d   : > { %p4315_p1 = pnand %p4313_p0, %p4310_p13 }
  0x3f   : > { %4318 = shalt.err (!%p4315_p1)
}
  0x40   : > { %s4319_s11 = scalar_lea.vmem %s4490_s14, 512  ;;  %p4327_p9 = scmp.lt.s32.totalorder %s4490_s14, %s4490_s14 }
  0x41   : > { %p4320_p4 = scmp.ne.s32.totalorder %s4490_s14, %s4319_s11  ;;  %p4328_p10 = scmp.lt.s32.totalorder %s4319_s11, %s4319_s11 }
  0x43   : > { %p4322_p6 = pnand %p4320_p4, %p4500_p7  ;;  %p4329_p11 = por %p4328_p10, %p4327_p9 }
  0x45   : > { %p4323_p8 = pneg %p4322_p6 }
  0x47   : > { %p4330_p12 = pnand %p4329_p11, %p4323_p8 }
  0x49   : > { %4333 = shalt.err (!%p4330_p12)
}
  0x4a   : > { %s4363_s15 = smov 256   ;;  %s4364_s16 = smov 16  }
  0x4b   : > { %3925 = dma.hbm_to_vmem [thread:$0]  (!%p4486_p5), %s6776_s6, 512, %s4490_s14, [#allocation8], %s4363_s15, %s4363_s15, %s4364_s16  }
  0x4c   : > { %296 = sbr.rel (%p4476_p3) target bundleno = 2193 (0x891), region = 52 }
  0x53   : > { %4343 = dma.done.wait (%p3926_p2), [#allocation6], 64  }
  0x54   : > { %4345 = vsyncadd (%p3926_p2), [#allocation6], 4294967232 }
  0x55   : > { %4347 = dma.done.wait (%p3926_p2), [#allocation8], 3648  }
  0x56   : > { %4349 = vsyncadd (%p3926_p2), [#allocation8], 4294963648  ;;  %p338_p7 = scmp.lt.s32.totalorder %s4469_s30, 1  ;;  %v367_v0 = vlaneseq  ;;  %v4365_v1 = vmov 0.0  }
  0x57   : > { %349 = vst [vmem:[#allocation2 + $0x10] sm:$0xff] %v4365_v1  ;;  %350 = vst [vmem:[#allocation2 + $0x18] sm:$0xff] %v4365_v1 }
  0x58   : > { %351 = vst [vmem:[#allocation2 + $0x20] sm:$0xff] %v4365_v1  ;;  %352 = vst [vmem:[#allocation2 + $0x28] sm:$0xff] %v4365_v1  ;;  %s7087_s30 = smov (!%p338_p7, %s4469_s30), 1  ;;  %v4581_v2 = vshrl.u32 %v367_v0, 7  ;;  %v4583_v3 = vand.u32 127, %v367_v0 }
  0x59   : > { %353 = vst [vmem:[#allocation2 + $0x30] sm:$0xff] %v4365_v1  ;;  %354 = vst [vmem:[#allocation2 + $0x38] sm:$0xff] %v4365_v1  ;;  %s3819_s9 = sshll.u32 %s7087_s30, 7  ;;  %s3820_s12 = sshll.u32 %s7087_s30, 9 }
  0x5a   : > { %355 = vst [vmem:[#allocation2 + $0x40] sm:$0xff] %v4365_v1  ;;  %356 = vst [vmem:[#allocation2 + $0x48] sm:$0xff] %v4365_v1  ;;  %vm6870_vm0 = vcmp.eq.s32.totalorder %v4581_v2, 0  ;;  %s4590_s19 = scalar_lea.vmem %s6770_s0, %s3819_s9  ;;  %s4595_s22 = scalar_lea.vmem %s6778_s8, %s3820_s12 }
  0x5b   : > { %357 = vst [vmem:[#allocation2 + $0x50] sm:$0xff] %v4365_v1  ;;  %358 = vst [vmem:[#allocation2 + $0x58] sm:$0xff] %v4365_v1  ;;  %v372_v4 = vsel %vm6870_vm0, 1.0, %v4365_v1  ;;  %s4599_s30 = smov 0  }
  0x5c   : > { %359 = vst [vmem:[#allocation3] sm:$0xff] %v4365_v1  ;;  %360 = vst [vmem:[#allocation3 + $0x8] sm:$0xff] %v4365_v1  ;;  %v374_v5 = vpack.c.bf16 %v4365_v1, %v372_v4 }
  0x5d   : > { %361 = vst [vmem:[#allocation3 + $0x10] sm:$0xff] %v4365_v1  ;;  %362 = vst [vmem:[#allocation3 + $0x18] sm:$0xff] %v4365_v1 }
  0x5e   : > { %363 = vst [vmem:[#allocation3 + $0x20] sm:$0xff] %v4365_v1  ;;  %364 = vst [vmem:[#allocation3 + $0x28] sm:$0xff] %v4365_v1 }
  0x5f   : > { %365 = vst [vmem:[#allocation3 + $0x30] sm:$0xff] %v4365_v1  ;;  %366 = vst [vmem:[#allocation3 + $0x38] sm:$0xff] %v4365_v1 }
  0x60   : > { %6876 = vst [vmem:[#allocation12_spill] sm:$0xff] %v4581_v2  ;;  %375 = vst [vmem:[#allocation4 + $0x1b0] sm:$0xff] %v374_v5 }
  0x61   : > { %376 = vst [vmem:[#allocation4 + $0x1b8] sm:$0xff] %v374_v5 }
  0x62 LB: >> { %v4604_v6 = vld [vmem:[#allocation2 + $0x20] sm:$0xff]  ;;  %v4606_v7 = vld [vmem:[#allocation2 + $0x28] sm:$0xff]  ;;  %v4610_v9 = vld [vmem:[#allocation2 + $0x30] sm:$0xff]  ;;  %s3821_s23 = sshll.u32 %s4356_s30, 4  ;;  %vm4367_vm2 = vmmov 0   ;;  %vm630_vm3 = vcmp.eq.s32.totalorder %v4583_v3, 1  ;;  %s4356_s30 = sphi %s4599_s30, %s406_s30  }
  0x63   : >> { %v465_v8 = vmax.f32 %v4604_v6, %v4606_v7  ;;  %v4612_v10 = vld [vmem:[#allocation2 + $0x38] sm:$0xff]  ;;  %v4615_v11 = vld [vmem:[#allocation2 + $0x10] sm:$0xff]  ;;  %s409_s24 = scalar_lea.vmem %s4590_s19, %s3821_s23  ;;  %v4632_v19 = vld [vmem:[#allocation2 + $0x40] sm:$0xff]  ;;  %v481_v24 = vmul.f32 %v4604_v6, %v4604_v6  ;;  %v482_v25 = vmul.f32 %v4606_v7, %v4606_v7  ;;  %v483_v32 = vmul.f32 %v4610_v9, %v4610_v9  ;;  %s4370_s17 = smov 51  }
  0x64   : >> { %v4617_v12 = vld [vmem:[#allocation2 + $0x18] sm:$0xff]  ;;  %v4619_v13 = vld [vmem:[#allocation2 + $0x50] sm:$0xff]  ;;  %v468_v14 = vmax.f32 %v4610_v9, %v4612_v10  ;;  %v4626_v16 = vld [vmem:[%s409_s24] sm:$0xff]  ;;  %v479_v26 = vmul.f32 %v4615_v11, %v4615_v11  ;;  %v484_v33 = vmul.f32 %v4612_v10, %v4612_v10  ;;  %vm621_vm10 = vcmp.eq.s32.totalorder %v4583_v3, 0  ;;  %s4371_s18 = smov 47   ;;  %s4372_s9 = smov 50  }
  0x65   : >> { %466 = vmax.xlane.f32.xlu1 %v465_v8  ;;  %v4624_v15 = vld [vmem:[#allocation2 + $0x58] sm:$0xff]  ;;  %v4628_v17 = vld [vmem:[%s409_s24 + $0x8] sm:$0xff]  ;;  %v462_v21 = vmax.f32 %v4615_v11, %v4617_v12  ;;  %v480_v27 = vmul.f32 %v4617_v12, %v4617_v12  ;;  %v495_v28 = vadd.f32 %v482_v25, %v481_v24  ;;  %v477_v30 = vmul.f32 %v4626_v16, %v4626_v16  ;;  %s4373_s12 = smov 49   ;;  %s4374_s14 = smov 48  }
  0x66   : >> { %v459_v18 = vmax.f32 %v4626_v16, %v4628_v17  ;;  %v4634_v20 = vld [vmem:[#allocation2 + $0x48] sm:$0xff]  ;;  %v474_v22 = vmax.f32 %v4619_v13, %v4624_v15  ;;  %v478_v31 = vmul.f32 %v4628_v17, %v4628_v17  ;;  %v498_v35 = vadd.f32 %v484_v33, %v483_v32  ;;  %s4375_s20 = smov 46   ;;  %s4376_s29 = smov 45  }
  0x67   : >> { %v6877_v2 = vld [vmem:[#allocation12_spill] sm:$0xff]  ;;  %v471_v23 = vmax.f32 %v4632_v19, %v4634_v20  ;;  %v492_v29 = vadd.f32 %v480_v27, %v479_v26  ;;  %v487_v32 = vmul.f32 %v4619_v13, %v4619_v13  ;;  %v488_v33 = vmul.f32 %v4624_v15, %v4624_v15  ;;  %s4377_s21 = smov 35   ;;  %s4378_s23 = smov 34  }
  0x68   : >> { %460 = vmax.xlane.f32.xlu0 %v459_v18  ;;  %v489_v34 = vadd.f32 %v478_v31, %v477_v30  ;;  %v485_v18 = vmul.f32 %v4632_v19, %v4632_v19  ;;  %vm645_vm12 = vcmp.eq.s32.totalorder %v4583_v3, 2  ;;  %vm660_vm15 = vcmp.eq.s32.totalorder %v4583_v3, 3  ;;  %s4379_s24 = smov 33   ;;  %s4380_s25 = smov 32  }
  0x69   : >> { %469 = vmax.xlane.f32.xlu1 %v468_v14  ;;  %vm6886_vm1 = vcmp.lt.s32.totalorder %v6877_v2, 4  ;;  %vm6891_vm0 = vcmp.eq.s32.totalorder %v6877_v2, 0  ;;  %s4381_s26 = smov 31   ;;  %s4382_s28 = smov 30  }
  0x6a   : >> { %s4383_s10 = smov 29   ;;  %s4384_s13 = smov 19   ;;  %v5180_v2 = vld.sshfl [vmem:[#allocation7 + $0x14] sm:$0x33 pattern:$0x76325410] }
  0x6b   : >> { %s4385_s11 = smov 18   ;;  %s4386_s15 = smov 17  }
  0x6c   : >> { %463 = vmax.xlane.f32.xlu0 %v462_v21  ;;  %v486_v21 = vmul.f32 %v4634_v20, %v4634_v20  ;;  %s4387_s16 = smov 16  }
  0x6d   : >> { %475 = vmax.xlane.f32.xlu1 %v474_v22 }
  0x6e   : >> { %v501_v27 = vadd.f32 %v486_v21, %v485_v18 }
  0x70   : >> { %472 = vmax.xlane.f32.xlu0 %v471_v23 }
  0x71   : >> { %493 = vadd.xlane.f32.xlu1 %v492_v29 }
  0x74   : >> { %496 = vadd.xlane.f32.xlu0 %v495_v28 }
  0x75   : >> { %499 = vadd.xlane.f32.xlu1 %v498_v35 }
  0x78   : >> { %490 = vadd.xlane.f32.xlu0 %v489_v34 }
  0xf2   : >> { %v4658_v36 = vpop.xlane.xlu1 %466 }
  0xf3   : >> { %v553_v37 = vsub.f32 %v4604_v6, %v4658_v36  ;;  %v554_v38 = vsub.f32 %v4606_v7, %v4658_v36 }
  0xf5   : >> { %v569_v39 = vmul.f32 1.442695, %v553_v37  ;;  %v571_v40 = vmul.f32 1.442695, %v554_v38  ;;  %v4664_v41 = vpop.xlane.xlu0 %460  ;;  %v504_v38 = vadd.f32 %v488_v33, %v487_v32 }
  0xf6   : >> { %v4666_v42 = vpop.xlane.xlu1 %469  ;;  %v549_v43 = vsub.f32 %v4626_v16, %v4664_v41  ;;  %v550_v44 = vsub.f32 %v4628_v17, %v4664_v41 }
  0xf7   : >> { %4058 = vpow2.f32 %v569_v39  ;;  %v555_v45 = vsub.f32 %v4610_v9, %v4666_v42  ;;  %v556_v46 = vsub.f32 %v4612_v10, %v4666_v42  ;;  %v434_v39 = vadd.f32 %v4628_v17, %v4626_v16 }
  0xf8   : >> { %4060 = vpow2.f32 %v571_v40  ;;  %v561_v47 = vmul.f32 1.442695, %v549_v43  ;;  %v563_v48 = vmul.f32 1.442695, %v550_v44  ;;  %v440_v44 = vadd.f32 %v4606_v7, %v4604_v6 }
  0xf9   : >> { %v573_v49 = vmul.f32 1.442695, %v555_v45  ;;  %v4676_v50 = vpop.xlane.xlu0 %463  ;;  %v575_v51 = vmul.f32 1.442695, %v556_v46  ;;  %v437_v45 = vadd.f32 %v4617_v12, %v4615_v11  ;;  %v446_v46 = vadd.f32 %v4634_v20, %v4632_v19 }
  0xfa   : >> { %4062 = vpow2.f32 %v561_v47  ;;  %v551_v52 = vsub.f32 %v4615_v11, %v4676_v50  ;;  %v552_v53 = vsub.f32 %v4617_v12, %v4676_v50  ;;  %v4682_v54 = vpop.xlane.xlu1 %475  ;;  %v443_v47 = vadd.f32 %v4612_v10, %v4610_v9 }
  0xfb   : >> { %4064 = vpow2.f32 %v563_v48  ;;  %v559_v60 = vsub.f32 %v4619_v13, %v4682_v54  ;;  %v560_v61 = vsub.f32 %v4624_v15, %v4682_v54  ;;  %v449_v48 = vadd.f32 %v4624_v15, %v4619_v13 }
  0xfc   : >> { %v565_v55 = vmul.f32 1.442695, %v551_v52  ;;  %v567_v56 = vmul.f32 1.442695, %v552_v53  ;;  %4066 = vpow2.f32 %v573_v49  ;;  %v4366_v49 = vmov 0.0|0.0  }
  0xfd   : >> { %4068 = vpow2.f32 %v575_v51  ;;  %v4684_v57 = vpop.xlane.xlu0 %472  ;;  %v581_v5 = vmul.f32 1.442695, %v559_v60  ;;  %v583_v8 = vmul.f32 1.442695, %v560_v61  ;;  %3863 = vmatprep.subr.bf16.mxu0 %v4366_v49  ;;  %v4368_v51 = vmov 0.0  }
  0xfe   : >> { %4070 = vpow2.f32 %v565_v55  ;;  %v557_v58 = vsub.f32 %v4632_v19, %v4684_v57  ;;  %v558_v59 = vsub.f32 %v4634_v20, %v4684_v57  ;;  %3849 = vmatprep.mubr.msk.f32.mxu0 %vm4367_vm2, %v4368_v51  ;;  %v676_v52 = vld [vmem:[%s6772_s2] sm:$0xf]  ;;  %v4369_v53 = vmov 0  }
  0xff   : >> { %4072 = vpow2.f32 %v567_v56  ;;  %4008 = vset.pattern.permute.xlu0 %v4369_v53  ;;  %4009 = vset.pattern.permute.xlu1 %v4369_v53  ;;  %v4718_v56 = vpop.xlane.xlu1 %493 }
 0x100   : >> { %v577_v63 = vmul.f32 1.442695, %v557_v58  ;;  %v579_v0 = vmul.f32 1.442695, %v558_v59  ;;  %vm516_vm5 = vcmp.eq.f32.partialorder %v4718_v56, inf  ;;  %vm518_vm9 = vcmp.eq.f32.partialorder %v4718_v56, 0.0 }
 0x101   : >> { %v4059_v62 = vpop.eup %4058  ;;  %v497_v55 = vpop.xlane.xlu0 %496 }
 0x102   : >> { %v4061_v1 = vpop.eup %4060  ;;  %4074 = vpow2.f32 %v577_v63  ;;  %vm523_vm4 = vcmp.eq.f32.partialorder %v497_v55, inf  ;;  %vm525_vm6 = vcmp.eq.f32.partialorder %v497_v55, 0.0 }
 0x103   : >> { %v591_v4 = vadd.f32 %v4061_v1, %v4059_v62  ;;  %4076 = vpow2.f32 %v579_v0  ;;  %v4723_v59 = vpop.xlane.xlu1 %499 }
 0x104   : >> { %v4063_v14 = vpop.eup %4062  ;;  %4078 = vpow2.f32 %v581_v5  ;;  %vm530_vm8 = vcmp.eq.f32.partialorder %v4723_v59, inf  ;;  %vm532_vm13 = vcmp.eq.f32.partialorder %v4723_v59, 0.0 }
 0x105   : >> { %592 = vadd.xlane.f32.xlu0 %v591_v4  ;;  %v4065_v22 = vpop.eup %4064  ;;  %4080 = vpow2.f32 %v583_v8  ;;  %v4720_v58 = vpop.xlane.xlu0 %490 }
 0x106   : >> { %v4067_v23 = vpop.eup %4066  ;;  %v585_v24 = vadd.f32 %v4065_v22, %v4063_v14  ;;  %4082 = vrsqrt.f32 %v497_v55  ;;  %v4736_v22 = vsel %vm630_vm3, %v4658_v36, 0.0  ;;  %vm509_vm7 = vcmp.eq.f32.partialorder %v4720_v58, inf }
 0x107   : >> { %v4069_v25 = vpop.eup %4068  ;;  %4084 = vrsqrt.f32 %v4718_v56  ;;  %vm511_vm11 = vcmp.eq.f32.partialorder %v4720_v58, 0.0 }
 0x108   : >> { %v4071_v26 = vpop.eup %4070  ;;  %v594_v31 = vadd.f32 %v4069_v25, %v4067_v23  ;;  %4086 = vrsqrt.f32 %v4720_v58  ;;  %v633_v23 = vsel %vm630_vm3, %v4664_v41, 0.0 }
 0x109   : >> { %586 = vadd.xlane.f32.xlu0 %v585_v24  ;;  %v4073_v28 = vpop.eup %4072  ;;  %4088 = vrsqrt.f32 %v4723_v59  ;;  %v526_v24 = vand.u32 2147483648, %v497_v55 }
 0x10a   : >> { %v588_v29 = vadd.f32 %v4073_v28, %v4071_v26  ;;  %v519_v26 = vand.u32 2147483648, %v4718_v56 }
 0x10c   : >> { %v4075_v30 = vpop.eup %4074  ;;  %589 = vadd.xlane.f32.xlu1 %v588_v29 }
 0x10d   : >> { %502 = vadd.xlane.f32.xlu0 %v501_v27  ;;  %v4077_v34 = vpop.eup %4076 }
 0x10e   : >> { %v597_v35 = vadd.f32 %v4077_v34, %v4075_v30  ;;  %v4079_v37 = vpop.eup %4078  ;;  %v512_v34 = vand.u32 2147483648, %v4720_v58 }
 0x10f   : >> { %v4081_v40 = vpop.eup %4080 }
 0x110   : >> { %595 = vadd.xlane.f32.xlu1 %v594_v31  ;;  %v600_v43 = vadd.f32 %v4081_v40, %v4079_v37  ;;  %v4083_v62 = vpop.eup %4082  ;;  %v634_v37 = vsel %vm630_vm3, %v4676_v50, 0.0 }
 0x111   : >> { %598 = vadd.xlane.f32.xlu0 %v597_v35  ;;  %v4085_v63 = vpop.eup %4084  ;;  %v522_v5 = vmul.f32 %v4083_v62, %v497_v55 }
 0x112   : >> { %v4087_v4 = vpop.eup %4086  ;;  %v515_v8 = vmul.f32 %v4085_v63, %v4718_v56 }
 0x113   : >> { %v4089_v21 = vpop.eup %4088  ;;  %v508_v25 = vmul.f32 %v4087_v4, %v4720_v58  ;;  %v524_v27 = vsel %vm523_vm4, %v497_v55, %v522_v5  ;;  %v637_v4 = vsel %vm630_vm3, %v4684_v57, 0.0 }
 0x114   : >> { %505 = vadd.xlane.f32.xlu1 %v504_v38  ;;  %v517_v28 = vsel %vm516_vm5, %v4718_v56, %v515_v8  ;;  %v529_v31 = vmul.f32 %v4089_v21, %v4723_v59  ;;  %v4759_v38 = vsel %vm630_vm3, %v4666_v42, 0.0  ;;  %vm682_vm5 = vcmask 392192  }
 0x115   : >> { %435 = vadd.xlane.f32.xlu0 %v434_v39  ;;  %v510_v39 = vsel %vm509_vm7, %v4720_v58, %v508_v25  ;;  %v520_v53 = vsel %vm518_vm9, %v519_v26, %v517_v28  ;;  %vm779_vm7 = vcmask 31744   ;;  %vm1051_vm9 = vcmp.lt.s32.totalorder %v4583_v3, 51 }
 0x118   : >> { %601 = vadd.xlane.f32.xlu1 %v600_v43  ;;  %v527_v43 = vsel %vm525_vm6, %v526_v24, %v524_v27  ;;  %vm763_vm6 = vcmask 27648  }
 0x119   : >> { %441 = vadd.xlane.f32.xlu0 %v440_v44  ;;  %v533_v44 = vand.u32 2147483648, %v4723_v59  ;;  %v650_v63 = vsel %vm645_vm12, %v527_v43, 0.0 }
 0x11c   : >> { %438 = vadd.xlane.f32.xlu1 %v437_v45  ;;  %v4771_v45 = vsel %vm630_vm3, %v4682_v54, 0.0 }
 0x11d   : >> { %447 = vadd.xlane.f32.xlu0 %v446_v46 }
 0x120   : >> { %444 = vadd.xlane.f32.xlu1 %v443_v47 }
 0x124   : >> { %450 = vadd.xlane.f32.xlu1 %v449_v48 }
 0x133   : >> { %679 = vperm.xlu0 %4008, %v676_v52   ;;  %v531_v52 = vsel %vm530_vm8, %v4723_v59, %v529_v31  ;;  %vm798_vm8 = vcmask 1043456  }
 0x134   : >> { %v534_v8 = vsel %vm532_vm13, %v533_v44, %v531_v52  ;;  %vm1162_vm13 = vcmp.lt.s32.totalorder %v4583_v3, 46 }
 0x192   : >> { %v593_v60 = vpop.xlane.xlu0 %592 }
 0x193   : >> { %4090 = vlog2.f32 %v593_v60 }
 0x196   : >> { %v587_v61 = vpop.xlane.xlu0 %586 }
 0x197   : >> { %4092 = vlog2.f32 %v587_v61  ;;  %v513_v61 = vsel %vm511_vm11, %v512_v34, %v510_v39  ;;  %vm1072_vm11 = vcmp.lt.s32.totalorder %v4583_v3, 50 }
 0x198   : >> { %v648_v24 = vsel %vm645_vm12, %v513_v61, 0.0 }
 0x199   : >> { %v590_v0 = vpop.xlane.xlu1 %589 }
 0x19a   : >> { %v4727_v1 = vpop.xlane.xlu0 %502  ;;  %4094 = vlog2.f32 %v590_v0 }
 0x19b   : >> { %4096 = vrsqrt.f32 %v4727_v1  ;;  %vm537_vm14 = vcmp.eq.f32.partialorder %v4727_v1, inf  ;;  %vm539_vm2 = vcmp.eq.f32.partialorder %v4727_v1, 0.0  ;;  %v540_v31 = vand.u32 2147483648, %v4727_v1 }
 0x19d   : >> { %v596_v14 = vpop.xlane.xlu1 %595  ;;  %v4091_v32 = vpop.eup %4090 }
 0x19e   : >> { %v599_v18 = vpop.xlane.xlu0 %598  ;;  %4098 = vlog2.f32 %v596_v14  ;;  %v608_v5 = vmul.f32 0.6931472, %v4091_v32  ;;  %v649_v14 = vsel %vm645_vm12, %v520_v53, 0.0 }
 0x19f   : >> { %4100 = vlog2.f32 %v599_v18 }
 0x1a0   : >> { %v617_v34 = vadd.f32 %v608_v5, %v4658_v36 }
 0x1a1   : >> { %v4745_v29 = vpop.xlane.xlu1 %505  ;;  %v4093_v35 = vpop.eup %4092 }
 0x1a2   : >> { %v436_v30 = vpop.xlane.xlu0 %435  ;;  %4102 = vrsqrt.f32 %v4745_v29  ;;  %v604_v55 = vmul.f32 0.6931472, %v4093_v35  ;;  %vm544_vm3 = vcmp.eq.f32.partialorder %v4745_v29, inf  ;;  %vm546_vm4 = vcmp.eq.f32.partialorder %v4745_v29, 0.0 }
 0x1a3   : >> { %v453_v33 = vmul.f32 0.00390625, %v436_v30 }
 0x1a4   : >> { %v4095_v40 = vpop.eup %4094  ;;  %v615_v26 = vadd.f32 %v604_v55, %v4664_v41 }
 0x1a5   : >> { %v4097_v46 = vpop.eup %4096  ;;  %v624_v47 = vsel %vm621_vm10, %v453_v33, 0.0  ;;  %v602_v48 = vpop.xlane.xlu1 %601  ;;  %v606_v62 = vmul.f32 0.6931472, %v4095_v40 }
 0x1a6   : >> { %v442_v51 = vpop.xlane.xlu0 %441  ;;  %4104 = vlog2.f32 %v602_v48  ;;  %v536_v0 = vmul.f32 %v4097_v46, %v4727_v1  ;;  %v639_v56 = vadd.f32 %v633_v23, %v624_v47  ;;  %v547_v46 = vand.u32 2147483648, %v4745_v29 }
 0x1a7   : >> { %v455_v60 = vmul.f32 0.00390625, %v442_v51  ;;  %v616_v32 = vadd.f32 %v606_v62, %v4676_v50 }
 0x1a8   : >> { %v4099_v59 = vpop.eup %4098  ;;  %v538_v30 = vsel %vm537_vm14, %v4727_v1, %v536_v0  ;;  %v654_v40 = vadd.f32 %v648_v24, %v639_v56  ;;  %vm1116_vm14 = vcmp.lt.s32.totalorder %v4583_v3, 48 }
 0x1a9   : >> { %v626_v58 = vsel %vm621_vm10, %v455_v60, 0.0  ;;  %v439_v18 = vpop.xlane.xlu1 %438  ;;  %v4101_v27 = vpop.eup %4100  ;;  %v610_v28 = vmul.f32 0.6931472, %v4099_v59  ;;  %v541_v50 = vsel %vm539_vm2, %v540_v31, %v538_v30  ;;  %v664_v52 = vsel %vm660_vm15, %v616_v32, 0.0 }
 0x1aa   : >> { %v448_v21 = vpop.xlane.xlu0 %447  ;;  %v454_v25 = vmul.f32 0.00390625, %v439_v18  ;;  %v641_v35 = vadd.f32 %v4736_v22, %v626_v58  ;;  %v663_v22 = vsel %vm660_vm15, %v615_v26, 0.0  ;;  %v652_v58 = vsel %vm645_vm12, %v541_v50, 0.0  ;;  %v758_v50 = vld [vmem:[%s6773_s3 + $0x8] sm:$0xff] }
 0x1ab   : >> { %v457_v23 = vmul.f32 0.00390625, %v448_v21  ;;  %v618_v48 = vadd.f32 %v610_v28, %v4666_v42  ;;  %v669_v61 = vadd.f32 %v663_v22, %v654_v40  ;;  %v651_v42 = vsel %vm645_vm12, %v534_v8, 0.0  ;;  %v761_v22 = vld [vmem:[%s6773_s3 + $0x20] sm:$0xff] }
 0x1ac   : >> { %v4103_v33 = vpop.eup %4102  ;;  %v625_v39 = vsel %vm621_vm10, %v454_v25, 0.0  ;;  %v656_v55 = vadd.f32 %v650_v63, %v641_v35  ;;  %v665_v63 = vsel %vm660_vm15, %v617_v34, 0.0  ;;  %v675_v34 = vld [vmem:[#allocation5] sm:$0xf]  ;;  %vm1210_vm2 = vcmp.lt.s32.totalorder %v4583_v3, 35 }
 0x1ad   : >> { %v640_v43 = vadd.f32 %v634_v37, %v625_v39  ;;  %v445_v44 = vpop.xlane.xlu1 %444  ;;  %v543_v41 = vmul.f32 %v4103_v33, %v4745_v29  ;;  %v628_v36 = vsel %vm621_vm10, %v457_v23, 0.0  ;;  %v612_v37 = vmul.f32 0.6931472, %v4101_v27 }
 0x1ae   : >> { %v456_v47 = vmul.f32 0.00390625, %v445_v44  ;;  %v643_v0 = vadd.f32 %v637_v4, %v628_v36  ;;  %v671_v26 = vadd.f32 %v665_v63, %v656_v55  ;;  %v759_v36 = vld [vmem:[%s6773_s3 + $0x10] sm:$0xff]  ;;  %v770_v55 = vld [vmem:[%s6774_s4 + $0x18] sm:$0xff] }
 0x1af   : >> { %v655_v51 = vadd.f32 %v649_v14, %v640_v43  ;;  %v545_v60 = vsel %vm544_vm3, %v4745_v29, %v543_v41  ;;  %v619_v4 = vadd.f32 %v612_v37, %v4684_v57  ;;  %v666_v29 = vsel %vm660_vm15, %v618_v48, 0.0  ;;  %v762_v48 = vld [vmem:[%s6773_s3 + $0x28] sm:$0xff] }
 0x1b0   : >> { %v4105_v53 = vpop.eup %4104  ;;  %v627_v1 = vsel %vm621_vm10, %v456_v47, 0.0  ;;  %v548_v21 = vsel %vm546_vm4, %v547_v46, %v545_v60  ;;  %v658_v8 = vadd.f32 %v652_v58, %v643_v0  ;;  %v757_v46 = vld [vmem:[%s6773_s3] sm:$0xff]  ;;  %v760_v47 = vld [vmem:[%s6773_s3 + $0x18] sm:$0xff]  ;;  %v768_v37 = vld [vmem:[%s6774_s4 + $0x8] sm:$0xff]  ;;  %v776_v0 = vmul.f32 4.0, %v770_v55 }
 0x1b1   : >> { %v614_v62 = vmul.f32 0.6931472, %v4105_v53  ;;  %v642_v59 = vadd.f32 %v4759_v38, %v627_v1  ;;  %v451_v5 = vpop.xlane.xlu1 %450  ;;  %v670_v56 = vadd.f32 %v664_v52, %v655_v51  ;;  %v653_v28 = vsel %vm645_vm12, %v548_v21, 0.0  ;;  %v767_v51 = vld [vmem:[%s6774_s4] sm:$0xff]  ;;  %v769_v1 = vld [vmem:[%s6774_s4 + $0x10] sm:$0xff] }
 0x1b2   : >> { %v458_v14 = vmul.f32 0.00390625, %v451_v5  ;;  %v680_v35 = vpop.permute.xlu0 %679  ;;  %v774_v52 = vmul.f32 4.0, %v768_v37  ;;  %v773_v53 = vmul.f32 4.0, %v767_v51  ;;  %v775_v5 = vmul.f32 4.0, %v769_v1 }
 0x1b3   : >> { %v657_v18 = vadd.f32 %v651_v42, %v642_v59  ;;  %v3864_v24 = vpack.c.bf16 %v670_v56, %v669_v61  ;;  %v620_v38 = vadd.f32 %v614_v62, %v4682_v54  ;;  %v667_v54 = vsel %vm660_vm15, %v619_v4, 0.0  ;;  %v772_v56 = vld [vmem:[%s6774_s4 + $0x28] sm:$0xff]  ;;  %v771_v4 = vld [vmem:[%s6774_s4 + $0x20] sm:$0xff] }
 0x1b4   : >> { %v629_v25 = vsel %vm621_vm10, %v458_v14, 0.0  ;;  %v673_v32 = vadd.f32 %v667_v54, %v658_v8  ;;  %v778_v21 = vmul.f32 4.0, %v772_v56  ;;  %vm1138_vm10 = vcmp.lt.s32.totalorder %v4583_v3, 47 }
 0x1b5   : >> { %v644_v23 = vadd.f32 %v4771_v45, %v629_v25  ;;  %3865 = vmatpush3.bf16.msra.mxu0 %v3864_v24  ;;  %v672_v27 = vadd.f32 %v666_v29, %v657_v18  ;;  %v668_v31 = vsel %vm660_vm15, %v620_v38, 0.0  ;;  %vm1094_vm12 = vcmp.lt.s32.totalorder %v4583_v3, 49 }
 0x1b6   : >> { %3866 = vmatprep.subr.bf16.mxu0 %v4366_v49  ;;  %vm1186_vm15 = vcmp.lt.s32.totalorder %v4583_v3, 45  ;;  %vm1234_vm3 = vcmp.lt.s32.totalorder %v4583_v3, 34  ;;  %vm1258_vm4 = vcmp.lt.s32.totalorder %v4583_v3, 33 }
 0x1b7   : >> { %v659_v57 = vadd.f32 %v653_v28, %v644_v23  ;;  %v3867_v30 = vpack.c.bf16 %v672_v27, %v671_v26  ;;  %v777_v23 = vmul.f32 4.0, %v771_v4 }
 0x1b9   : >> { %3868 = vmatpush3.bf16.msra.mxu0 %v3867_v30  ;;  %v674_v33 = vadd.f32 %v668_v31, %v659_v57 }
 0x1ba   : >> { %3869 = vmatprep.subr.bf16.mxu0 %v4366_v49 }
 0x1bb   : >> { %v3870_v45 = vpack.c.bf16 %v674_v33, %v673_v32 }
 0x1bd   : >> { %3871 = vmatpush3.bf16.msra.mxu0 %v3870_v45 }
 0x1c0   : >> { %3850 = vmatmul.mubr.msk.f32.vlgmr.msra.gmra.mrb[0].mxu0 %vm682_vm5, %v675_v34  ;;  %vm1282_vm5 = vcmp.lt.s32.totalorder %v4583_v3, 32 }
 0x1c1   : >> { %3854 = vmatprep.mubr.msk.f32.mxu0 %vm779_vm7, %v757_v46 }
 0x293   : >> { %v752_v39 = vpop.f32.mrb[0].mxu0 }
 0x294   : >> { %v753_v40 = vadd.f32 %v752_v39, %v680_v35  ;;  %v3851_v43 = vpop.f32.mrb[1].mxu0 }
 0x296   : >> { %v756_v44 = vmax.f32 %v753_v40, 0.0 }
 0x298   : >> { %v764_v41 = vsel %vm763_vm6, %v756_v44, 0.0  ;;  %vm1306_vm6 = vcmp.lt.s32.totalorder %v4583_v3, 31 }
 0x299   : >> { %765 = vadd.xlane.f32.xlu1 %v764_v41 }
 0x326   : >> { %v766_v49 = vpop.xlane.xlu1 %765 }
 0x327   : >> { %3852 = vmatprep.subr.msk.mxu0 %vm798_vm8, %v766_v49 }
 0x328   : >> { %3853 = vmatpush3.msk.msra.mxu0 %vm798_vm8, %v766_v49  ;;  %vm1354_vm8 = vcmp.lt.s32.totalorder %v4583_v3, 29 }
 0x329   : >> { %3855 = vmatmul.mubr.msk.f32.vlgmr.msra.gmra.mrb[2].mxu0 %vm779_vm7, %v758_v50 }
 0x32a   : >> { %3857 = vmatprep.mubr.msk.f32.mxu0 %vm779_vm7, %v759_v36 }
 0x32d   : >> { %3858 = vmatmul.mubr.msk.f32.gmra.mrb[4].mxu0 %vm779_vm7, %v760_v47 }
 0x32e   : >> { %3860 = vmatprep.mubr.msk.f32.mxu0 %vm779_vm7, %v761_v22 }
 0x331   : >> { %3861 = vmatmul.mubr.msk.f32.gmra.mrb[6].mxu0 %vm779_vm7, %v762_v48  ;;  %vm1330_vm7 = vcmp.lt.s32.totalorder %v4583_v3, 30 }
 0x3fc   : >> { %v3856_v60 = vpop.f32.mrb[2].mxu0 }
 0x3fd   : >> { %v874_v61 = vadd.f32 %v3856_v60, %v774_v52  ;;  %v868_v62 = vpop.f32.mrb[3].mxu0 }
 0x3fe   : >> { %v869_v59 = vadd.f32 %v868_v62, %v773_v53 }
 0x3ff   : >> { %v3695_v42 = vmul.f32 -1.442695, %v874_v61 }
 0x400   : >> { %v3694_v14 = vmul.f32 -1.442695, %v869_v59  ;;  %v3859_v63 = vpop.f32.mrb[4].mxu0 }
 0x401   : >> { %4106 = vpow2.f32 %v3695_v42  ;;  %v884_v58 = vadd.f32 %v3859_v63, %v776_v0  ;;  %v878_v18 = vpop.f32.mrb[5].mxu0 }
 0x402   : >> { %4108 = vpow2.f32 %v3694_v14  ;;  %v879_v24 = vadd.f32 %v878_v18, %v775_v5 }
 0x403   : >> { %v3697_v38 = vmul.f32 -1.442695, %v884_v58 }
 0x404   : >> { %v3862_v25 = vpop.f32.mrb[6].mxu0  ;;  %v3696_v29 = vmul.f32 -1.442695, %v879_v24 }
 0x405   : >> { %4110 = vpow2.f32 %v3697_v38  ;;  %v894_v8 = vadd.f32 %v3862_v25, %v778_v21  ;;  %v888_v26 = vpop.f32.mrb[7].mxu0 }
 0x406   : >> { %4112 = vpow2.f32 %v3696_v29  ;;  %v889_v28 = vadd.f32 %v888_v26, %v777_v23 }
 0x407   : >> { %v3699_v27 = vmul.f32 -1.442695, %v894_v8 }
 0x408   : >> { %v3698_v31 = vmul.f32 -1.442695, %v889_v28 }
 0x409   : >> { %4114 = vpow2.f32 %v3699_v27 }
 0x40b   : >> { %v4107_v57 = vpop.eup %4106 }
 0x40c   : >> { %v4109_v30 = vpop.eup %4108  ;;  %v916_v54 = vadd.f32 1.0, %v4107_v57 }
 0x40d   : >> { %v915_v32 = vadd.f32 1.0, %v4109_v30 }
 0x40e   : >> { %4116 = vrcp.f32 %v916_v54 }
 0x40f   : >> { %v4111_v33 = vpop.eup %4110  ;;  %4118 = vpow2.f32 %v3698_v31 }
 0x410   : >> { %v918_v45 = vadd.f32 1.0, %v4111_v33  ;;  %4120 = vrcp.f32 %v915_v32  ;;  %v4113_v34 = vpop.eup %4112 }
 0x411   : >> { %v917_v39 = vadd.f32 1.0, %v4113_v34 }
 0x412   : >> { %4122 = vrcp.f32 %v918_v45 }
 0x413   : >> { %v4115_v35 = vpop.eup %4114  ;;  %4124 = vrcp.f32 %v917_v39 }
 0x414   : >> { %v920_v43 = vadd.f32 1.0, %v4115_v35 }
 0x416   : >> { %4126 = vrcp.f32 %v920_v43 }
 0x418   : >> { %v4117_v40 = vpop.eup %4116 }
 0x419   : >> { %940 = vperm.xlu1 %4009, %v4117_v40   ;;  %v4119_v44 = vpop.eup %4118 }
 0x41a   : >> { %v4121_v41 = vpop.eup %4120  ;;  %v919_v49 = vadd.f32 1.0, %v4119_v44 }
 0x41c   : >> { %v4123_v46 = vpop.eup %4122  ;;  %4128 = vrcp.f32 %v919_v49 }
 0x41d   : >> { %935 = vperm.xlu1 %4009, %v4121_v41   ;;  %v4125_v50 = vpop.eup %4124 }
 0x420   : >> { %v4127_v36 = vpop.eup %4126 }
 0x421   : >> { %950 = vperm.xlu1 %4009, %v4123_v46  }
 0x425   : >> { %945 = vperm.xlu1 %4009, %v4125_v50  }
 0x426   : >> { %v4129_v47 = vpop.eup %4128 }
 0x429   : >> { %960 = vperm.xlu1 %4009, %v4127_v36  }
 0x42d   : >> { %955 = vperm.xlu1 %4009, %v4129_v47  }
 0x498   : >> { %v941_v22 = vpop.permute.xlu1 %940 }
 0x499   : >> { %v4887_v55 = vmul.f32 %v941_v22, %v4615_v11  ;;  %v4890_v1 = vmul.f32 %v941_v22, %v4617_v12 }
 0x49b   : >> { %6880 = vst [vmem:[#allocation15_spill] sm:$0xff] %v4887_v55  ;;  %6881 = vst [vmem:[#allocation16_spill] sm:$0xff] %v4890_v1 }
 0x49c   : >> { %v936_v48 = vpop.permute.xlu1 %935 }
 0x49d   : >> { %v4881_v51 = vmul.f32 %v936_v48, %v4626_v16  ;;  %v4884_v52 = vmul.f32 %v936_v48, %v4628_v17 }
 0x49f   : >> { %6878 = vst [vmem:[#allocation13_spill] sm:$0xff] %v4881_v51  ;;  %6879 = vst [vmem:[#allocation14_spill] sm:$0xff] %v4884_v52  ;;  %v1021_v16 = vadd.f32 %v4887_v55, %v4881_v51  ;;  %v1032_v17 = vadd.f32 %v4890_v1, %v4884_v52  ;;  %v988_v59 = vsel %vm6886_vm1, %v4884_v52, -inf }
 0x4a0   : >> { %v951_v37 = vpop.permute.xlu1 %950  ;;  %v5168_v52 = vld.sshfl [vmem:[#allocation7 + $0x10] sm:$0x33 pattern:$0x76325410] }
 0x4a1   : >> { %v4917_v5 = vmul.f32 %v951_v37, %v4610_v9  ;;  %v4920_v56 = vmul.f32 %v951_v37, %v4612_v10  ;;  %v5170_v1 = vld.sshfl [vmem:[#allocation7 + $0x4] sm:$0x33 pattern:$0x76325410] }
 0x4a2   : >> { %v5178_v55 = vld.sshfl [vmem:[#allocation7 + $0xc] sm:$0x33 pattern:$0x76325410] }
 0x4a3   : >> { %6887 = vst [vmem:[#allocation21_spill] sm:$0xff] %v4917_v5  ;;  %6888 = vst [vmem:[#allocation22_spill] sm:$0xff] %v4920_v56 }
 0x4a4   : >> { %v946_v53 = vpop.permute.xlu1 %945 }
 0x4a5   : >> { %v4893_v60 = vmul.f32 %v946_v53, %v4604_v6  ;;  %v4896_v61 = vmul.f32 %v946_v53, %v4606_v7  ;;  %v987_v7 = vsel %vm6886_vm1, %v4881_v51, -inf  ;;  %v5176_v51 = vld.sshfl [vmem:[#allocation7 + $0x8] sm:$0x33 pattern:$0x76325410]  ;;  %vm1995_vm1 = vcmp.lt.s32.totalorder %v4583_v3, 94 }
 0x4a7   : >> { %6882 = vst [vmem:[#allocation17_spill] sm:$0xff] %v4893_v60  ;;  %6883 = vst [vmem:[#allocation18_spill] sm:$0xff] %v4896_v61  ;;  %v1022_v0 = vadd.f32 %v1021_v16, %v4893_v60  ;;  %v1033_v11 = vadd.f32 %v1032_v17, %v4896_v61  ;;  %v1010_v42 = vmax.f32 %v988_v59, %v4896_v61  ;;  %v3724_v61 = vld.sshfl [vmem:[#allocation7 + $0x60] sm:$0x33 pattern:$0x76325410] }
 0x4a8   : >> { %v961_v62 = vpop.permute.xlu1 %960 }
 0x4a9   : >> { %v4905_v12 = vmul.f32 %v961_v62, %v4619_v13  ;;  %v4908_v6 = vmul.f32 %v961_v62, %v4624_v15  ;;  %v999_v13 = vmax.f32 %v987_v7, %v4893_v60  ;;  %v1023_v14 = vadd.f32 %v1022_v0, %v4917_v5 }
 0x4aa   : >> { %v1034_v63 = vadd.f32 %v1033_v11, %v4920_v56 }
 0x4ab   : >> { %6884 = vst [vmem:[#allocation19_spill] sm:$0xff] %v4905_v12  ;;  %6885 = vst [vmem:[#allocation20_spill] sm:$0xff] %v4908_v6  ;;  %v1002_v9 = vmax.f32 %v4917_v5, %v4905_v12  ;;  %v1013_v10 = vmax.f32 %v4920_v56, %v4908_v6  ;;  %v5166_v56 = vld.sshfl [vmem:[#allocation7] sm:$0x33 pattern:$0x76325410] }
 0x4ac   : >> { %v956_v15 = vpop.permute.xlu1 %955 }
 0x4ad   : >> { %v4927_v58 = vmul.f32 %v956_v15, %v4632_v19  ;;  %v4930_v18 = vmul.f32 %v956_v15, %v4634_v20 }
 0x4af   : >> { %6889 = vst [vmem:[#allocation23_spill] sm:$0xff] %v4927_v58  ;;  %6890 = vst [vmem:[#allocation24_spill] sm:$0xff] %v4930_v18  ;;  %v1001_v21 = vmax.f32 %v999_v13, %v4927_v58  ;;  %v1012_v24 = vmax.f32 %v1010_v42, %v4930_v18  ;;  %v1024_v4 = vadd.f32 %v1023_v14, %v4927_v58 }
 0x4b0   : >> { %v1035_v38 = vadd.f32 %v1034_v63, %v4930_v18 }
 0x4b1   : >> { %v1003_v25 = vmax.f32 %v1001_v21, %v1002_v9  ;;  %v1014_v19 = vmax.f32 %v1012_v24, %v1013_v10  ;;  %v1025_v29 = vadd.f32 %v1024_v4, %v4905_v12 }
 0x4b2   : >> { %v1036_v20 = vadd.f32 %v1035_v38, %v4908_v6 }
 0x4b3   : >> { %v1004_v8 = vrot.slane %v1003_v25, 4  ;;  %v1015_v23 = vrot.slane %v1014_v19, 4  ;;  %v1026_v26 = vrot.slane %v1025_v29, 4 }
 0x4b4   : >> { %v1037_v27 = vrot.slane %v1036_v20, 4 }
 0x4b5   : >> { %v1005_v28 = vmax.f32 %v1003_v25, %v1004_v8  ;;  %v1016_v57 = vmax.f32 %v1014_v19, %v1015_v23  ;;  %v1027_v30 = vadd.f32 %v1026_v26, %v1025_v29 }
 0x4b6   : >> { %v1038_v54 = vadd.f32 %v1037_v27, %v1036_v20 }
 0x4b7   : >> { %v1006_v31 = vrot.slane %v1005_v28, 2  ;;  %v1017_v32 = vrot.slane %v1016_v57, 2  ;;  %v1028_v33 = vrot.slane %v1027_v30, 2 }
 0x4b8   : >> { %v1039_v45 = vrot.slane %v1038_v54, 2 }
 0x4b9   : >> { %v1007_v34 = vmax.f32 %v1005_v28, %v1006_v31  ;;  %v1018_v35 = vmax.f32 %v1016_v57, %v1017_v32  ;;  %v1029_v39 = vadd.f32 %v1028_v33, %v1027_v30 }
 0x4ba   : >> { %v1040_v40 = vadd.f32 %v1039_v45, %v1038_v54 }
 0x4bb   : >> { %v1008_v43 = vrot.slane %v1007_v34, 1  ;;  %v1019_v44 = vrot.slane %v1018_v35, 1  ;;  %v1030_v41 = vrot.slane %v1029_v39, 1 }
 0x4bc   : >> { %v1041_v46 = vrot.slane %v1040_v40, 1 }
 0x4bd   : >> { %v1031_v49 = vadd.f32 %v1030_v41, %v1029_v39  ;;  %v1009_v36 = vmax.f32 %v1007_v34, %v1008_v43  ;;  %v1020_v47 = vmax.f32 %v1018_v35, %v1019_v44 }
 0x4be   : >> { %v1042_v50 = vadd.f32 %v1041_v46, %v1040_v40 }
 0x4bf   : >> { %v1043_v22 = vmul.f32 0.027777778, %v1031_v49 }
 0x4c0   : >> { %v1044_v48 = vmul.f32 0.027777778, %v1042_v50 }
 0x4c1   : >> { %v4944_v37 = vsel %vm6891_vm0, %v1009_v36, %v1043_v22 }
 0x4c2   : >> { %v4948_v53 = vsel %vm6891_vm0, %v1020_v47, %v1044_v48  ;;  %1047 = vrot.lane.b32.xlu1 %v4944_v37, %s4370_s17  ;;  %vm1971_vm0 = vcmp.lt.s32.totalorder %v4583_v3, 95 }
 0x4c3   : >> { %1049 = vrot.lane.b32.xlu0 %v4948_v53, %s4370_s17  ;;  %s4388_s17 = smov 15  }
 0x4c6   : >> { %1134 = vrot.lane.b32.xlu1 %v4944_v37, %s4371_s18 }
 0x4c7   : >> { %1136 = vrot.lane.b32.xlu0 %v4948_v53, %s4371_s18  ;;  %s4389_s18 = smov 14  }
 0x4ca   : >> { %1068 = vrot.lane.b32.xlu1 %v4944_v37, %s4372_s9 }
 0x4cb   : >> { %1070 = vrot.lane.b32.xlu0 %v4948_v53, %s4372_s9  ;;  %s4390_s9 = smov 13  }
 0x4ce   : >> { %1090 = vrot.lane.b32.xlu1 %v4944_v37, %s4373_s12 }
 0x4cf   : >> { %1092 = vrot.lane.b32.xlu0 %v4948_v53, %s4373_s12  ;;  %s4391_s12 = smov 3  }
 0x4d2   : >> { %1112 = vrot.lane.b32.xlu1 %v4944_v37, %s4374_s14 }
 0x4d3   : >> { %1114 = vrot.lane.b32.xlu0 %v4948_v53, %s4374_s14  ;;  %s4392_s14 = smov 2  }
 0x4d6   : >> { %1158 = vrot.lane.b32.xlu1 %v4944_v37, %s4375_s20 }
 0x4d7   : >> { %1160 = vrot.lane.b32.xlu0 %v4948_v53, %s4375_s20  ;;  %s4393_s20 = smov 1  }
 0x4da   : >> { %1182 = vrot.lane.b32.xlu1 %v4944_v37, %s4376_s29 }
 0x4db   : >> { %1184 = vrot.lane.b32.xlu0 %v4948_v53, %s4376_s29  ;;  %s4394_s29 = smov 127  }
 0x4de   : >> { %1206 = vrot.lane.b32.xlu1 %v4944_v37, %s4377_s21 }
 0x4df   : >> { %1208 = vrot.lane.b32.xlu0 %v4948_v53, %s4377_s21  ;;  %s4395_s21 = smov 126  }
 0x4e2   : >> { %1230 = vrot.lane.b32.xlu1 %v4944_v37, %s4378_s23 }
 0x4e3   : >> { %1232 = vrot.lane.b32.xlu0 %v4948_v53, %s4378_s23  ;;  %s4396_s23 = smov 125  }
 0x4e6   : >> { %1254 = vrot.lane.b32.xlu1 %v4944_v37, %s4379_s24 }
 0x4e7   : >> { %1256 = vrot.lane.b32.xlu0 %v4948_v53, %s4379_s24  ;;  %s4397_s24 = smov 115  }
 0x4ea   : >> { %1278 = vrot.lane.b32.xlu1 %v4944_v37, %s4380_s25 }
 0x4eb   : >> { %1280 = vrot.lane.b32.xlu0 %v4948_v53, %s4380_s25  ;;  %s4398_s25 = smov 114  }
 0x4ee   : >> { %1302 = vrot.lane.b32.xlu1 %v4944_v37, %s4381_s26 }
 0x4ef   : >> { %1304 = vrot.lane.b32.xlu0 %v4948_v53, %s4381_s26  ;;  %s4399_s26 = smov 113  }
 0x4f2   : >> { %1326 = vrot.lane.b32.xlu1 %v4944_v37, %s4382_s28 }
 0x4f3   : >> { %1328 = vrot.lane.b32.xlu0 %v4948_v53, %s4382_s28  ;;  %s4400_s28 = smov 112  }
 0x4f6   : >> { %1350 = vrot.lane.b32.xlu1 %v4944_v37, %s4383_s10 }
 0x4f7   : >> { %1352 = vrot.lane.b32.xlu0 %v4948_v53, %s4383_s10  ;;  %s4401_s10 = smov 111  }
 0x4fa   : >> { %1374 = vrot.lane.b32.xlu1 %v4944_v37, %s4384_s13 }
 0x4fb   : >> { %1376 = vrot.lane.b32.xlu0 %v4948_v53, %s4384_s13  ;;  %s4402_s13 = smov 110  }
 0x4fe   : >> { %1398 = vrot.lane.b32.xlu1 %v4944_v37, %s4385_s11 }
 0x4ff   : >> { %1400 = vrot.lane.b32.xlu0 %v4948_v53, %s4385_s11  ;;  %s4403_s11 = smov 109  }
 0x502   : >> { %1422 = vrot.lane.b32.xlu1 %v4944_v37, %s4386_s15 }
 0x503   : >> { %1424 = vrot.lane.b32.xlu0 %v4948_v53, %s4386_s15 }
 0x506   : >> { %1446 = vrot.lane.b32.xlu1 %v4944_v37, %s4387_s16 }
 0x507   : >> { %1448 = vrot.lane.b32.xlu0 %v4948_v53, %s4387_s16 }
 0x50a   : >> { %1470 = vrot.lane.b32.xlu1 %v4944_v37, %s4388_s17 }
 0x50b   : >> { %1472 = vrot.lane.b32.xlu0 %v4948_v53, %s4388_s17 }
 0x50e   : >> { %1494 = vrot.lane.b32.xlu1 %v4944_v37, %s4389_s18 }
 0x50f   : >> { %1496 = vrot.lane.b32.xlu0 %v4948_v53, %s4389_s18  ;;  %s4404_s18 = smov 99  }
 0x512   : >> { %1518 = vrot.lane.b32.xlu1 %v4944_v37, %s4390_s9 }
 0x513   : >> { %1520 = vrot.lane.b32.xlu0 %v4948_v53, %s4390_s9  ;;  %s4405_s9 = smov 98  }
 0x516   : >> { %1542 = vrot.lane.b32.xlu1 %v4944_v37, %s4391_s12 }
 0x517   : >> { %1544 = vrot.lane.b32.xlu0 %v4948_v53, %s4391_s12  ;;  %s4406_s12 = smov 97  }
 0x51a   : >> { %1566 = vrot.lane.b32.xlu1 %v4944_v37, %s4392_s14 }
 0x51b   : >> { %1568 = vrot.lane.b32.xlu0 %v4948_v53, %s4392_s14  ;;  %s4407_s14 = smov 96  }
 0x51e   : >> { %1590 = vrot.lane.b32.xlu1 %v4944_v37, %s4393_s20 }
 0x51f   : >> { %1592 = vrot.lane.b32.xlu0 %v4948_v53, %s4393_s20 }
 0x522   : >> { %1631 = vrot.lane.b32.xlu1 %v4944_v37, %s4394_s29 }
 0x523   : >> { %1633 = vrot.lane.b32.xlu0 %v4948_v53, %s4394_s29 }
 0x526   : >> { %1655 = vrot.lane.b32.xlu1 %v4944_v37, %s4395_s21 }
 0x527   : >> { %1657 = vrot.lane.b32.xlu0 %v4948_v53, %s4395_s21  ;;  %s4408_s21 = smov 95  }
 0x52a   : >> { %1679 = vrot.lane.b32.xlu1 %v4944_v37, %s4396_s23 }
 0x52b   : >> { %1681 = vrot.lane.b32.xlu0 %v4948_v53, %s4396_s23  ;;  %s4409_s23 = smov 94  }
 0x52e   : >> { %1703 = vrot.lane.b32.xlu1 %v4944_v37, %s4397_s24 }
 0x52f   : >> { %1705 = vrot.lane.b32.xlu0 %v4948_v53, %s4397_s24  ;;  %s4410_s24 = smov 93  }
 0x532   : >> { %1727 = vrot.lane.b32.xlu1 %v4944_v37, %s4398_s25 }
 0x533   : >> { %1729 = vrot.lane.b32.xlu0 %v4948_v53, %s4398_s25  ;;  %s4411_s25 = smov 83  }
 0x534   : >> { %v5020_v17 = vpop.permute.xlu1 %1047 }
 0x535   : >> { %v5018_v16 = vpop.permute.xlu0 %1049 }
 0x536   : >> { %1751 = vrot.lane.b32.xlu1 %v4944_v37, %s4399_s26 }
 0x537   : >> { %1753 = vrot.lane.b32.xlu0 %v4948_v53, %s4399_s26 }
 0x538   : >> { %v5028_v0 = vpop.permute.xlu1 %1134 }
 0x539   : >> { %v5026_v62 = vpop.permute.xlu0 %1136 }
 0x53a   : >> { %1775 = vrot.lane.b32.xlu1 %v4944_v37, %s4400_s28 }
 0x53b   : >> { %1777 = vrot.lane.b32.xlu0 %v4948_v53, %s4400_s28 }
 0x53c   : >> { %v5036_v7 = vpop.permute.xlu1 %1068 }
 0x53d   : >> { %v5034_v11 = vpop.permute.xlu0 %1070 }
 0x53e   : >> { %1799 = vrot.lane.b32.xlu1 %v4944_v37, %s4401_s10 }
 0x53f   : >> { %1801 = vrot.lane.b32.xlu0 %v4948_v53, %s4401_s10 }
 0x540   : >> { %v5044_v13 = vpop.permute.xlu1 %1090 }
 0x541   : >> { %v5042_v59 = vpop.permute.xlu0 %1092 }
 0x542   : >> { %1823 = vrot.lane.b32.xlu1 %v4944_v37, %s4402_s13 }
 0x543   : >> { %1825 = vrot.lane.b32.xlu0 %v4948_v53, %s4402_s13  ;;  %s4412_s13 = smov 82  }
 0x544   : >> { %v5050_v15 = vpop.permute.xlu1 %1112 }
 0x545   : >> { %v5048_v42 = vpop.permute.xlu0 %1114 }
 0x546   : >> { %1847 = vrot.lane.b32.xlu1 %v4944_v37, %s4403_s11 }
 0x547   : >> { %1849 = vrot.lane.b32.xlu0 %v4948_v53, %s4403_s11  ;;  %s4413_s11 = smov 81  }
 0x548   : >> { %v5056_v63 = vpop.permute.xlu1 %1158 }
 0x549   : >> { %v5054_v14 = vpop.permute.xlu0 %1160 }
 0x54a   : >> { %1871 = vrot.lane.b32.xlu1 %v4944_v37, %s4404_s18 }
 0x54b   : >> { %1873 = vrot.lane.b32.xlu0 %v4948_v53, %s4404_s18  ;;  %s4414_s18 = smov 80  }
 0x54c   : >> { %v5062_v10 = vpop.permute.xlu1 %1182 }
 0x54d   : >> { %v5060_v9 = vpop.permute.xlu0 %1184 }
 0x54e   : >> { %1895 = vrot.lane.b32.xlu1 %v4944_v37, %s4405_s9 }
 0x54f   : >> { %1897 = vrot.lane.b32.xlu0 %v4948_v53, %s4405_s9  ;;  %s4415_s9 = smov 79  }
 0x550   : >> { %v5068_v24 = vpop.permute.xlu1 %1206 }
 0x551   : >> { %v5066_v21 = vpop.permute.xlu0 %1208 }
 0x552   : >> { %1919 = vrot.lane.b32.xlu1 %v4944_v37, %s4406_s12 }
 0x553   : >> { %1921 = vrot.lane.b32.xlu0 %v4948_v53, %s4406_s12  ;;  %s4416_s12 = smov 78  }
 0x554   : >> { %v5074_v38 = vpop.permute.xlu1 %1230 }
 0x555   : >> { %v5072_v4 = vpop.permute.xlu0 %1232 }
 0x556   : >> { %1943 = vrot.lane.b32.xlu1 %v4944_v37, %s4407_s14 }
 0x557   : >> { %1945 = vrot.lane.b32.xlu0 %v4948_v53, %s4407_s14  ;;  %s4417_s14 = smov 77  }
 0x558   : >> { %v5080_v19 = vpop.permute.xlu1 %1254 }
 0x559   : >> { %v5078_v25 = vpop.permute.xlu0 %1256 }
 0x55a   : >> { %1967 = vrot.lane.b32.xlu1 %v4944_v37, %s4408_s21 }
 0x55b   : >> { %1969 = vrot.lane.b32.xlu0 %v4948_v53, %s4408_s21 }
 0x55c   : >> { %v5086_v20 = vpop.permute.xlu1 %1278 }
 0x55d   : >> { %v5084_v29 = vpop.permute.xlu0 %1280 }
 0x55e   : >> { %1991 = vrot.lane.b32.xlu1 %v4944_v37, %s4409_s23 }
 0x55f   : >> { %1993 = vrot.lane.b32.xlu0 %v4948_v53, %s4409_s23 }
 0x560   : >> { %v5092_v23 = vpop.permute.xlu1 %1302 }
 0x561   : >> { %v5090_v8 = vpop.permute.xlu0 %1304 }
 0x562   : >> { %2015 = vrot.lane.b32.xlu1 %v4944_v37, %s4410_s24 }
 0x563   : >> { %2017 = vrot.lane.b32.xlu0 %v4948_v53, %s4410_s24  ;;  %s3822_s24 = sshll.u32 %s4356_s30, 6  ;;  %s406_s30 = sadd.s32 1, %s4356_s30  }
 0x564   : >> { %v5098_v27 = vpop.permute.xlu1 %1326  ;;  %p403_p2 = scmp.ge.s32.totalorder %s406_s30, 8  }
 0x565   : >> { %v5096_v26 = vpop.permute.xlu0 %1328 }
 0x566   : >> { %2039 = vrot.lane.b32.xlu1 %v4944_v37, %s4411_s25 }
 0x567   : >> { %2041 = vrot.lane.b32.xlu0 %v4948_v53, %s4411_s25  ;;  %s6754_s25 = scalar_lea.vmem %s4595_s22, %s3822_s24 }
 0x568   : >> { %v5104_v57 = vpop.permute.xlu1 %1350 }
 0x569   : >> { %v5102_v28 = vpop.permute.xlu0 %1352 }
 0x56a   : >> { %2063 = vrot.lane.b32.xlu1 %v4944_v37, %s4412_s13 }
 0x56b   : >> { %2065 = vrot.lane.b32.xlu0 %v4948_v53, %s4412_s13 }
 0x56c   : >> { %v5110_v54 = vpop.permute.xlu1 %1374 }
 0x56d   : >> { %v5108_v30 = vpop.permute.xlu0 %1376  ;;  %6893 = vst [vmem:[#allocation26_spill] sm:$0xff] %v5110_v54  ;;  %v5278_v54 = vld.sshfl [vmem:[#allocation7 + $0x70] sm:$0x33 pattern:$0x76325410] }
 0x56e   : >> { %6892 = vst [vmem:[#allocation25_spill] sm:$0xff] %v5108_v30  ;;  %2087 = vrot.lane.b32.xlu1 %v4944_v37, %s4413_s11  ;;  %v5276_v30 = vld.sshfl [vmem:[#allocation7 + $0x6c] sm:$0x33 pattern:$0x76325410] }
 0x56f   : >> { %2089 = vrot.lane.b32.xlu0 %v4948_v53, %s4413_s11 }
 0x570   : >> { %v5116_v32 = vpop.permute.xlu1 %1398 }
 0x571   : >> { %v5114_v31 = vpop.permute.xlu0 %1400  ;;  %6895 = vst [vmem:[#allocation28_spill] sm:$0xff] %v5116_v32  ;;  %v5235_v32 = vmul.f32 %v3724_v61, %v4944_v37 }
 0x572   : >> { %6894 = vst [vmem:[#allocation27_spill] sm:$0xff] %v5114_v31  ;;  %2111 = vrot.lane.b32.xlu1 %v4944_v37, %s4414_s18  ;;  %v5229_v31 = vld.sshfl [vmem:[#allocation7 + $0x54] sm:$0x33 pattern:$0x76325410] }
 0x573   : >> { %2113 = vrot.lane.b32.xlu0 %v4948_v53, %s4414_s18  ;;  %6927 = vst [vmem:[#allocation60_spill] sm:$0xff] %v5229_v31  ;;  %6929 = vst [vmem:[#allocation62_spill] sm:$0xff] %v5235_v32  ;;  %v5325_v31 = vld.sshfl [vmem:[#allocation7 + $0x84] sm:$0x33 pattern:$0x76325410] }
 0x574   : >> { %v5122_v45 = vpop.permute.xlu1 %1422  ;;  %6933 = vst [vmem:[#allocation66_spill] sm:$0xff] %v5325_v31 }
 0x575   : >> { %v5120_v33 = vpop.permute.xlu0 %1424  ;;  %6897 = vst [vmem:[#allocation30_spill] sm:$0xff] %v5122_v45 }
 0x576   : >> { %6896 = vst [vmem:[#allocation29_spill] sm:$0xff] %v5120_v33  ;;  %2135 = vrot.lane.b32.xlu1 %v4944_v37, %s4415_s9  ;;  %v5245_v33 = vld.sshfl [vmem:[#allocation7 + $0x58] sm:$0x33 pattern:$0x76325410] }
 0x577   : >> { %2137 = vrot.lane.b32.xlu0 %v4948_v53, %s4415_s9 }
 0x578   : >> { %v5128_v35 = vpop.permute.xlu1 %1446 }
 0x579   : >> { %v5126_v34 = vpop.permute.xlu0 %1448  ;;  %6899 = vst [vmem:[#allocation32_spill] sm:$0xff] %v5128_v35  ;;  %v5217_v35 = vld.sshfl [vmem:[#allocation7 + $0x44] sm:$0x33 pattern:$0x76325410] }
 0x57a   : >> { %6898 = vst [vmem:[#allocation31_spill] sm:$0xff] %v5126_v34  ;;  %2159 = vrot.lane.b32.xlu1 %v4944_v37, %s4416_s12  ;;  %6924 = vst [vmem:[#allocation57_spill] sm:$0xff] %v5217_v35  ;;  %v5259_v34 = vld.sshfl [vmem:[#allocation7 + $0x64] sm:$0x33 pattern:$0x76325410] }
 0x57b   : >> { %2161 = vrot.lane.b32.xlu0 %v4948_v53, %s4416_s12  ;;  %v5353_v35 = vld.sshfl [vmem:[#allocation7 + $0x8c] sm:$0x33 pattern:$0x76325410] }
 0x57c   : >> { %v5134_v40 = vpop.permute.xlu1 %1470  ;;  %6936 = vst [vmem:[#allocation68_spill] sm:$0xff] %v5353_v35 }
 0x57d   : >> { %v5132_v39 = vpop.permute.xlu0 %1472  ;;  %6901 = vst [vmem:[#allocation34_spill] sm:$0xff] %v5134_v40  ;;  %v1151_v40 = vcombine.high %v5168_v52, %v5168_v52 }
 0x57e   : >> { %6900 = vst [vmem:[#allocation33_spill] sm:$0xff] %v5132_v39  ;;  %2183 = vrot.lane.b32.xlu1 %v4944_v37, %s4417_s14  ;;  %v5215_v39 = vld.sshfl [vmem:[#allocation7 + $0x40] sm:$0x33 pattern:$0x76325410]  ;;  %v1052_v37 = vsel %vm1051_vm9, %v5020_v17, %v5018_v16 }
 0x57f   : >> { %2185 = vrot.lane.b32.xlu0 %v4948_v53, %s4417_s14 }
 0x580   : >> { %v5140_v44 = vpop.permute.xlu1 %1494 }
 0x581   : >> { %v5138_v43 = vpop.permute.xlu0 %1496  ;;  %6903 = vst [vmem:[#allocation36_spill] sm:$0xff] %v5140_v44 }
 0x582   : >> { %6902 = vst [vmem:[#allocation35_spill] sm:$0xff] %v5138_v43 }
 0x584   : >> { %v5144_v46 = vpop.permute.xlu1 %1518 }
 0x585   : >> { %v5142_v41 = vpop.permute.xlu0 %1520  ;;  %6905 = vst [vmem:[#allocation38_spill] sm:$0xff] %v5144_v46  ;;  %v5225_v46 = vld.sshfl [vmem:[#allocation7 + $0x4c] sm:$0x33 pattern:$0x76325410] }
 0x586   : >> { %6904 = vst [vmem:[#allocation37_spill] sm:$0xff] %v5142_v41  ;;  %6926 = vst [vmem:[#allocation59_spill] sm:$0xff] %v5225_v46  ;;  %v5227_v41 = vld.sshfl [vmem:[#allocation7 + $0x50] sm:$0x33 pattern:$0x76325410] }
 0x588   : >> { %v5148_v50 = vpop.permute.xlu1 %1542 }
 0x589   : >> { %v5146_v49 = vpop.permute.xlu0 %1544  ;;  %6907 = vst [vmem:[#allocation40_spill] sm:$0xff] %v5148_v50  ;;  %v5201_v50 = vld.sshfl [vmem:[#allocation7 + $0x38] sm:$0x33 pattern:$0x76325410] }
 0x58a   : >> { %6906 = vst [vmem:[#allocation39_spill] sm:$0xff] %v5146_v49  ;;  %6920 = vst [vmem:[#allocation53_spill] sm:$0xff] %v5201_v50  ;;  %v5203_v49 = vld.sshfl [vmem:[#allocation7 + $0x3c] sm:$0x33 pattern:$0x76325410]  ;;  %v1053_v50 = vsel %vm1051_vm9, %v5018_v16, %v5020_v17 }
 0x58b   : >> { %6921 = vst [vmem:[#allocation54_spill] sm:$0xff] %v5203_v49  ;;  %v5296_v49 = vld.sshfl [vmem:[#allocation7 + $0x7c] sm:$0x33 pattern:$0x76325410]  ;;  %vm1378_vm9 = vcmp.lt.s32.totalorder %v4583_v3, 19 }
 0x58c   : >> { %v5152_v47 = vpop.permute.xlu1 %1566  ;;  %6932 = vst [vmem:[#allocation65_spill] sm:$0xff] %v5296_v49  ;;  %v5332_v17 = vld.sshfl [vmem:[#allocation7 + $0x88] sm:$0x33 pattern:$0x76325410] }
 0x58d   : >> { %v5150_v36 = vpop.permute.xlu0 %1568  ;;  %6909 = vst [vmem:[#allocation42_spill] sm:$0xff] %v5152_v47  ;;  %v5197_v47 = vld.sshfl [vmem:[#allocation7 + $0x30] sm:$0x33 pattern:$0x76325410]  ;;  %6934 = vst [vmem:[#allocation67_spill] sm:$0xff] %v5332_v17 }
 0x58e   : >> { %6908 = vst [vmem:[#allocation41_spill] sm:$0xff] %v5150_v36  ;;  %6918 = vst [vmem:[#allocation51_spill] sm:$0xff] %v5197_v47  ;;  %v5199_v36 = vld.sshfl [vmem:[#allocation7 + $0x34] sm:$0x33 pattern:$0x76325410]  ;;  %v1074_v47 = vsel %vm1072_vm11, %v5034_v11, %v5036_v7 }
 0x58f   : >> { %6919 = vst [vmem:[#allocation52_spill] sm:$0xff] %v5199_v36  ;;  %v1212_v36 = vsel %vm1210_vm2, %v5066_v21, %v5068_v24 }
 0x590   : >> { %v5156_v48 = vpop.permute.xlu1 %1590 }
 0x591   : >> { %v5154_v22 = vpop.permute.xlu0 %1592  ;;  %6911 = vst [vmem:[#allocation44_spill] sm:$0xff] %v5156_v48  ;;  %v5188_v48 = vld.sshfl [vmem:[#allocation7 + $0x24] sm:$0x33 pattern:$0x76325410] }
 0x592   : >> { %6910 = vst [vmem:[#allocation43_spill] sm:$0xff] %v5154_v22  ;;  %v5190_v22 = vld.sshfl [vmem:[#allocation7 + $0x28] sm:$0x33 pattern:$0x76325410] }
 0x594   : >> { %v5160_v6 = vpop.permute.xlu1 %1631 }
 0x595   : >> { %v5158_v18 = vpop.permute.xlu0 %1633  ;;  %6913 = vst [vmem:[#allocation46_spill] sm:$0xff] %v5160_v6  ;;  %v1624_v6 = vcombine.high %v3724_v61, %v3724_v61  ;;  %v1139_v61 = vsel %vm1138_vm10, %v5028_v0, %v5026_v62 }
 0x596   : >> { %6912 = vst [vmem:[#allocation45_spill] sm:$0xff] %v5158_v18  ;;  %v5186_v18 = vld.sshfl [vmem:[#allocation7 + $0x20] sm:$0x33 pattern:$0x76325410] }
 0x598   : >> { %v5164_v12 = vpop.permute.xlu1 %1655 }
 0x599   : >> { %v5162_v58 = vpop.permute.xlu0 %1657  ;;  %6915 = vst [vmem:[#allocation48_spill] sm:$0xff] %v5164_v12  ;;  %v5184_v12 = vld.sshfl [vmem:[#allocation7 + $0x1c] sm:$0x33 pattern:$0x76325410] }
 0x59a   : >> { %6914 = vst [vmem:[#allocation47_spill] sm:$0xff] %v5162_v58  ;;  %v5182_v58 = vld.sshfl [vmem:[#allocation7 + $0x18] sm:$0x33 pattern:$0x76325410] }
 0x59b   : >> { %v6941_v17 = vcombine.high %v5182_v58, %v5182_v58 }
 0x59c   : >> { %v5174_v5 = vpop.permute.xlu1 %1679 }
 0x59d   : >> { %v5172_v60 = vpop.permute.xlu0 %1681  ;;  %6917 = vst [vmem:[#allocation50_spill] sm:$0xff] %v5174_v5  ;;  %v5232_v5 = vmul.f32 %v1624_v6, %v4948_v53  ;;  %v5247_v6 = vld.sshfl [vmem:[#allocation7 + $0x5c] sm:$0x33 pattern:$0x76325410]  ;;  %v1140_v53 = vsel %vm1138_vm10, %v5026_v62, %v5028_v0  ;;  %vm1426_vm10 = vcmp.lt.s32.totalorder %v4583_v3, 17 }
 0x59e   : >> { %6916 = vst [vmem:[#allocation49_spill] sm:$0xff] %v5172_v60  ;;  %v5192_v60 = vld.sshfl [vmem:[#allocation7 + $0x2c] sm:$0x33 pattern:$0x76325410]  ;;  %v1154_v46 = vmul.f32 %v5168_v52, %v1140_v53  ;;  %v6935_v53 = vcombine.high %v5166_v56, %v5166_v56 }
 0x59f   : >> { %6928 = vst [vmem:[#allocation61_spill] sm:$0xff] %v5232_v5  ;;  %v5307_v0 = vld.sshfl [vmem:[#allocation7 + $0x80] sm:$0x33 pattern:$0x76325410] }
 0x5a0   : >> { %v5207_v43 = vpop.permute.xlu1 %1703  ;;  %v1067_v16 = vmul.f32 %v6935_v53, %v1052_v37  ;;  %v1088_v53 = vmul.f32 %v5170_v1, %v1074_v47  ;;  %v1117_v37 = vsel %vm1116_vm14, %v5050_v15, %v5048_v42 }
 0x5a1   : >> { %v5205_v44 = vpop.permute.xlu0 %1705  ;;  %6923 = vst [vmem:[#allocation56_spill] sm:$0xff] %v5207_v43  ;;  %v5261_v43 = vld.sshfl [vmem:[#allocation7 + $0x68] sm:$0x33 pattern:$0x76325410] }
 0x5a2   : >> { %6922 = vst [vmem:[#allocation55_spill] sm:$0xff] %v5205_v44  ;;  %v5223_v44 = vld.sshfl [vmem:[#allocation7 + $0x48] sm:$0x33 pattern:$0x76325410] }
 0x5a3   : >> { %6925 = vst [vmem:[#allocation58_spill] sm:$0xff] %v5223_v44  ;;  %v1155_v44 = vmul.f32 %v1151_v40, %v1139_v61  ;;  %v1066_v61 = vmul.f32 %v5166_v56, %v1053_v50  ;;  %v1073_v40 = vsel %vm1072_vm11, %v5036_v7, %v5034_v11  ;;  %v1163_v11 = vsel %vm1162_vm13, %v5056_v63, %v5054_v14 }
 0x5a4   : >> { %v5265_v5 = vpop.permute.xlu1 %1727  ;;  %v1164_v7 = vsel %vm1162_vm13, %v5054_v14, %v5056_v63  ;;  %v5395_v14 = vld.sshfl [vmem:[#allocation7 + $0x90] sm:$0x33 pattern:$0x76325410]  ;;  %v6938_v63 = vcombine.high %v5170_v1, %v5170_v1  ;;  %vm1402_vm11 = vcmp.lt.s32.totalorder %v4583_v3, 18  ;;  %vm1450_vm13 = vcmp.lt.s32.totalorder %v4583_v3, 16 }
 0x5a5   : >> { %v5263_v32 = vpop.permute.xlu0 %1729  ;;  %6931 = vst [vmem:[#allocation64_spill] sm:$0xff] %v5265_v5  ;;  %v5282_v5 = vld.sshfl [vmem:[#allocation7 + $0x78] sm:$0x33 pattern:$0x76325410]  ;;  %v5370_v52 = vadd.f32 %v1154_v46, %v1066_v61  ;;  %v5372_v49 = vadd.f32 %v1155_v44, %v1067_v16  ;;  %v1095_v44 = vsel %vm1094_vm12, %v5044_v13, %v5042_v59  ;;  %v1096_v46 = vsel %vm1094_vm12, %v5042_v59, %v5044_v13 }
 0x5a6   : >> { %6930 = vst [vmem:[#allocation63_spill] sm:$0xff] %v5263_v32  ;;  %v5280_v32 = vld.sshfl [vmem:[#allocation7 + $0x74] sm:$0x33 pattern:$0x76325410]  ;;  %6937 = vst [vmem:[#allocation69_spill] sm:$0xff] %v5395_v14  ;;  %v1089_v47 = vmul.f32 %v6938_v63, %v1073_v40  ;;  %v1118_v61 = vsel %vm1116_vm14, %v5048_v42, %v5050_v15  ;;  %v1187_v59 = vsel %vm1186_vm15, %v5062_v10, %v5060_v9 }
 0x5a7   : >> { %v1188_v13 = vsel %vm1186_vm15, %v5060_v9, %v5062_v10  ;;  %v1178_v1 = vmul.f32 %v5180_v2, %v1164_v7  ;;  %v6939_v40 = vcombine.high %v5180_v2, %v5180_v2  ;;  %v1211_v16 = vsel %vm1210_vm2, %v5068_v24, %v5066_v21  ;;  %v5430_v7 = vld.sshfl [vmem:[#allocation7 + $0x94] sm:$0x33 pattern:$0x76325410] }
 0x5a8   : >> { %v5323_v62 = vpop.permute.xlu1 %1751  ;;  %v1110_v2 = vmul.f32 %v5176_v51, %v1096_v46  ;;  %v5442_v24 = vld.sshfl [vmem:[#allocation7 + $0x98] sm:$0x33 pattern:$0x76325410]  ;;  %v1202_v35 = vmul.f32 %v5182_v58, %v1188_v13  ;;  %v1203_v46 = vmul.f32 %v6941_v17, %v1187_v59  ;;  %v1236_v42 = vsel %vm1234_vm3, %v5072_v4, %v5074_v38  ;;  %v6979_v59 = vld [vmem:[#allocation35_spill] sm:$0xff] }
 0x5a9   : >> { %v5321_v45 = vpop.permute.xlu0 %1753  ;;  %v1179_v63 = vmul.f32 %v6939_v40, %v1163_v11  ;;  %v6940_v11 = vcombine.high %v5176_v51, %v5176_v51  ;;  %v1235_v51 = vsel %vm1234_vm3, %v5074_v38, %v5072_v4  ;;  %v5456_v15 = vld.sshfl [vmem:[#allocation7 + $0x9c] sm:$0x33 pattern:$0x76325410]  ;;  %v1226_v13 = vmul.f32 %v5184_v12, %v1212_v36 }
 0x5aa   : >> { %6942 = vst [vmem:[#allocation70_spill] sm:$0xff] %v5456_v15  ;;  %v6943_v58 = vcombine.high %v5184_v12, %v5184_v12  ;;  %v6945_v21 = vcombine.high %v5178_v55, %v5178_v55  ;;  %v1180_v4 = vadd.f32 %v1178_v1, %v1088_v53  ;;  %v1250_v12 = vmul.f32 %v5186_v18, %v1236_v42 }
 0x5ab   : >> { %v1111_v40 = vmul.f32 %v6940_v11, %v1095_v44  ;;  %v1132_v44 = vmul.f32 %v5178_v55, %v1118_v61  ;;  %v5465_v11 = vld.sshfl [vmem:[#allocation7 + $0xa0] sm:$0x33 pattern:$0x76325410]  ;;  %v1181_v38 = vadd.f32 %v1179_v63, %v1089_v47  ;;  %v1259_v55 = vsel %vm1258_vm4, %v5080_v19, %v5078_v25 }
 0x5ac   : >> { %v5362_v56 = vpop.permute.xlu1 %1775  ;;  %v1227_v17 = vmul.f32 %v6943_v58, %v1211_v16  ;;  %6944 = vst [vmem:[#allocation71_spill] sm:$0xff] %v5465_v11  ;;  %v1133_v14 = vmul.f32 %v6945_v21, %v1117_v37  ;;  %v6946_v16 = vcombine.high %v5186_v18, %v5186_v18  ;;  %v1260_v37 = vsel %vm1258_vm4, %v5078_v25, %v5080_v19  ;;  %v5494_v63 = vld.sshfl [vmem:[#allocation7 + $0xa4] sm:$0x33 pattern:$0x76325410] }
 0x5ad   : >> { %v5360_v50 = vpop.permute.xlu0 %1777  ;;  %v1204_v53 = vadd.f32 %v1202_v35, %v1110_v2  ;;  %v1205_v47 = vadd.f32 %v1203_v46, %v1111_v40  ;;  %6947 = vst [vmem:[#allocation72_spill] sm:$0xff] %v5494_v63  ;;  %v1228_v21 = vadd.f32 %v1226_v13, %v1132_v44  ;;  %v1283_v25 = vsel %vm1282_vm5, %v5086_v20, %v5084_v29  ;;  %v6959_v18 = vld [vmem:[#allocation52_spill] sm:$0xff] }
 0x5ae   : >> { %v1251_v58 = vmul.f32 %v6946_v16, %v1235_v51  ;;  %v1229_v51 = vadd.f32 %v1227_v17, %v1133_v14  ;;  %v1284_v19 = vsel %vm1282_vm5, %v5084_v29, %v5086_v20  ;;  %v1274_v35 = vmul.f32 %v5188_v48, %v1260_v37  ;;  %v5545_v16 = vld.sshfl [vmem:[#allocation7 + $0xac] sm:$0x33 pattern:$0x76325410] }
 0x5af   : >> { %v6948_v2 = vcombine.high %v5188_v48, %v5188_v48  ;;  %v1307_v14 = vsel %vm1306_vm6, %v5092_v23, %v5090_v8  ;;  %v1308_v46 = vsel %vm1306_vm6, %v5090_v8, %v5092_v23  ;;  %vm1522_vm12 = vcmp.lt.s32.totalorder %v4583_v3, 13  ;;  %v5530_v23 = vld.sshfl [vmem:[#allocation7 + $0xa8] sm:$0x33 pattern:$0x76325410]  ;;  %6951 = vst [vmem:[#allocation74_spill] sm:$0xff] %v5545_v16 }
 0x5b0   : >> { %v5428_v10 = vpop.permute.xlu1 %1799  ;;  %v1252_v20 = vadd.f32 %v1250_v12, %v5370_v52  ;;  %v1253_v48 = vadd.f32 %v1251_v58, %v5372_v49  ;;  %v1332_v44 = vsel %vm1330_vm7, %v5096_v26, %v5098_v27  ;;  %6949 = vst [vmem:[#allocation73_spill] sm:$0xff] %v5530_v23  ;;  %v1298_v13 = vmul.f32 %v5190_v22, %v1284_v19  ;;  %v6954_v37 = vld [vmem:[#allocation25_spill] sm:$0xff]  ;;  %v6984_v23 = vld [vmem:[#allocation58_spill] sm:$0xff] }
 0x5b1   : >> { %v5426_v9 = vpop.permute.xlu0 %1801  ;;  %v1275_v40 = vmul.f32 %v6948_v2, %v1259_v55  ;;  %v6950_v17 = vcombine.high %v5190_v22, %v5190_v22  ;;  %v1331_v49 = vsel %vm1330_vm7, %v5098_v27, %v5096_v26  ;;  %v1356_v12 = vsel %vm1354_vm8, %v5102_v28, %v5104_v57  ;;  %v6953_v27 = vld [vmem:[#allocation26_spill] sm:$0xff]  ;;  %v5560_v19 = vld.sshfl [vmem:[#allocation7 + $0xb0] sm:$0x33 pattern:$0x76325410] }
 0x5b2   : >> { %vm1474_vm14 = vcmp.lt.s32.totalorder %v4583_v3, 15  ;;  %v1322_v58 = vmul.f32 %v5192_v60, %v1308_v46  ;;  %v6952_v22 = vcombine.high %v5192_v60, %v5192_v60  ;;  %v1355_v26 = vsel %vm1354_vm8, %v5104_v57, %v5102_v28  ;;  %6955 = vst [vmem:[#allocation26_spill] sm:$0xff] %v5560_v19  ;;  %v5569_v57 = vld.sshfl [vmem:[#allocation7 + $0xb4] sm:$0x33 pattern:$0x76325410] }
 0x5b3   : >> { %v1299_v52 = vmul.f32 %v6950_v17, %v1283_v25  ;;  %v1380_v25 = vsel %vm1378_vm9, %v6954_v37, %v6953_v27  ;;  %vm1498_vm15 = vcmp.lt.s32.totalorder %v4583_v3, 14  ;;  %v1276_v2 = vadd.f32 %v1274_v35, %v1180_v4  ;;  %v6956_v17 = vld [vmem:[#allocation51_spill] sm:$0xff]  ;;  %6957 = vst [vmem:[#allocation25_spill] sm:$0xff] %v5569_v57 }
 0x5b4   : >> { %v5472_v61 = vpop.permute.xlu1 %1823  ;;  %v1323_v55 = vmul.f32 %v6952_v22, %v1307_v14  ;;  %v1277_v46 = vadd.f32 %v1275_v40, %v1181_v38  ;;  %v1346_v8 = vmul.f32 %v6956_v17, %v1332_v44  ;;  %v6958_v22 = vcombine.high %v6956_v17, %v6956_v17  ;;  %v6961_v17 = vld [vmem:[#allocation53_spill] sm:$0xff] }
 0x5b5   : >> { %v5470_v31 = vpop.permute.xlu0 %1825  ;;  %v1370_v36 = vmul.f32 %v6959_v18, %v1356_v12  ;;  %v1379_v4 = vsel %vm1378_vm9, %v6953_v27, %v6954_v37  ;;  %vm1546_vm2 = vcmp.lt.s32.totalorder %v4583_v3, 3  ;;  %v1300_v35 = vadd.f32 %v1298_v13, %v1204_v53  ;;  %v5587_v12 = vld.sshfl [vmem:[#allocation7 + $0xb8] sm:$0x33 pattern:$0x76325410]  ;;  %v6965_v37 = vld [vmem:[#allocation29_spill] sm:$0xff] }
 0x5b6   : >> { %v1347_v1 = vmul.f32 %v6958_v22, %v1331_v49  ;;  %v1301_v40 = vadd.f32 %v1299_v52, %v1205_v47  ;;  %v6960_v44 = vcombine.high %v6959_v18, %v6959_v18  ;;  %v1394_v49 = vmul.f32 %v6961_v17, %v1380_v25  ;;  %6962 = vst [vmem:[#allocation51_spill] sm:$0xff] %v5587_v12  ;;  %v5598_v18 = vld.sshfl [vmem:[#allocation7 + $0xbc] sm:$0x33 pattern:$0x76325410]  ;;  %v6971_v38 = vld [vmem:[#allocation37_spill] sm:$0xff] }
 0x5b7   : >> { %vm1570_vm3 = vcmp.lt.s32.totalorder %v4583_v3, 2  ;;  %v5589_v22 = vadd.f32 %v1322_v58, %v1228_v21  ;;  %v5591_v27 = vadd.f32 %v1323_v55, %v1229_v51  ;;  %vm1594_vm4 = vcmp.lt.s32.totalorder %v4583_v3, 1  ;;  %6963 = vst [vmem:[#allocation52_spill] sm:$0xff] %v5598_v18  ;;  %v6966_v21 = vld [vmem:[#allocation30_spill] sm:$0xff]  ;;  %v6968_v47 = vld [vmem:[#allocation27_spill] sm:$0xff]  ;;  %v6980_v12 = vld [vmem:[#allocation36_spill] sm:$0xff] }
 0x5b8   : >> { %v5519_v29 = vpop.permute.xlu1 %1847  ;;  %v1371_v28 = vmul.f32 %v6960_v44, %v1355_v26  ;;  %v1348_v13 = vadd.f32 %v1346_v8, %v1252_v20  ;;  %v6964_v52 = vcombine.high %v6961_v17, %v6961_v17  ;;  %v1427_v51 = vsel %vm1426_vm10, %v6966_v21, %v6965_v37  ;;  %v6967_v8 = vld [vmem:[#allocation28_spill] sm:$0xff]  ;;  %v6972_v17 = vld [vmem:[#allocation38_spill] sm:$0xff] }
 0x5b9   : >> { %v5517_v42 = vpop.permute.xlu0 %1849  ;;  %v1428_v58 = vsel %vm1426_vm10, %v6965_v37, %v6966_v21  ;;  %v1349_v44 = vadd.f32 %v1347_v1, %v1253_v48  ;;  %v1372_v20 = vadd.f32 %v1370_v36, %v1276_v2  ;;  %v1396_v53 = vadd.f32 %v1394_v49, %v1300_v35  ;;  %v5627_v1 = vld.sshfl [vmem:[#allocation7 + $0xc0] sm:$0x33 pattern:$0x76325410]  ;;  %v6973_v49 = vld [vmem:[#allocation54_spill] sm:$0xff]  ;;  %v6975_v21 = vld [vmem:[#allocation32_spill] sm:$0xff] }
 0x5ba   : >> { %v1395_v26 = vmul.f32 %v6964_v52, %v1379_v4  ;;  %v1404_v4 = vsel %vm1402_vm11, %v6968_v47, %v6967_v8  ;;  %v1373_v52 = vadd.f32 %v1371_v28, %v1277_v46  ;;  %v1403_v37 = vsel %vm1402_vm11, %v6967_v8, %v6968_v47  ;;  %6969 = vst [vmem:[#allocation53_spill] sm:$0xff] %v5627_v1  ;;  %v6974_v8 = vld [vmem:[#allocation31_spill] sm:$0xff]  ;;  %v6982_v1 = vld [vmem:[#allocation57_spill] sm:$0xff] }
 0x5bb   : >> { %v1442_v36 = vmul.f32 %v5215_v39, %v1428_v58  ;;  %v6970_v48 = vcombine.high %v5215_v39, %v5215_v39  ;;  %v1523_v46 = vsel %vm1522_vm12, %v6972_v17, %v6971_v38  ;;  %v1524_v28 = vsel %vm1522_vm12, %v6971_v38, %v6972_v17 }
 0x5bc   : >> { %v5565_v14 = vpop.permute.xlu1 %1871  ;;  %v1397_v35 = vadd.f32 %v1395_v26, %v1301_v40  ;;  %v1418_v47 = vmul.f32 %v6973_v49, %v1404_v4  ;;  %v1451_v58 = vsel %vm1450_vm13, %v6975_v21, %v6974_v8  ;;  %v1452_v39 = vsel %vm1450_vm13, %v6974_v8, %v6975_v21  ;;  %v6977_v26 = vld [vmem:[#allocation33_spill] sm:$0xff]  ;;  %v6978_v4 = vld [vmem:[#allocation34_spill] sm:$0xff] }
 0x5bd   : >> { %v5563_v60 = vpop.permute.xlu0 %1873  ;;  %v1443_v2 = vmul.f32 %v6970_v48, %v1427_v51  ;;  %vm1635_vm5 = vcmp.lt.s32.totalorder %v4583_v3, 127  ;;  %v6976_v38 = vcombine.high %v6973_v49, %v6973_v49  ;;  %v1475_v17 = vsel %vm1474_vm14, %v6978_v4, %v6977_v26 }
 0x5be   : >> { %v1476_v21 = vsel %vm1474_vm14, %v6977_v26, %v6978_v4  ;;  %vm1659_vm6 = vcmp.lt.s32.totalorder %v4583_v3, 126  ;;  %v1500_v49 = vsel %vm1498_vm15, %v6979_v59, %v6980_v12  ;;  %v6981_v26 = vcombine.high %v5227_v41, %v5227_v41 }
 0x5bf   : >> { %v1419_v40 = vmul.f32 %v6976_v38, %v1403_v37  ;;  %v1499_v37 = vsel %vm1498_vm15, %v6980_v12, %v6979_v59  ;;  %v1538_v38 = vmul.f32 %v5227_v41, %v1524_v28  ;;  %vm1683_vm7 = vcmp.lt.s32.totalorder %v4583_v3, 125  ;;  %v6986_v41 = vld [vmem:[#allocation39_spill] sm:$0xff] }
 0x5c0   : >> { %v5613_v25 = vpop.permute.xlu1 %1895  ;;  %v1539_v4 = vmul.f32 %v6981_v26, %v1523_v46  ;;  %v1444_v57 = vadd.f32 %v1442_v36, %v1348_v13  ;;  %v1445_v8 = vadd.f32 %v1443_v2, %v1349_v44  ;;  %v1466_v18 = vmul.f32 %v6982_v1, %v1452_v39  ;;  %v6987_v46 = vld [vmem:[#allocation40_spill] sm:$0xff]  ;;  %v6988_v36 = vld [vmem:[#allocation59_spill] sm:$0xff]  ;;  %v6990_v39 = vld [vmem:[#allocation41_spill] sm:$0xff] }
 0x5c1   : >> { %v5611_v55 = vpop.permute.xlu0 %1897  ;;  %v6983_v19 = vcombine.high %v6982_v1, %v6982_v1  ;;  %vm1707_vm8 = vcmp.lt.s32.totalorder %v4583_v3, 115  ;;  %v1490_v59 = vmul.f32 %v6984_v23, %v1476_v21  ;;  %v6985_v12 = vcombine.high %v6984_v23, %v6984_v23 }
 0x5c2   : >> { %v1547_v13 = vsel %vm1546_vm2, %v6987_v46, %v6986_v41  ;;  %v1548_v44 = vsel %vm1546_vm2, %v6986_v41, %v6987_v46  ;;  %vm1731_vm9 = vcmp.lt.s32.totalorder %v4583_v3, 114  ;;  %v1514_v2 = vmul.f32 %v6988_v36, %v1500_v49  ;;  %v6992_v46 = vld [vmem:[#allocation43_spill] sm:$0xff]  ;;  %v6993_v49 = vld [vmem:[#allocation44_spill] sm:$0xff] }
 0x5c3   : >> { %v1467_v16 = vmul.f32 %v6983_v19, %v1451_v58  ;;  %v1491_v28 = vmul.f32 %v6985_v12, %v1475_v17  ;;  %v6989_v23 = vcombine.high %v6988_v36, %v6988_v36  ;;  %v6991_v17 = vld [vmem:[#allocation42_spill] sm:$0xff]  ;;  %vm1755_vm11 = vcmp.lt.s32.totalorder %v4583_v3, 113 }
 0x5c4   : >> { %v5653_v48 = vpop.permute.xlu1 %1919  ;;  %v1571_v21 = vsel %vm1570_vm3, %v6991_v17, %v6990_v39  ;;  %v1572_v26 = vsel %vm1570_vm3, %v6990_v39, %v6991_v17  ;;  %v1540_v12 = vadd.f32 %v1538_v38, %v1444_v57  ;;  %v1541_v41 = vadd.f32 %v1539_v4, %v1445_v8  ;;  %v6994_v17 = vld [vmem:[#allocation60_spill] sm:$0xff] }
 0x5c5   : >> { %v5651_v51 = vpop.permute.xlu0 %1921  ;;  %v1515_v58 = vmul.f32 %v6989_v23, %v1499_v37  ;;  %v1595_v36 = vsel %vm1594_vm4, %v6993_v49, %v6992_v46  ;;  %v1596_v37 = vsel %vm1594_vm4, %v6992_v46, %v6993_v49  ;;  %vm6872_vm12 = vcmp.lt.s32.totalorder %v4583_v3, 112 }
 0x5c6   : >> { %v1420_v23 = vadd.f32 %v1418_v47, %v5589_v22  ;;  %v1421_v39 = vadd.f32 %v1419_v40, %v5591_v27  ;;  %v1562_v63 = vmul.f32 %v6994_v17, %v1548_v44  ;;  %v6995_v57 = vcombine.high %v6994_v17, %v6994_v17  ;;  %v7000_v17 = vld [vmem:[#allocation45_spill] sm:$0xff] }
 0x5c7   : >> { %v1468_v38 = vadd.f32 %v1466_v18, %v1372_v20  ;;  %v1469_v4 = vadd.f32 %v1467_v16, %v1373_v52  ;;  %v1586_v11 = vmul.f32 %v5245_v33, %v1572_v26  ;;  %v6996_v15 = vcombine.high %v5245_v33, %v5245_v33  ;;  %v6999_v33 = vld [vmem:[#allocation62_spill] sm:$0xff] }
 0x5c8   : >> { %v5702_v1 = vpop.permute.xlu1 %1943  ;;  %v1563_v8 = vmul.f32 %v6995_v57, %v1547_v13  ;;  %vm6871_vm15 = vcmp.lt.s32.totalorder %v4583_v3, 111  ;;  %v1492_v27 = vadd.f32 %v1490_v59, %v1396_v53  ;;  %v1493_v47 = vadd.f32 %v1491_v28, %v1397_v35  ;;  %v6998_v13 = vld [vmem:[#allocation61_spill] sm:$0xff]  ;;  %v7001_v57 = vld [vmem:[#allocation46_spill] sm:$0xff]  ;;  %v7002_v28 = vld [vmem:[#allocation47_spill] sm:$0xff] }
 0x5c9   : >> { %v5700_v19 = vpop.permute.xlu0 %1945  ;;  %v1587_v46 = vmul.f32 %v6996_v15, %v1571_v21  ;;  %v1610_v40 = vmul.f32 %v5247_v6, %v1596_v37  ;;  %v6997_v18 = vcombine.high %v5247_v6, %v5247_v6  ;;  %v1516_v20 = vadd.f32 %v1514_v2, %v1420_v23  ;;  %v7003_v2 = vld [vmem:[#allocation48_spill] sm:$0xff]  ;;  %v7004_v23 = vld [vmem:[#allocation49_spill] sm:$0xff] }
 0x5ca   : >> { %v1517_v52 = vadd.f32 %v1515_v58, %v1421_v39  ;;  %v1630_v44 = vadd.f32 %v6998_v13, %v1541_v41  ;;  %v1629_v15 = vadd.f32 %v6999_v33, %v1540_v12  ;;  %v1564_v21 = vadd.f32 %v1562_v63, %v1468_v38  ;;  %v7005_v39 = vld [vmem:[#allocation50_spill] sm:$0xff]  ;;  %v7011_v13 = vld [vmem:[#allocation64_spill] sm:$0xff] }
 0x5cb   : >> { %v1611_v16 = vmul.f32 %v6997_v18, %v1595_v36  ;;  %v1565_v26 = vadd.f32 %v1563_v8, %v1469_v4  ;;  %v1636_v53 = vsel %vm1635_vm5, %v7001_v57, %v7000_v17  ;;  %v1637_v35 = vsel %vm1635_vm5, %v7000_v17, %v7001_v57 }
 0x5cc   : >> { %v5739_v22 = vpop.permute.xlu1 %1967  ;;  %vm1827_vm2 = vcmp.lt.s32.totalorder %v4583_v3, 110  ;;  %v1588_v6 = vadd.f32 %v1586_v11, %v1492_v27  ;;  %v1589_v59 = vadd.f32 %v1587_v46, %v1493_v47  ;;  %v1660_v63 = vsel %vm1659_vm6, %v7003_v2, %v7002_v28  ;;  %v7007_v27 = vld [vmem:[#allocation55_spill] sm:$0xff]  ;;  %v7008_v47 = vld [vmem:[#allocation56_spill] sm:$0xff] }
 0x5cd   : >> { %v5737_v49 = vpop.permute.xlu0 %1969  ;;  %v1661_v58 = vsel %vm1659_vm6, %v7002_v28, %v7003_v2  ;;  %v1612_v36 = vadd.f32 %v1610_v40, %v1516_v20  ;;  %v1613_v37 = vadd.f32 %v1611_v16, %v1517_v52  ;;  %v1684_v11 = vsel %vm1683_vm7, %v7005_v39, %v7004_v23 }
 0x5ce   : >> { %v1685_v8 = vsel %vm1683_vm7, %v7004_v23, %v7005_v39  ;;  %vm1851_vm3 = vcmp.lt.s32.totalorder %v4583_v3, 109  ;;  %v1651_v38 = vmul.f32 %v5259_v34, %v1636_v53  ;;  %v7006_v4 = vcombine.high %v5259_v34, %v5259_v34  ;;  %v7010_v34 = vld [vmem:[#allocation63_spill] sm:$0xff] }
 0x5cf   : >> { %v1708_v40 = vsel %vm1707_vm8, %v7008_v47, %v7007_v27  ;;  %v1709_v18 = vsel %vm1707_vm8, %v7007_v27, %v7008_v47  ;;  %vm1875_vm6 = vcmp.lt.s32.totalorder %v4583_v3, 99  ;;  %v1675_v16 = vmul.f32 %v5261_v43, %v1660_v63 }
 0x5d0   : >> { %v5766_v41 = vpop.permute.xlu1 %1991  ;;  %v1652_v46 = vmul.f32 %v7006_v4, %v1637_v35  ;;  %v7009_v20 = vcombine.high %v5261_v43, %v5261_v43  ;;  %v1732_v33 = vsel %vm1731_vm9, %v7011_v13, %v7010_v34  ;;  %v1733_v17 = vsel %vm1731_vm9, %v7010_v34, %v7011_v13 }
 0x5d1   : >> { %v5764_v12 = vpop.permute.xlu0 %1993  ;;  %vm1899_vm7 = vcmp.lt.s32.totalorder %v4583_v3, 98  ;;  %v1699_v57 = vmul.f32 %v5276_v30, %v1684_v11  ;;  %v7012_v53 = vcombine.high %v5276_v30, %v5276_v30  ;;  %v1756_v43 = vsel %vm1755_vm11, %v5323_v62, %v5321_v45 }
 0x5d2   : >> { %v1676_v52 = vmul.f32 %v7009_v20, %v1661_v58  ;;  %v1757_v28 = vsel %vm1755_vm11, %v5321_v45, %v5323_v62  ;;  %vm1923_vm8 = vcmp.lt.s32.totalorder %v4583_v3, 97  ;;  %v1723_v58 = vmul.f32 %v5278_v54, %v1708_v40 }
 0x5d3   : >> { %v1700_v35 = vmul.f32 %v7012_v53, %v1685_v8  ;;  %v7013_v30 = vcombine.high %v5278_v54, %v5278_v54  ;;  %v1780_v39 = vsel %vm6872_vm12, %v5362_v56, %v5360_v50  ;;  %v1781_v45 = vsel %vm6872_vm12, %v5360_v50, %v5362_v56 }
 0x5d4   : >> { %v5818_v63 = vpop.permute.xlu1 %2015  ;;  %vm1947_vm9 = vcmp.lt.s32.totalorder %v4583_v3, 96  ;;  %v1653_v62 = vadd.f32 %v1651_v38, %v1564_v21  ;;  %v1654_v11 = vadd.f32 %v1652_v46, %v1565_v26  ;;  %v1747_v8 = vmul.f32 %v5280_v32, %v1732_v33  ;;  %v7016_v26 = vld [vmem:[#allocation65_spill] sm:$0xff] }
 0x5d5   : >> { %v5816_v2 = vpop.permute.xlu0 %2017  ;;  %v1724_v23 = vmul.f32 %v7013_v30, %v1709_v18  ;;  %v7014_v54 = vcombine.high %v5280_v32, %v5280_v32  ;;  %v1771_v27 = vmul.f32 %v5282_v5, %v1756_v43  ;;  %v7015_v47 = vcombine.high %v5282_v5, %v5282_v5 }
 0x5d6   : >> { %v1804_v50 = vsel %vm6871_vm15, %v5428_v10, %v5426_v9  ;;  %v1805_v56 = vsel %vm6871_vm15, %v5426_v9, %v5428_v10  ;;  %v1677_v32 = vadd.f32 %v1675_v16, %v1588_v6  ;;  %v1678_v21 = vadd.f32 %v1676_v52, %v1589_v59 }
 0x5d7   : >> { %v1748_v4 = vmul.f32 %v7014_v54, %v1733_v17  ;;  %v1772_v40 = vmul.f32 %v7015_v47, %v1757_v28  ;;  %v1795_v38 = vmul.f32 %v7016_v26, %v1780_v39  ;;  %v7017_v5 = vcombine.high %v7016_v26, %v7016_v26 }
 0x5d8   : >> { %v5857_v20 = vpop.permute.xlu1 %2039  ;;  %v1701_v34 = vadd.f32 %v1699_v57, %v1612_v36  ;;  %v1702_v13 = vadd.f32 %v1700_v35, %v1613_v37  ;;  %v1725_v33 = vadd.f32 %v1723_v58, %v1629_v15  ;;  %v1726_v9 = vadd.f32 %v1724_v23, %v1630_v44 }
 0x5d9   : >> { %v1796_v46 = vmul.f32 %v7017_v5, %v1781_v45  ;;  %v5855_v18 = vpop.permute.xlu0 %2041  ;;  %v1819_v10 = vmul.f32 %v5307_v0, %v1804_v50  ;;  %v7018_v6 = vcombine.high %v5307_v0, %v5307_v0  ;;  %v1828_v16 = vsel %vm1827_vm2, %v5472_v61, %v5470_v31 }
 0x5da   : >> { %v1829_v52 = vsel %vm1827_vm2, %v5470_v31, %v5472_v61  ;;  %v1749_v36 = vadd.f32 %v1747_v8, %v1653_v62  ;;  %v1750_v37 = vadd.f32 %v1748_v4, %v1654_v11  ;;  %v1773_v15 = vadd.f32 %v1771_v27, %v1677_v32  ;;  %v7019_v61 = vld [vmem:[#allocation66_spill] sm:$0xff]  ;;  %v7021_v62 = vld [vmem:[#allocation67_spill] sm:$0xff]  ;;  %v7023_v4 = vld [vmem:[#allocation68_spill] sm:$0xff] }
 0x5db   : >> { %v1820_v59 = vmul.f32 %v7018_v6, %v1805_v56  ;;  %v1774_v44 = vadd.f32 %v1772_v40, %v1678_v21  ;;  %v1797_v17 = vadd.f32 %v1795_v38, %v1701_v34  ;;  %v1798_v57 = vadd.f32 %v1796_v46, %v1702_v13 }
 0x5dc   : >> { %v1852_v0 = vsel %vm1851_vm3, %v5519_v29, %v5517_v42  ;;  %v1853_v53 = vsel %vm1851_vm3, %v5517_v42, %v5519_v29  ;;  %vm2019_vm15 = vcmp.lt.s32.totalorder %v4583_v3, 93  ;;  %v2064_v31 = vpop.permute.xlu1 %2063  ;;  %v1843_v43 = vmul.f32 %v7019_v61, %v1828_v16 }
 0x5dd   : >> { %v2066_v35 = vpop.permute.xlu0 %2065  ;;  %v7020_v28 = vcombine.high %v7019_v61, %v7019_v61  ;;  %v1876_v30 = vsel %vm1875_vm6, %v5565_v14, %v5563_v60  ;;  %v1877_v42 = vsel %vm1875_vm6, %v5563_v60, %v5565_v14  ;;  %vm2043_vm2 = vcmp.lt.s32.totalorder %v4583_v3, 83 }
 0x5de   : >> { %vm2067_vm3 = vcmp.lt.s32.totalorder %v4583_v3, 82  ;;  %v1821_v29 = vadd.f32 %v1819_v10, %v1725_v33  ;;  %v1822_v23 = vadd.f32 %v1820_v59, %v1726_v9  ;;  %v1900_v39 = vsel %vm1899_vm7, %v5613_v25, %v5611_v55 }
 0x5df   : >> { %v1844_v58 = vmul.f32 %v7020_v28, %v1829_v52  ;;  %v1901_v45 = vsel %vm1899_vm7, %v5611_v55, %v5613_v25  ;;  %vm2091_vm12 = vcmp.lt.s32.totalorder %v4583_v3, 81  ;;  %v1867_v60 = vmul.f32 %v7021_v62, %v1852_v0 }
 0x5e0   : >> { %v7022_v14 = vcombine.high %v7021_v62, %v7021_v62  ;;  %v1924_v8 = vsel %vm1923_vm8, %v5653_v48, %v5651_v51  ;;  %v1925_v54 = vsel %vm1923_vm8, %v5651_v51, %v5653_v48  ;;  %v1891_v55 = vmul.f32 %v7023_v4, %v1876_v30  ;;  %v2088_v56 = vpop.permute.xlu1 %2087  ;;  %v7025_v48 = vld [vmem:[#allocation69_spill] sm:$0xff] }
 0x5e1   : >> { %v7024_v25 = vcombine.high %v7023_v4, %v7023_v4  ;;  %v1948_v47 = vsel %vm1947_vm9, %v5702_v1, %v5700_v19  ;;  %v1949_v40 = vsel %vm1947_vm9, %v5700_v19, %v5702_v1  ;;  %v2090_v50 = vpop.permute.xlu0 %2089  ;;  %v1845_v32 = vadd.f32 %v1843_v43, %v1749_v36 }
 0x5e2   : >> { %v1868_v11 = vmul.f32 %v7022_v14, %v1853_v53  ;;  %v1846_v51 = vadd.f32 %v1844_v58, %v1750_v37  ;;  %v1915_v21 = vmul.f32 %v7025_v48, %v1900_v39  ;;  %v7026_v26 = vcombine.high %v7025_v48, %v7025_v48  ;;  %v7031_v58 = vld [vmem:[#allocation71_spill] sm:$0xff] }
 0x5e3   : >> { %v1892_v27 = vmul.f32 %v7024_v25, %v1877_v42  ;;  %vm2115_vm6 = vcmp.lt.s32.totalorder %v4583_v3, 80  ;;  %v1939_v5 = vmul.f32 %v5430_v7, %v1924_v8  ;;  %v7027_v46 = vcombine.high %v5430_v7, %v5430_v7 }
 0x5e4   : >> { %v1916_v38 = vmul.f32 %v7026_v26, %v1901_v45  ;;  %v1972_v19 = vsel %vm1971_vm0, %v5739_v22, %v5737_v49  ;;  %v1973_v1 = vsel %vm1971_vm0, %v5737_v49, %v5739_v22  ;;  %vm2139_vm7 = vcmp.lt.s32.totalorder %v4583_v3, 79  ;;  %v2112_v52 = vpop.permute.xlu1 %2111 }
 0x5e5   : >> { %v1940_v34 = vmul.f32 %v7027_v46, %v1925_v54  ;;  %vm2163_vm8 = vcmp.lt.s32.totalorder %v4583_v3, 78  ;;  %v1963_v13 = vmul.f32 %v5442_v24, %v1948_v47  ;;  %v7028_v7 = vcombine.high %v5442_v24, %v5442_v24  ;;  %v2114_v16 = vpop.permute.xlu0 %2113  ;;  %v7029_v24 = vld [vmem:[#allocation70_spill] sm:$0xff]  ;;  %v7033_v54 = vld [vmem:[#allocation72_spill] sm:$0xff] }
 0x5e6   : >> { %v1996_v9 = vsel %vm1995_vm1, %v5766_v41, %v5764_v12  ;;  %v1997_v49 = vsel %vm1995_vm1, %v5764_v12, %v5766_v41  ;;  %v1869_v22 = vadd.f32 %v1867_v60, %v1773_v15  ;;  %v1870_v10 = vadd.f32 %v1868_v11, %v1774_v44 }
 0x5e7   : >> { %v1964_v33 = vmul.f32 %v7028_v7, %v1949_v40  ;;  %v1893_v6 = vadd.f32 %v1891_v55, %v1797_v17  ;;  %v1894_v59 = vadd.f32 %v1892_v27, %v1798_v57  ;;  %v1917_v36 = vadd.f32 %v1915_v21, %v1821_v29  ;;  %v7035_v55 = vld [vmem:[#allocation73_spill] sm:$0xff]  ;;  %v7037_v27 = vld [vmem:[#allocation74_spill] sm:$0xff] }
 0x5e8   : >> { %v1918_v37 = vadd.f32 %v1916_v38, %v1822_v23  ;;  %v1987_v0 = vmul.f32 %v7029_v24, %v1972_v19  ;;  %v7030_v53 = vcombine.high %v7029_v24, %v7029_v24  ;;  %v1941_v43 = vadd.f32 %v1939_v5, %v1845_v32  ;;  %v2136_v62 = vpop.permute.xlu1 %2135 }
 0x5e9   : >> { %v1942_v28 = vadd.f32 %v1940_v34, %v1846_v51  ;;  %v2011_v30 = vmul.f32 %v7031_v58, %v1996_v9  ;;  %v7032_v12 = vcombine.high %v7031_v58, %v7031_v58  ;;  %vm2187_vm0 = vcmp.lt.s32.totalorder %v4583_v3, 77  ;;  %v2138_v45 = vpop.permute.xlu0 %2137 }
 0x5ea   : >> { %v1988_v61 = vmul.f32 %v7030_v53, %v1973_v1  ;;  %v1965_v15 = vadd.f32 %v1963_v13, %v1869_v22  ;;  %v1966_v44 = vadd.f32 %v1964_v33, %v1870_v10  ;;  %v2020_v17 = vsel %vm2019_vm15, %v5818_v63, %v5816_v2  ;;  %v7041_v33 = vld [vmem:[#allocation52_spill] sm:$0xff] }
 0x5eb   : >> { %v2012_v41 = vmul.f32 %v7032_v12, %v1997_v49  ;;  %v2021_v57 = vsel %vm2019_vm15, %v5816_v2, %v5818_v63  ;;  %v2044_v42 = vsel %vm2043_vm2, %v5857_v20, %v5855_v18  ;;  %v2045_v29 = vsel %vm2043_vm2, %v5855_v18, %v5857_v20 }
 0x5ec   : >> { %v2068_v23 = vsel %vm2067_vm3, %v2064_v31, %v2066_v35  ;;  %v2069_v39 = vsel %vm2067_vm3, %v2066_v35, %v2064_v31  ;;  %v1989_v60 = vadd.f32 %v1987_v0, %v1893_v6  ;;  %v1990_v2 = vadd.f32 %v1988_v61, %v1894_v59  ;;  %v2160_v5 = vpop.permute.xlu1 %2159  ;;  %v7043_v59 = vld [vmem:[#allocation25_spill] sm:$0xff]  ;;  %v7045_v0 = vld [vmem:[#allocation51_spill] sm:$0xff] }
 0x5ed   : >> { %v2092_v63 = vsel %vm2091_vm12, %v2088_v56, %v2090_v50  ;;  %v2093_v14 = vsel %vm2091_vm12, %v2090_v50, %v2088_v56  ;;  %v2013_v11 = vadd.f32 %v2011_v30, %v1917_v36  ;;  %v2014_v8 = vadd.f32 %v2012_v41, %v1918_v37  ;;  %v7039_v56 = vld [vmem:[#allocation26_spill] sm:$0xff]  ;;  %v2162_v38 = vpop.permute.xlu0 %2161 }
 0x5ee   : >> { %v2035_v18 = vmul.f32 %v7033_v54, %v2020_v17  ;;  %v7034_v20 = vcombine.high %v7033_v54, %v7033_v54  ;;  %v2059_v35 = vmul.f32 %v7035_v55, %v2044_v42  ;;  %v7036_v31 = vcombine.high %v7035_v55, %v7035_v55 }
 0x5ef   : >> { %v2083_v47 = vmul.f32 %v7037_v27, %v2068_v23  ;;  %v7038_v40 = vcombine.high %v7037_v27, %v7037_v27  ;;  %v2107_v32 = vmul.f32 %v7039_v56, %v2092_v63  ;;  %v7040_v51 = vcombine.high %v7039_v56, %v7039_v56 }
 0x5f0   : >> { %v2036_v4 = vmul.f32 %v7034_v20, %v2021_v57  ;;  %v2060_v25 = vmul.f32 %v7036_v31, %v2045_v29  ;;  %v2116_v21 = vsel %vm2115_vm6, %v2112_v52, %v2114_v16  ;;  %v2117_v26 = vsel %vm2115_vm6, %v2114_v16, %v2112_v52  ;;  %v2184_v58 = vpop.permute.xlu1 %2183  ;;  %v7047_v57 = vld [vmem:[#allocation53_spill] sm:$0xff] }
 0x5f1   : >> { %v2084_v50 = vmul.f32 %v7038_v40, %v2069_v39  ;;  %v2108_v48 = vmul.f32 %v7040_v51, %v2093_v14  ;;  %v2140_v46 = vsel %vm2139_vm7, %v2136_v62, %v2138_v45  ;;  %v2141_v34 = vsel %vm2139_vm7, %v2138_v45, %v2136_v62 }
 0x5f2   : >> { %v2164_v19 = vsel %vm2163_vm8, %v2160_v5, %v2162_v38  ;;  %v2165_v1 = vsel %vm2163_vm8, %v2162_v38, %v2160_v5  ;;  %v2037_v13 = vadd.f32 %v2035_v18, %v1941_v43  ;;  %v2038_v7 = vadd.f32 %v2036_v4, %v1942_v28  ;;  %v2186_v28 = vpop.permute.xlu0 %2185 }
 0x5f3   : >> { %v2179_v9 = vmul.f32 %v7041_v33, %v2164_v19  ;;  %v7042_v49 = vcombine.high %v7041_v33, %v7041_v33  ;;  %v2061_v10 = vadd.f32 %v2059_v35, %v1965_v15  ;;  %v2062_v6 = vadd.f32 %v2060_v25, %v1966_v44  ;;  %v2544_v33 = vld [vmem:[#allocation9 + $0x4] ss:$8 sm:$0x3] }
 0x5f4   : >> { %v2131_v16 = vmul.f32 %v7043_v59, %v2116_v21  ;;  %v7044_v52 = vcombine.high %v7043_v59, %v7043_v59  ;;  %v2085_v37 = vadd.f32 %v2083_v47, %v1989_v60  ;;  %v2086_v24 = vadd.f32 %v2084_v50, %v1990_v2 }
 0x5f5   : >> { %v2180_v22 = vmul.f32 %v7042_v49, %v2165_v1  ;;  %v2155_v53 = vmul.f32 %v7045_v0, %v2140_v46  ;;  %v7046_v61 = vcombine.high %v7045_v0, %v7045_v0  ;;  %v2109_v30 = vadd.f32 %v2107_v32, %v2013_v11  ;;  %v7049_v1 = vld [vmem:[#allocation12_spill] sm:$0xff] }
 0x5f6   : >> { %v2132_v36 = vmul.f32 %v7044_v52, %v2117_v26  ;;  %v2110_v12 = vadd.f32 %v2108_v48, %v2014_v8  ;;  %v2188_v41 = vsel %vm2187_vm0, %v2184_v58, %v2186_v28  ;;  %v2189_v15 = vsel %vm2187_vm0, %v2186_v28, %v2184_v58  ;;  %v7056_v58 = vld [vmem:[#allocation22_spill] sm:$0xff] }
 0x5f7   : >> { %v2156_v43 = vmul.f32 %v7046_v61, %v2141_v34  ;;  %v2181_v44 = vadd.f32 %v2179_v9, %v2085_v37  ;;  %v2182_v17 = vadd.f32 %v2180_v22, %v2086_v24  ;;  %v2203_v42 = vmul.f32 %v7047_v57, %v2188_v41  ;;  %v7053_v24 = vld [vmem:[#allocation17_spill] sm:$0xff] }
 0x5f8   : >> { %v7048_v29 = vcombine.high %v7047_v57, %v7047_v57  ;;  %v2133_v39 = vadd.f32 %v2131_v16, %v2037_v13  ;;  %v2134_v45 = vadd.f32 %v2132_v36, %v2038_v7  ;;  %v2157_v62 = vadd.f32 %v2155_v53, %v2061_v10  ;;  %v7051_v16 = vld [vmem:[#allocation13_spill] sm:$0xff]  ;;  %v7054_v53 = vld [vmem:[#allocation16_spill] sm:$0xff] }
 0x5f9   : >> { %v2158_v60 = vadd.f32 %v2156_v43, %v2062_v6  ;;  %v2205_v2 = vadd.f32 %v2203_v42, %v2109_v30  ;;  %vm2213_vm1 = vcmask 1041408   ;;  %v6040_v13 = vsub.s32 0, %v7049_v1  ;;  %v7050_v6 = vld [vmem:[#allocation15_spill] sm:$0xff]  ;;  %v7052_v36 = vld [vmem:[#allocation21_spill] sm:$0xff]  ;;  %v7055_v43 = vld [vmem:[#allocation14_spill] sm:$0xff] }
 0x5fa   : >> { %v2204_v23 = vmul.f32 %v7048_v29, %v2189_v15  ;;  %v2209_v14 = vadd.f32 %v2181_v44, %v2157_v62  ;;  %v6043_v7 = vsub.s32 1, %v7049_v1  ;;  %v7058_v15 = vld [vmem:[#allocation19_spill] sm:$0xff]  ;;  %v7060_v42 = vld [vmem:[#allocation20_spill] sm:$0xff]  ;;  %vm7074_vm0 = vcmp.lt.s32.totalorder %v4583_v3, 111 }
 0x5fb   : >> { %v2210_v11 = vadd.f32 %v2182_v17, %v2158_v60  ;;  %v2207_v8 = vadd.f32 %v2205_v2, %v2133_v39  ;;  %v2549_v22 = vrot.slane %v2544_v33, %v6040_v13  ;;  %v7059_v17 = vld [vmem:[#allocation23_spill] sm:$0xff] }
 0x5fc   : >> { %v2206_v63 = vadd.f32 %v2204_v23, %v2110_v12  ;;  %v2553_v49 = vrot.slane %v2544_v33, %v6043_v7  ;;  %v7057_v12 = vld [vmem:[#allocation18_spill] sm:$0xff]  ;;  %v7061_v23 = vld [vmem:[#allocation24_spill] sm:$0xff] }
 0x5fd   : >> { %v2211_v18 = vadd.f32 %v2209_v14, %v2207_v8 }
 0x5fe   : >> { %v2208_v54 = vadd.f32 %v2206_v63, %v2134_v45 }
 0x5ff   : >> { %v2214_v4 = vsel %vm2213_vm1, %v2211_v18, 0.0 }
 0x600   : >> { %v2212_v20 = vadd.f32 %v2210_v11, %v2208_v54  ;;  %v2215_v35 = vrot.slane %v2214_v4, 4 }
 0x602   : >> { %v2221_v55 = vsel %vm2213_vm1, %v2212_v20, 0.0  ;;  %v2216_v25 = vadd.f32 %v2215_v35, %v2214_v4  ;;  %vm7075_vm1 = vmmov %vm7074_vm0 }
 0x603   : >> { %v2222_v31 = vrot.slane %v2221_v55, 4 }
 0x604   : >> { %v2217_v47 = vrot.slane %v2216_v25, 2 }
 0x605   : >> { %v2223_v27 = vadd.f32 %v2222_v31, %v2221_v55 }
 0x606   : >> { %v2218_v50 = vadd.f32 %v2217_v47, %v2216_v25 }
 0x607   : >> { %v2224_v40 = vrot.slane %v2223_v27, 2 }
 0x608   : >> { %v2219_v32 = vrot.slane %v2218_v50, 1 }
 0x609   : >> { %v2225_v56 = vadd.f32 %v2224_v40, %v2223_v27  ;;  %v2288_v40 = vld [vmem:[#allocation9] ss:$8 sm:$0x3] }
 0x60a   : >> { %v2220_v48 = vadd.f32 %v2219_v32, %v2218_v50  ;;  %v2293_v32 = vrot.slane %v2288_v40, %v6040_v13 }
 0x60b   : >> { %v2226_v51 = vrot.slane %v2225_v56, 1 }
 0x60c   : >> { %v3749_v26 = vmul.f32 -1.442695, %v2220_v48 }
 0x60d   : >> { %v2227_v21 = vadd.f32 %v2226_v51, %v2225_v56  ;;  %v2297_v51 = vrot.slane %v2288_v40, %v6043_v7 }
 0x60e   : >> { %4130 = vpow2.f32 %v3749_v26 }
 0x60f   : >> { %v3750_v38 = vmul.f32 -1.442695, %v2227_v21 }
 0x611   : >> { %4132 = vpow2.f32 %v3750_v38 }
 0x618   : >> { %v4131_v5 = vpop.eup %4130 }
 0x619   : >> { %v2234_v34 = vadd.f32 1.0, %v4131_v5 }
 0x61b   : >> { %v4133_v46 = vpop.eup %4132  ;;  %4134 = vrcp.f32 %v2234_v34 }
 0x61c   : >> { %v2235_v19 = vadd.f32 1.0, %v4133_v46 }
 0x61e   : >> { %4136 = vrcp.f32 %v2235_v19 }
 0x625   : >> { %v4135_v9 = vpop.eup %4134 }
 0x626   : >> { %v6048_v59 = vmul.f32 %v4135_v9, %v7050_v6  ;;  %v6051_v52 = vmul.f32 %v4135_v9, %v7051_v16  ;;  %v6054_v37 = vmul.f32 %v4135_v9, %v7052_v36  ;;  %v6057_v0 = vmul.f32 %v4135_v9, %v7053_v24 }
 0x627   : >> { %v6076_v44 = vmul.f32 %v4135_v9, %v7058_v15  ;;  %v6079_v57 = vmul.f32 %v4135_v9, %v7059_v17 }
 0x628   : >> { %v4137_v10 = vpop.eup %4136  ;;  %2254 = vrot.lane.b32.xlu0 %v6048_v59, %s4386_s15  ;;  %2252 = vrot.lane.b32.xlu1 %v6051_v52, %s4386_s15  ;;  %v6094_v60 = vmul.f32 %v2549_v22, %v6051_v52  ;;  %v6097_v2 = vmul.f32 %v2549_v22, %v6048_v59  ;;  %v6106_v11 = vmul.f32 %v2549_v22, %v6057_v0 }
 0x629   : >> { %v6060_v61 = vmul.f32 %v4137_v10, %v7054_v53  ;;  %v6063_v28 = vmul.f32 %v4137_v10, %v7055_v43  ;;  %v6066_v30 = vmul.f32 %v4137_v10, %v7056_v58  ;;  %v6069_v41 = vmul.f32 %v4137_v10, %v7057_v12 }
 0x62a   : >> { %v6082_v29 = vmul.f32 %v4137_v10, %v7060_v42  ;;  %v6085_v39 = vmul.f32 %v4137_v10, %v7061_v23  ;;  %v6111_v54 = vmul.f32 %v2549_v22, %v6054_v37  ;;  %v2568_v4 = vpack.c.bf16 %v6097_v2, %v6094_v60 }
 0x62b   : >> { %v6088_v45 = vmul.f32 %v2553_v49, %v6063_v28  ;;  %v6091_v62 = vmul.f32 %v2553_v49, %v6060_v61  ;;  %v6100_v63 = vmul.f32 %v2553_v49, %v6069_v41  ;;  %v6103_v14 = vmul.f32 %v2553_v49, %v6066_v30 }
 0x62c   : >> { %v6114_v18 = vmul.f32 %v2553_v49, %v6085_v39  ;;  %v6117_v20 = vmul.f32 %v2553_v49, %v6082_v29  ;;  %2266 = vrot.lane.b32.xlu0 %v6060_v61, %s4386_s15  ;;  %2264 = vrot.lane.b32.xlu1 %v6063_v28, %s4386_s15  ;;  %v6128_v35 = vmul.f32 %v2549_v22, %v6079_v57 }
 0x62d   : >> { %v2569_v8 = vpack.c.bf16 %v6091_v62, %v6088_v45  ;;  %v2571_v55 = vpack.c.bf16 %v6103_v14, %v6100_v63  ;;  %v2570_v31 = vpack.c.bf16 %v6111_v54, %v6106_v11  ;;  %v6135_v27 = vmul.f32 %v2549_v22, %v6076_v44 }
 0x62e   : >> { %v2573_v25 = vpack.c.bf16 %v6117_v20, %v6114_v18 }
 0x62f   : >> { %v2572_v47 = vpack.c.bf16 %v6135_v27, %v6128_v35 }
 0x630   : >> { %2258 = vrot.lane.b32.xlu0 %v6054_v37, %s4386_s15  ;;  %2256 = vrot.lane.b32.xlu1 %v6057_v0, %s4386_s15 }
 0x634   : >> { %2270 = vrot.lane.b32.xlu0 %v6066_v30, %s4386_s15  ;;  %2268 = vrot.lane.b32.xlu1 %v6069_v41, %s4386_s15 }
 0x638   : >> { %2262 = vrot.lane.b32.xlu0 %v6076_v44, %s4386_s15  ;;  %2260 = vrot.lane.b32.xlu1 %v6079_v57, %s4386_s15 }
 0x63c   : >> { %2274 = vrot.lane.b32.xlu0 %v6082_v29, %s4386_s15  ;;  %2272 = vrot.lane.b32.xlu1 %v6085_v39, %s4386_s15 }
 0x640   : >> { %2326 = vrot.lane.b32.xlu0 %v6048_v59, %s4387_s16  ;;  %2324 = vrot.lane.b32.xlu1 %v6051_v52, %s4387_s16 }
 0x644   : >> { %2338 = vrot.lane.b32.xlu0 %v6060_v61, %s4387_s16  ;;  %2336 = vrot.lane.b32.xlu1 %v6063_v28, %s4387_s16 }
 0x648   : >> { %2330 = vrot.lane.b32.xlu0 %v6054_v37, %s4387_s16  ;;  %2328 = vrot.lane.b32.xlu1 %v6057_v0, %s4387_s16 }
 0x64c   : >> { %2342 = vrot.lane.b32.xlu0 %v6066_v30, %s4387_s16  ;;  %2340 = vrot.lane.b32.xlu1 %v6069_v41, %s4387_s16 }
 0x650   : >> { %2586 = vrot.lane.b32.xlu0 %v6054_v37, %s4394_s29  ;;  %2584 = vrot.lane.b32.xlu1 %v6057_v0, %s4394_s29 }
 0x654   : >> { %2598 = vrot.lane.b32.xlu0 %v6066_v30, %s4394_s29  ;;  %2596 = vrot.lane.b32.xlu1 %v6069_v41, %s4394_s29 }
 0x658   : >> { %2334 = vrot.lane.b32.xlu0 %v6076_v44, %s4387_s16  ;;  %2332 = vrot.lane.b32.xlu1 %v6079_v57, %s4387_s16 }
 0x65c   : >> { %2346 = vrot.lane.b32.xlu0 %v6082_v29, %s4387_s16  ;;  %2344 = vrot.lane.b32.xlu1 %v6085_v39, %s4387_s16 }
 0x660   : >> { %2590 = vrot.lane.b32.xlu0 %v6076_v44, %s4394_s29  ;;  %2588 = vrot.lane.b32.xlu1 %v6079_v57, %s4394_s29 }
 0x664   : >> { %2602 = vrot.lane.b32.xlu0 %v6082_v29, %s4394_s29  ;;  %2600 = vrot.lane.b32.xlu1 %v6085_v39, %s4394_s29 }
 0x668   : >> { %2399 = vrot.lane.b32.xlu0 %v6048_v59, %s4388_s17  ;;  %2397 = vrot.lane.b32.xlu1 %v6051_v52, %s4388_s17 }
 0x66c   : >> { %2411 = vrot.lane.b32.xlu0 %v6060_v61, %s4388_s17  ;;  %2409 = vrot.lane.b32.xlu1 %v6063_v28, %s4388_s17 }
 0x670   : >> { %2655 = vrot.lane.b32.xlu0 %v6048_v59, %s4399_s26  ;;  %2653 = vrot.lane.b32.xlu1 %v6051_v52, %s4399_s26 }
 0x674   : >> { %2667 = vrot.lane.b32.xlu0 %v6060_v61, %s4399_s26  ;;  %2665 = vrot.lane.b32.xlu1 %v6063_v28, %s4399_s26 }
 0x678   : >> { %2403 = vrot.lane.b32.xlu0 %v6054_v37, %s4388_s17  ;;  %2401 = vrot.lane.b32.xlu1 %v6057_v0, %s4388_s17 }
 0x67c   : >> { %2415 = vrot.lane.b32.xlu0 %v6066_v30, %s4388_s17  ;;  %2413 = vrot.lane.b32.xlu1 %v6069_v41, %s4388_s17 }
 0x680   : >> { %2659 = vrot.lane.b32.xlu0 %v6054_v37, %s4399_s26  ;;  %2657 = vrot.lane.b32.xlu1 %v6057_v0, %s4399_s26 }
 0x684   : >> { %2671 = vrot.lane.b32.xlu0 %v6066_v30, %s4399_s26  ;;  %2669 = vrot.lane.b32.xlu1 %v6069_v41, %s4399_s26 }
 0x688   : >> { %2407 = vrot.lane.b32.xlu0 %v6076_v44, %s4388_s17  ;;  %2405 = vrot.lane.b32.xlu1 %v6079_v57, %s4388_s17 }
 0x68c   : >> { %2419 = vrot.lane.b32.xlu0 %v6082_v29, %s4388_s17  ;;  %2417 = vrot.lane.b32.xlu1 %v6085_v39, %s4388_s17 }
 0x690   : >> { %2663 = vrot.lane.b32.xlu0 %v6076_v44, %s4399_s26  ;;  %2661 = vrot.lane.b32.xlu1 %v6079_v57, %s4399_s26 }
 0x694   : >> { %2675 = vrot.lane.b32.xlu0 %v6082_v29, %s4399_s26  ;;  %2673 = vrot.lane.b32.xlu1 %v6085_v39, %s4399_s26 }
 0x698   : >> { %2472 = vrot.lane.b32.xlu0 %v6048_v59, %s4393_s20  ;;  %2470 = vrot.lane.b32.xlu1 %v6051_v52, %s4393_s20 }
 0x69a   : >> { %v2255_v50 = vpop.permute.xlu0 %2254  ;;  %v2253_v56 = vpop.permute.xlu1 %2252 }
 0x69c   : >> { %2484 = vrot.lane.b32.xlu0 %v6060_v61, %s4393_s20  ;;  %2482 = vrot.lane.b32.xlu1 %v6063_v28, %s4393_s20 }
 0x69e   : >> { %v2267_v48 = vpop.permute.xlu0 %2266  ;;  %v2265_v21 = vpop.permute.xlu1 %2264 }
 0x69f   : >> { %v2277_v26 = vsel %vm1426_vm10, %v2255_v50, %v2267_v48  ;;  %v2283_v38 = vsel %vm1426_vm10, %v2267_v48, %v2255_v50  ;;  %v2276_v5 = vsel %vm1426_vm10, %v2253_v56, %v2265_v21  ;;  %v2282_v46 = vsel %vm1426_vm10, %v2265_v21, %v2253_v56 }
 0x6a0   : >> { %v2302_v34 = vmul.f32 %v2293_v32, %v2283_v38  ;;  %v2303_v19 = vmul.f32 %v2297_v51, %v2277_v26  ;;  %v2300_v1 = vmul.f32 %v2293_v32, %v2282_v46  ;;  %v2301_v33 = vmul.f32 %v2297_v51, %v2276_v5  ;;  %2728 = vrot.lane.b32.xlu0 %v6048_v59, %s4400_s28 }
 0x6a1   : >> { %2726 = vrot.lane.b32.xlu1 %v6051_v52, %s4400_s28 }
 0x6a2   : >> { %v2312_v9 = vpack.c.bf16 %v2302_v34, %v2300_v1  ;;  %v2313_v49 = vpack.c.bf16 %v2303_v19, %v2301_v33  ;;  %v2259_v22 = vpop.permute.xlu0 %2258  ;;  %v2257_v10 = vpop.permute.xlu1 %2256  ;;  %v2361_v33 = vld [vmem:[#allocation9 + $0x1] ss:$8 sm:$0x3] }
 0x6a4   : >> { %2740 = vrot.lane.b32.xlu0 %v6060_v61, %s4400_s28  ;;  %3137 = vmatprep.subr.bf16.mxu1 %v2313_v49 }
 0x6a5   : >> { %2738 = vrot.lane.b32.xlu1 %v6063_v28, %s4400_s28  ;;  %3138 = vmatpush1.bf16.msra.mxu1 %v2312_v9 }
 0x6a6   : >> { %v2271_v6 = vpop.permute.xlu0 %2270  ;;  %v2269_v16 = vpop.permute.xlu1 %2268 }
 0x6a7   : >> { %v2279_v36 = vsel %vm1426_vm10, %v2259_v22, %v2271_v6  ;;  %v2285_v24 = vsel %vm1426_vm10, %v2271_v6, %v2259_v22  ;;  %v2278_v53 = vsel %vm1426_vm10, %v2257_v10, %v2269_v16  ;;  %v2284_v43 = vsel %vm1426_vm10, %v2269_v16, %v2257_v10 }
 0x6a8   : >> { %v2306_v58 = vmul.f32 %v2293_v32, %v2285_v24  ;;  %v2307_v12 = vmul.f32 %v2297_v51, %v2279_v36  ;;  %v2304_v15 = vmul.f32 %v2293_v32, %v2284_v43  ;;  %v2305_v17 = vmul.f32 %v2297_v51, %v2278_v53  ;;  %2476 = vrot.lane.b32.xlu0 %v6054_v37, %s4393_s20 }
 0x6a9   : >> { %2474 = vrot.lane.b32.xlu1 %v6057_v0, %s4393_s20  ;;  %v6300_v6 = vrot.slane %v2361_v33, %v6040_v13 }
 0x6aa   : >> { %v2314_v42 = vpack.c.bf16 %v2306_v58, %v2304_v15  ;;  %v2315_v23 = vpack.c.bf16 %v2307_v12, %v2305_v17  ;;  %v2263_v40 = vpop.permute.xlu0 %2262  ;;  %v2261_v50 = vpop.permute.xlu1 %2260 }
 0x6ac   : >> { %2488 = vrot.lane.b32.xlu0 %v6066_v30, %s4393_s20  ;;  %3139 = vmatprep.subr.bf16.mxu1 %v2315_v23 }
 0x6ad   : >> { %2486 = vrot.lane.b32.xlu1 %v6069_v41, %s4393_s20  ;;  %3140 = vmatpush1.bf16.msra.mxu1 %v2314_v42 }
 0x6ae   : >> { %v2275_v56 = vpop.permute.xlu0 %2274  ;;  %v2273_v48 = vpop.permute.xlu1 %2272 }
 0x6af   : >> { %v2281_v21 = vsel %vm1426_vm10, %v2263_v40, %v2275_v56  ;;  %v2287_v26 = vsel %vm1426_vm10, %v2275_v56, %v2263_v40  ;;  %v2280_v38 = vsel %vm1426_vm10, %v2261_v50, %v2273_v48  ;;  %v2286_v5 = vsel %vm1426_vm10, %v2273_v48, %v2261_v50 }
 0x6b0   : >> { %v2310_v46 = vmul.f32 %v2293_v32, %v2287_v26  ;;  %v2311_v34 = vmul.f32 %v2297_v51, %v2281_v21  ;;  %v2308_v19 = vmul.f32 %v2293_v32, %v2286_v5  ;;  %v2309_v1 = vmul.f32 %v2297_v51, %v2280_v38  ;;  %2732 = vrot.lane.b32.xlu0 %v6054_v37, %s4400_s28 }
 0x6b1   : >> { %2730 = vrot.lane.b32.xlu1 %v6057_v0, %s4400_s28  ;;  %v6303_v32 = vrot.slane %v2361_v33, %v6043_v7  ;;  %v2617_v33 = vld [vmem:[#allocation9 + $0x5] ss:$8 sm:$0x3]  ;;  %vm3112_vm10 = vcmask 523264  }
 0x6b2   : >> { %v2316_v9 = vpack.c.bf16 %v2310_v46, %v2308_v19  ;;  %v2317_v49 = vpack.c.bf16 %v2311_v34, %v2309_v1  ;;  %v2327_v22 = vpop.permute.xlu0 %2326  ;;  %v2325_v10 = vpop.permute.xlu1 %2324 }
 0x6b4   : >> { %2744 = vrot.lane.b32.xlu0 %v6066_v30, %s4400_s28  ;;  %3141 = vmatprep.subr.bf16.mxu1 %v2317_v49 }
 0x6b5   : >> { %2742 = vrot.lane.b32.xlu1 %v6069_v41, %s4400_s28  ;;  %3142 = vmatpush1.bf16.msra.mxu1 %v2316_v9 }
 0x6b6   : >> { %v2339_v51 = vpop.permute.xlu0 %2338  ;;  %v2337_v16 = vpop.permute.xlu1 %2336 }
 0x6b7   : >> { %v2349_v36 = vsel %vm1450_vm13, %v2327_v22, %v2339_v51  ;;  %v2355_v24 = vsel %vm1450_vm13, %v2339_v51, %v2327_v22  ;;  %v2348_v53 = vsel %vm1450_vm13, %v2325_v10, %v2337_v16  ;;  %v2354_v43 = vsel %vm1450_vm13, %v2337_v16, %v2325_v10 }
 0x6b8   : >> { %v2375_v58 = vmul.f32 %v6300_v6, %v2355_v24  ;;  %v2376_v12 = vmul.f32 %v6303_v32, %v2349_v36  ;;  %v2373_v15 = vmul.f32 %v6300_v6, %v2354_v43  ;;  %v2374_v17 = vmul.f32 %v6303_v32, %v2348_v53  ;;  %2480 = vrot.lane.b32.xlu0 %v6076_v44, %s4393_s20 }
 0x6b9   : >> { %2478 = vrot.lane.b32.xlu1 %v6079_v57, %s4393_s20  ;;  %v6346_v51 = vrot.slane %v2617_v33, %v6040_v13  ;;  %v6349_v16 = vrot.slane %v2617_v33, %v6043_v7 }
 0x6ba   : >> { %v2385_v42 = vpack.c.bf16 %v2375_v58, %v2373_v15  ;;  %v2386_v23 = vpack.c.bf16 %v2376_v12, %v2374_v17  ;;  %v2331_v40 = vpop.permute.xlu0 %2330  ;;  %v2329_v50 = vpop.permute.xlu1 %2328 }
 0x6bc   : >> { %2492 = vrot.lane.b32.xlu0 %v6082_v29, %s4393_s20  ;;  %3143 = vmatprep.subr.bf16.mxu1 %v2386_v23 }
 0x6bd   : >> { %2490 = vrot.lane.b32.xlu1 %v6085_v39, %s4393_s20  ;;  %3144 = vmatpush1.bf16.msra.mxu1 %v2385_v42 }
 0x6be   : >> { %v2343_v56 = vpop.permute.xlu0 %2342  ;;  %v2341_v48 = vpop.permute.xlu1 %2340 }
 0x6bf   : >> { %v2351_v21 = vsel %vm1450_vm13, %v2331_v40, %v2343_v56  ;;  %v2357_v26 = vsel %vm1450_vm13, %v2343_v56, %v2331_v40  ;;  %v2350_v38 = vsel %vm1450_vm13, %v2329_v50, %v2341_v48  ;;  %v2356_v5 = vsel %vm1450_vm13, %v2341_v48, %v2329_v50 }
 0x6c0   : >> { %v2379_v46 = vmul.f32 %v6300_v6, %v2357_v26  ;;  %v2380_v34 = vmul.f32 %v6303_v32, %v2351_v21  ;;  %v2377_v19 = vmul.f32 %v6300_v6, %v2356_v5  ;;  %v2378_v1 = vmul.f32 %v6303_v32, %v2350_v38  ;;  %2736 = vrot.lane.b32.xlu0 %v6076_v44, %s4400_s28 }
 0x6c1   : >> { %2734 = vrot.lane.b32.xlu1 %v6079_v57, %s4400_s28 }
 0x6c2   : >> { %v2387_v9 = vpack.c.bf16 %v2379_v46, %v2377_v19  ;;  %v2388_v49 = vpack.c.bf16 %v2380_v34, %v2378_v1  ;;  %v2587_v22 = vpop.permute.xlu0 %2586  ;;  %v2585_v10 = vpop.permute.xlu1 %2584 }
 0x6c4   : >> { %2748 = vrot.lane.b32.xlu0 %v6082_v29, %s4400_s28  ;;  %3145 = vmatprep.subr.bf16.mxu1 %v2388_v49 }
 0x6c5   : >> { %2746 = vrot.lane.b32.xlu1 %v6085_v39, %s4400_s28  ;;  %3146 = vmatpush1.bf16.msra.mxu1 %v2387_v9 }
 0x6c6   : >> { %v2599_v36 = vpop.permute.xlu0 %2598  ;;  %v2597_v24 = vpop.permute.xlu1 %2596 }
 0x6c7   : >> { %v2607_v53 = vsel %vm1635_vm5, %v2587_v22, %v2599_v36  ;;  %v2613_v43 = vsel %vm1635_vm5, %v2599_v36, %v2587_v22  ;;  %v2606_v58 = vsel %vm1635_vm5, %v2585_v10, %v2597_v24  ;;  %v2612_v12 = vsel %vm1635_vm5, %v2597_v24, %v2585_v10 }
 0x6c8   : >> { %v2635_v15 = vmul.f32 %v6346_v51, %v2607_v53  ;;  %v2636_v17 = vmul.f32 %v6349_v16, %v2613_v43  ;;  %v2633_v42 = vmul.f32 %v6346_v51, %v2606_v58  ;;  %v2634_v23 = vmul.f32 %v6349_v16, %v2612_v12  ;;  %2801 = vrot.lane.b32.xlu0 %v6048_v59, %s4401_s10  ;;  %v2434_v12 = vld [vmem:[#allocation9 + $0x2] ss:$8 sm:$0x3] }
 0x6c9   : >> { %2799 = vrot.lane.b32.xlu1 %v6051_v52, %s4401_s10 }
 0x6ca   : >> { %v2643_v40 = vpack.c.bf16 %v2635_v15, %v2633_v42  ;;  %v2644_v50 = vpack.c.bf16 %v2636_v17, %v2634_v23  ;;  %v2335_v56 = vpop.permute.xlu0 %2334  ;;  %v2333_v48 = vpop.permute.xlu1 %2332 }
 0x6cc   : >> { %2813 = vrot.lane.b32.xlu0 %v6060_v61, %s4401_s10  ;;  %3250 = vmatprep.subr.bf16.mxu0 %v2644_v50  ;;  %v6415_v50 = vrot.slane %v2434_v12, %v6043_v7 }
 0x6cd   : >> { %2811 = vrot.lane.b32.xlu1 %v6063_v28, %s4401_s10  ;;  %3251 = vmatpush1.bf16.msra.mxu0 %v2643_v40  ;;  %v6412_v40 = vrot.slane %v2434_v12, %v6040_v13 }
 0x6ce   : >> { %v2347_v21 = vpop.permute.xlu0 %2346  ;;  %v2345_v26 = vpop.permute.xlu1 %2344 }
 0x6cf   : >> { %v2353_v38 = vsel %vm1450_vm13, %v2335_v56, %v2347_v21  ;;  %v2359_v5 = vsel %vm1450_vm13, %v2347_v21, %v2335_v56  ;;  %v2352_v46 = vsel %vm1450_vm13, %v2333_v48, %v2345_v26  ;;  %v2358_v34 = vsel %vm1450_vm13, %v2345_v26, %v2333_v48  ;;  %v4012_v56 = vld [vmem:[%s6777_s7 + $0x4] ss:$16 sps:$4 sm:$0xff]   ;;  %v4015_v26 = vld [vmem:[%s6777_s7 + $0xc] ss:$16 sps:$4 sm:$0xff]  }
 0x6d0   : >> { %v2383_v19 = vmul.f32 %v6300_v6, %v2359_v5  ;;  %v2384_v1 = vmul.f32 %v6303_v32, %v2353_v38  ;;  %v2381_v33 = vmul.f32 %v6300_v6, %v2358_v34  ;;  %v2382_v9 = vmul.f32 %v6303_v32, %v2352_v46  ;;  %2805 = vrot.lane.b32.xlu0 %v6054_v37, %s4401_s10 }
 0x6d1   : >> { %2803 = vrot.lane.b32.xlu1 %v6057_v0, %s4401_s10  ;;  %3169 = vmatprep.mubr.bf16.mxu1 %v4012_v56  ;;  %vm7062_vm13 = vcmp.lt.s32.totalorder %v4583_v3, 112 }
 0x6d2   : >> { %v2389_v49 = vpack.c.bf16 %v2383_v19, %v2381_v33  ;;  %v2390_v22 = vpack.c.bf16 %v2384_v1, %v2382_v9  ;;  %v2591_v10 = vpop.permute.xlu0 %2590  ;;  %v2589_v36 = vpop.permute.xlu1 %2588  ;;  %v2690_v19 = vld [vmem:[#allocation9 + $0x6] ss:$8 sm:$0x3]  ;;  %3783 = vmatprep.mubr.msk.bf16.mxu0 %vm3112_vm10, %v4015_v26 }
 0x6d4   : >> { %2817 = vrot.lane.b32.xlu0 %v6066_v30, %s4401_s10  ;;  %3147 = vmatprep.subr.bf16.mxu1 %v2390_v22  ;;  %v6445_v22 = vrot.slane %v2690_v19, %v6040_v13 }
 0x6d5   : >> { %2815 = vrot.lane.b32.xlu1 %v6069_v41, %s4401_s10  ;;  %3148 = vmatpush1.bf16.msra.mxu1 %v2389_v49 }
 0x6d6   : >> { %v2603_v6 = vpop.permute.xlu0 %2602  ;;  %v2601_v32 = vpop.permute.xlu1 %2600 }
 0x6d7   : >> { %v2609_v37 = vsel %vm1635_vm5, %v2591_v10, %v2603_v6  ;;  %v2615_v0 = vsel %vm1635_vm5, %v2603_v6, %v2591_v10  ;;  %v2608_v24 = vsel %vm1635_vm5, %v2589_v36, %v2601_v32  ;;  %v2614_v53 = vsel %vm1635_vm5, %v2601_v32, %v2589_v36 }
 0x6d8   : >> { %v2639_v30 = vmul.f32 %v6346_v51, %v2609_v37  ;;  %v2640_v43 = vmul.f32 %v6349_v16, %v2615_v0  ;;  %v2637_v41 = vmul.f32 %v6346_v51, %v2608_v24  ;;  %v2638_v58 = vmul.f32 %v6349_v16, %v2614_v53  ;;  %2809 = vrot.lane.b32.xlu0 %v6076_v44, %s4401_s10 }
 0x6d9   : >> { %2807 = vrot.lane.b32.xlu1 %v6079_v57, %s4401_s10  ;;  %v6448_v10 = vrot.slane %v2690_v19, %v6043_v7 }
 0x6da   : >> { %v2645_v15 = vpack.c.bf16 %v2639_v30, %v2637_v41  ;;  %v2646_v17 = vpack.c.bf16 %v2640_v43, %v2638_v58  ;;  %v2400_v42 = vpop.permute.xlu0 %2399  ;;  %v2398_v23 = vpop.permute.xlu1 %2397 }
 0x6dc   : >> { %2821 = vrot.lane.b32.xlu0 %v6082_v29, %s4401_s10  ;;  %3252 = vmatprep.subr.bf16.mxu0 %v2646_v17 }
 0x6dd   : >> { %2819 = vrot.lane.b32.xlu1 %v6085_v39, %s4401_s10  ;;  %3253 = vmatpush1.bf16.msra.mxu0 %v2645_v15 }
 0x6de   : >> { %v2412_v44 = vpop.permute.xlu0 %2411  ;;  %v2410_v57 = vpop.permute.xlu1 %2409 }
 0x6df   : >> { %v2422_v29 = vsel %vm1474_vm14, %v2400_v42, %v2412_v44  ;;  %v2428_v48 = vsel %vm1474_vm14, %v2412_v44, %v2400_v42  ;;  %v2421_v21 = vsel %vm1474_vm14, %v2398_v23, %v2410_v57  ;;  %v2427_v39 = vsel %vm1474_vm14, %v2410_v57, %v2398_v23 }
 0x6e0   : >> { %v2448_v38 = vmul.f32 %v6412_v40, %v2428_v48  ;;  %v2449_v5 = vmul.f32 %v6415_v50, %v2422_v29  ;;  %v2446_v46 = vmul.f32 %v6412_v40, %v2427_v39  ;;  %v2447_v34 = vmul.f32 %v6415_v50, %v2421_v21  ;;  %2582 = vrot.lane.b32.xlu0 %v6048_v59, %s4394_s29 }
 0x6e1   : >> { %2580 = vrot.lane.b32.xlu1 %v6051_v52, %s4394_s29 }
 0x6e2   : >> { %v2458_v1 = vpack.c.bf16 %v2448_v38, %v2446_v46  ;;  %v2459_v33 = vpack.c.bf16 %v2449_v5, %v2447_v34  ;;  %v2656_v9 = vpop.permute.xlu0 %2655  ;;  %v2654_v49 = vpop.permute.xlu1 %2653 }
 0x6e4   : >> { %2594 = vrot.lane.b32.xlu0 %v6060_v61, %s4394_s29  ;;  %3149 = vmatprep.subr.bf16.mxu1 %v2459_v33 }
 0x6e5   : >> { %2592 = vrot.lane.b32.xlu1 %v6063_v28, %s4394_s29  ;;  %3150 = vmatpush1.bf16.msra.mxu1 %v2458_v1 }
 0x6e6   : >> { %v2668_v59 = vpop.permute.xlu0 %2667  ;;  %v2666_v52 = vpop.permute.xlu1 %2665 }
 0x6e7   : >> { %v2678_v36 = vsel %vm1755_vm11, %v2656_v9, %v2668_v59  ;;  %v2684_v6 = vsel %vm1755_vm11, %v2668_v59, %v2656_v9  ;;  %v2677_v61 = vsel %vm1755_vm11, %v2654_v49, %v2666_v52  ;;  %v2683_v32 = vsel %vm1755_vm11, %v2666_v52, %v2654_v49 }
 0x6e8   : >> { %v2704_v37 = vmul.f32 %v6445_v22, %v2678_v36  ;;  %v2705_v0 = vmul.f32 %v6448_v10, %v2684_v6  ;;  %v2702_v28 = vmul.f32 %v6445_v22, %v2677_v61  ;;  %v2703_v24 = vmul.f32 %v6448_v10, %v2683_v32 }
 0x6ea   : >> { %v2714_v53 = vpack.c.bf16 %v2704_v37, %v2702_v28  ;;  %v2715_v30 = vpack.c.bf16 %v2705_v0, %v2703_v24  ;;  %v2404_v43 = vpop.permute.xlu0 %2403  ;;  %v2402_v41 = vpop.permute.xlu1 %2401 }
 0x6ec   : >> { %3254 = vmatprep.subr.bf16.mxu0 %v2715_v30 }
 0x6ed   : >> { %3255 = vmatpush1.bf16.msra.mxu0 %v2714_v53 }
 0x6ee   : >> { %v2416_v58 = vpop.permute.xlu0 %2415  ;;  %v2414_v12 = vpop.permute.xlu1 %2413 }
 0x6ef   : >> { %v2424_v15 = vsel %vm1474_vm14, %v2404_v43, %v2416_v58  ;;  %v2430_v17 = vsel %vm1474_vm14, %v2416_v58, %v2404_v43  ;;  %v2423_v42 = vsel %vm1474_vm14, %v2402_v41, %v2414_v12  ;;  %v2429_v23 = vsel %vm1474_vm14, %v2414_v12, %v2402_v41 }
 0x6f0   : >> { %v2452_v44 = vmul.f32 %v6412_v40, %v2430_v17  ;;  %v2453_v57 = vmul.f32 %v6415_v50, %v2424_v15  ;;  %v2450_v56 = vmul.f32 %v6412_v40, %v2429_v23  ;;  %v2451_v29 = vmul.f32 %v6415_v50, %v2423_v42 }
 0x6f2   : >> { %v2460_v48 = vpack.c.bf16 %v2452_v44, %v2450_v56  ;;  %v2461_v21 = vpack.c.bf16 %v2453_v57, %v2451_v29  ;;  %v2660_v39 = vpop.permute.xlu0 %2659  ;;  %v2658_v26 = vpop.permute.xlu1 %2657 }
 0x6f4   : >> { %3151 = vmatprep.subr.bf16.mxu1 %v2461_v21 }
 0x6f5   : >> { %3152 = vmatpush1.bf16.msra.mxu1 %v2460_v48 }
 0x6f6   : >> { %v2672_v38 = vpop.permute.xlu0 %2671  ;;  %v2670_v5 = vpop.permute.xlu1 %2669 }
 0x6f7   : >> { %v2680_v46 = vsel %vm1755_vm11, %v2660_v39, %v2672_v38  ;;  %v2686_v34 = vsel %vm1755_vm11, %v2672_v38, %v2660_v39  ;;  %v2679_v19 = vsel %vm1755_vm11, %v2658_v26, %v2670_v5  ;;  %v2685_v1 = vsel %vm1755_vm11, %v2670_v5, %v2658_v26  ;;  %v2507_v26 = vld [vmem:[#allocation9 + $0x3] ss:$8 sm:$0x3] }
 0x6f8   : >> { %v2708_v33 = vmul.f32 %v6445_v22, %v2680_v46  ;;  %v2709_v9 = vmul.f32 %v6448_v10, %v2686_v34  ;;  %v2706_v49 = vmul.f32 %v6445_v22, %v2679_v19  ;;  %v2707_v59 = vmul.f32 %v6448_v10, %v2685_v1 }
 0x6f9   : >> { %v6513_v19 = vrot.slane %v2507_v26, %v6040_v13  ;;  %v6516_v1 = vrot.slane %v2507_v26, %v6043_v7 }
 0x6fa   : >> { %v2716_v52 = vpack.c.bf16 %v2708_v33, %v2706_v49  ;;  %v2717_v36 = vpack.c.bf16 %v2709_v9, %v2707_v59  ;;  %v2408_v6 = vpop.permute.xlu0 %2407  ;;  %v2406_v61 = vpop.permute.xlu1 %2405 }
 0x6fc   : >> { %3256 = vmatprep.subr.bf16.mxu0 %v2717_v36 }
 0x6fd   : >> { %3257 = vmatpush1.bf16.msra.mxu0 %v2716_v52 }
 0x6fe   : >> { %v2420_v32 = vpop.permute.xlu0 %2419  ;;  %v2418_v37 = vpop.permute.xlu1 %2417 }
 0x6ff   : >> { %v2426_v0 = vsel %vm1474_vm14, %v2408_v6, %v2420_v32  ;;  %v2432_v28 = vsel %vm1474_vm14, %v2420_v32, %v2408_v6  ;;  %v2425_v24 = vsel %vm1474_vm14, %v2406_v61, %v2418_v37  ;;  %v2431_v53 = vsel %vm1474_vm14, %v2418_v37, %v2406_v61  ;;  %v2763_v32 = vld [vmem:[#allocation9 + $0x7] ss:$8 sm:$0x3]  ;;  %vm7063_vm14 = vmmov %vm7062_vm13 }
 0x700   : >> { %v2456_v30 = vmul.f32 %v6412_v40, %v2432_v28  ;;  %v2457_v43 = vmul.f32 %v6415_v50, %v2426_v0  ;;  %v2454_v41 = vmul.f32 %v6412_v40, %v2431_v53  ;;  %v2455_v58 = vmul.f32 %v6415_v50, %v2425_v24 }
 0x701   : >> { %v6531_v53 = vrot.slane %v2763_v32, %v6040_v13 }
 0x702   : >> { %v2462_v12 = vpack.c.bf16 %v2456_v30, %v2454_v41  ;;  %v2463_v15 = vpack.c.bf16 %v2457_v43, %v2455_v58  ;;  %v2664_v17 = vpop.permute.xlu0 %2663  ;;  %v2662_v42 = vpop.permute.xlu1 %2661  ;;  %v6534_v30 = vrot.slane %v2763_v32, %v6043_v7 }
 0x704   : >> { %3153 = vmatprep.subr.bf16.mxu1 %v2463_v15 }
 0x705   : >> { %3154 = vmatpush1.bf16.msra.mxu1 %v2462_v12 }
 0x706   : >> { %v2676_v23 = vpop.permute.xlu0 %2675  ;;  %v2674_v44 = vpop.permute.xlu1 %2673 }
 0x707   : >> { %v2682_v57 = vsel %vm1755_vm11, %v2664_v17, %v2676_v23  ;;  %v2688_v56 = vsel %vm1755_vm11, %v2676_v23, %v2664_v17  ;;  %v2681_v29 = vsel %vm1755_vm11, %v2662_v42, %v2674_v44  ;;  %v2687_v40 = vsel %vm1755_vm11, %v2674_v44, %v2662_v42  ;;  %vm7064_vm11 = vmmov %vm7062_vm13 }
 0x708   : >> { %v2712_v50 = vmul.f32 %v6445_v22, %v2682_v57  ;;  %v2713_v48 = vmul.f32 %v6448_v10, %v2688_v56  ;;  %v2710_v21 = vmul.f32 %v6445_v22, %v2681_v29  ;;  %v2711_v39 = vmul.f32 %v6448_v10, %v2687_v40  ;;  %vm7065_vm12 = vmmov %vm7064_vm11 }
 0x709   : >> { %vm7066_vm15 = vmmov %vm7064_vm11 }
 0x70a   : >> { %v2718_v38 = vpack.c.bf16 %v2712_v50, %v2710_v21  ;;  %v2719_v5 = vpack.c.bf16 %v2713_v48, %v2711_v39  ;;  %v2473_v46 = vpop.permute.xlu0 %2472  ;;  %v2471_v34 = vpop.permute.xlu1 %2470  ;;  %vm7067_vm9 = vmmov %vm7064_vm11 }
 0x70b   : >> { %vm7068_vm2 = vmmov %vm7067_vm9 }
 0x70c   : >> { %3258 = vmatprep.subr.bf16.mxu0 %v2719_v5  ;;  %vm7069_vm3 = vmmov %vm7068_vm2 }
 0x70d   : >> { %3259 = vmatpush1.bf16.msra.mxu0 %v2718_v38  ;;  %vm7070_vm6 = vmmov %vm7068_vm2 }
 0x70e   : >> { %v2485_v33 = vpop.permute.xlu0 %2484  ;;  %v2483_v9 = vpop.permute.xlu1 %2482  ;;  %vm7071_vm7 = vmmov %vm7068_vm2 }
 0x70f   : >> { %v2495_v22 = vsel %vm1594_vm4, %v2473_v46, %v2485_v33  ;;  %v2501_v10 = vsel %vm1594_vm4, %v2485_v33, %v2473_v46  ;;  %v2494_v49 = vsel %vm1594_vm4, %v2471_v34, %v2483_v9  ;;  %v2500_v59 = vsel %vm1594_vm4, %v2483_v9, %v2471_v34  ;;  %vm7073_vm8 = vmmov %vm7068_vm2 }
 0x710   : >> { %v2521_v52 = vmul.f32 %v6513_v19, %v2501_v10  ;;  %v2522_v36 = vmul.f32 %v6516_v1, %v2495_v22  ;;  %v2519_v6 = vmul.f32 %v6513_v19, %v2500_v59  ;;  %v2520_v61 = vmul.f32 %v6516_v1, %v2494_v49 }
 0x712   : >> { %v2531_v37 = vpack.c.bf16 %v2521_v52, %v2519_v6  ;;  %v2532_v0 = vpack.c.bf16 %v2522_v36, %v2520_v61  ;;  %v2729_v28 = vpop.permute.xlu0 %2728 }
 0x713   : >> { %v2727_v24 = vpop.permute.xlu1 %2726 }
 0x714   : >> { %3155 = vmatprep.subr.bf16.mxu1 %v2532_v0 }
 0x715   : >> { %3156 = vmatpush1.bf16.msra.mxu1 %v2531_v37 }
 0x716   : >> { %v2741_v43 = vpop.permute.xlu0 %2740 }
 0x717   : >> { %v2751_v41 = vsel %vm7062_vm13, %v2729_v28, %v2741_v43  ;;  %v2757_v58 = vsel %vm7063_vm14, %v2741_v43, %v2729_v28  ;;  %v2739_v12 = vpop.permute.xlu1 %2738  ;;  %vm7076_vm13 = vmmov %vm7074_vm0 }
 0x718   : >> { %v2777_v15 = vmul.f32 %v6531_v53, %v2751_v41  ;;  %v2778_v17 = vmul.f32 %v6534_v30, %v2757_v58  ;;  %v2750_v42 = vsel %vm7064_vm11, %v2727_v24, %v2739_v12  ;;  %v2756_v23 = vsel %vm7065_vm12, %v2739_v12, %v2727_v24  ;;  %vm7077_vm14 = vmmov %vm7074_vm0 }
 0x719   : >> { %v2775_v44 = vmul.f32 %v6531_v53, %v2750_v42  ;;  %v2776_v57 = vmul.f32 %v6534_v30, %v2756_v23  ;;  %vm7078_vm11 = vmmov %vm7074_vm0 }
 0x71a   : >> { %v2477_v56 = vpop.permute.xlu0 %2476  ;;  %vm7079_vm12 = vmmov %vm7074_vm0 }
 0x71b   : >> { %v2787_v29 = vpack.c.bf16 %v2777_v15, %v2775_v44  ;;  %v2788_v40 = vpack.c.bf16 %v2778_v17, %v2776_v57  ;;  %v2475_v50 = vpop.permute.xlu1 %2474 }
 0x71d   : >> { %3260 = vmatprep.subr.bf16.mxu0 %v2788_v40 }
 0x71e   : >> { %v2489_v48 = vpop.permute.xlu0 %2488  ;;  %3261 = vmatpush1.bf16.msra.mxu0 %v2787_v29 }
 0x71f   : >> { %v2497_v21 = vsel %vm1594_vm4, %v2477_v56, %v2489_v48  ;;  %v2503_v39 = vsel %vm1594_vm4, %v2489_v48, %v2477_v56  ;;  %v2487_v26 = vpop.permute.xlu1 %2486 }
 0x720   : >> { %v2525_v38 = vmul.f32 %v6513_v19, %v2503_v39  ;;  %v2526_v5 = vmul.f32 %v6516_v1, %v2497_v21  ;;  %v2496_v46 = vsel %vm1594_vm4, %v2475_v50, %v2487_v26  ;;  %v2502_v34 = vsel %vm1594_vm4, %v2487_v26, %v2475_v50 }
 0x721   : >> { %v2523_v33 = vmul.f32 %v6513_v19, %v2502_v34  ;;  %v2524_v9 = vmul.f32 %v6516_v1, %v2496_v46 }
 0x722   : >> { %v2733_v22 = vpop.permute.xlu0 %2732 }
 0x723   : >> { %v2533_v10 = vpack.c.bf16 %v2525_v38, %v2523_v33  ;;  %v2534_v49 = vpack.c.bf16 %v2526_v5, %v2524_v9  ;;  %v2731_v59 = vpop.permute.xlu1 %2730 }
 0x725   : >> { %3157 = vmatprep.subr.bf16.mxu1 %v2534_v49 }
 0x726   : >> { %v2745_v52 = vpop.permute.xlu0 %2744  ;;  %3158 = vmatpush1.bf16.msra.mxu1 %v2533_v10 }
 0x727   : >> { %v2753_v36 = vsel %vm7066_vm15, %v2733_v22, %v2745_v52  ;;  %v2759_v6 = vsel %vm7067_vm9, %v2745_v52, %v2733_v22  ;;  %v2743_v61 = vpop.permute.xlu1 %2742  ;;  %vm7080_vm15 = vmmov %vm7074_vm0 }
 0x728   : >> { %v2781_v32 = vmul.f32 %v6531_v53, %v2753_v36  ;;  %v2782_v37 = vmul.f32 %v6534_v30, %v2759_v6  ;;  %v2752_v0 = vsel %vm7068_vm2, %v2731_v59, %v2743_v61  ;;  %v2758_v28 = vsel %vm7069_vm3, %v2743_v61, %v2731_v59  ;;  %v2836_v59 = vld [vmem:[#allocation9 + $0x10] ss:$8 sm:$0x3]  ;;  %vm7081_vm9 = vmmov %vm7074_vm0 }
 0x729   : >> { %v2779_v24 = vmul.f32 %v6531_v53, %v2752_v0  ;;  %v2780_v43 = vmul.f32 %v6534_v30, %v2758_v28  ;;  %v2841_v36 = vrot.slane %v2836_v59, %v6040_v13  ;;  %v2845_v6 = vrot.slane %v2836_v59, %v6043_v7  ;;  %vm7083_vm3 = vmmov %vm7074_vm0  ;;  %v4013_v59 = vld [vmem:[%s6777_s7 + $0x8] ss:$16 sps:$4 sm:$0xff]  }
 0x72a   : >> { %v2481_v41 = vpop.permute.xlu0 %2480 }
 0x72b   : >> { %v2789_v58 = vpack.c.bf16 %v2781_v32, %v2779_v24  ;;  %v2790_v12 = vpack.c.bf16 %v2782_v37, %v2780_v43  ;;  %v2479_v15 = vpop.permute.xlu1 %2478 }
 0x72d   : >> { %3262 = vmatprep.subr.bf16.mxu0 %v2790_v12 }
 0x72e   : >> { %v2493_v17 = vpop.permute.xlu0 %2492  ;;  %3263 = vmatpush1.bf16.msra.mxu0 %v2789_v58 }
 0x72f   : >> { %v2499_v42 = vsel %vm1594_vm4, %v2481_v41, %v2493_v17  ;;  %v2505_v23 = vsel %vm1594_vm4, %v2493_v17, %v2481_v41  ;;  %v2491_v44 = vpop.permute.xlu1 %2490 }
 0x730   : >> { %v2529_v57 = vmul.f32 %v6513_v19, %v2505_v23  ;;  %v2530_v56 = vmul.f32 %v6516_v1, %v2499_v42  ;;  %v2498_v29 = vsel %vm1594_vm4, %v2479_v15, %v2491_v44  ;;  %v2504_v40 = vsel %vm1594_vm4, %v2491_v44, %v2479_v15  ;;  %vm7072_vm4 = vmmov %vm7068_vm2 }
 0x731   : >> { %v2527_v50 = vmul.f32 %v6513_v19, %v2504_v40  ;;  %v2528_v48 = vmul.f32 %v6516_v1, %v2498_v29  ;;  %vm7082_vm2 = vmmov %vm7074_vm0 }
 0x732   : >> { %v2737_v21 = vpop.permute.xlu0 %2736 }
 0x733   : >> { %v2535_v39 = vpack.c.bf16 %v2529_v57, %v2527_v50  ;;  %v2536_v26 = vpack.c.bf16 %v2530_v56, %v2528_v48  ;;  %v2735_v38 = vpop.permute.xlu1 %2734 }
 0x735   : >> { %3159 = vmatprep.subr.bf16.mxu1 %v2536_v26  ;;  %v2959_v26 = vld [vmem:[#allocation4 + $0x1b8] sm:$0xff] }
 0x736   : >> { %v2749_v5 = vpop.permute.xlu0 %2748  ;;  %3160 = vmatpush1.bf16.msra.mxu1 %v2535_v39 }
 0x737   : >> { %v2755_v46 = vsel %vm7070_vm6, %v2737_v21, %v2749_v5  ;;  %v2761_v34 = vsel %vm7071_vm7, %v2749_v5, %v2737_v21  ;;  %v2747_v33 = vpop.permute.xlu1 %2746  ;;  %3161 = vmatprep.subr.bf16.mxu1 %v2569_v8  ;;  %vm7084_vm6 = vmmov %vm7074_vm0 }
 0x738   : >> { %v2785_v19 = vmul.f32 %v6531_v53, %v2755_v46  ;;  %v2786_v1 = vmul.f32 %v6534_v30, %v2761_v34  ;;  %v2754_v9 = vsel %vm7072_vm4, %v2735_v38, %v2747_v33  ;;  %v2760_v22 = vsel %vm7073_vm8, %v2747_v33, %v2735_v38  ;;  %vm7085_vm7 = vmmov %vm7074_vm0  ;;  %v2958_v33 = vld [vmem:[#allocation4 + $0x1b0] sm:$0xff] }
 0x739   : >> { %v2783_v10 = vmul.f32 %v6531_v53, %v2754_v9  ;;  %v2784_v49 = vmul.f32 %v6534_v30, %v2760_v22 }
 0x73a   : >> { %v2802_v52 = vpop.permute.xlu0 %2801  ;;  %3162 = vmatpush1.bf16.msra.mxu1 %v2568_v4 }
 0x73b   : >> { %v2791_v45 = vpack.c.bf16 %v2785_v19, %v2783_v10  ;;  %v2792_v62 = vpack.c.bf16 %v2786_v1, %v2784_v49  ;;  %v2800_v8 = vpop.permute.xlu1 %2799  ;;  %3163 = vmatprep.subr.bf16.mxu1 %v2571_v55 }
 0x73d   : >> { %3264 = vmatprep.subr.bf16.mxu0 %v2792_v62 }
 0x73e   : >> { %v2814_v53 = vpop.permute.xlu0 %2813  ;;  %3164 = vmatpush1.bf16.msra.mxu1 %v2570_v31  ;;  %3265 = vmatpush1.bf16.msra.mxu0 %v2791_v45 }
 0x73f   : >> { %v2824_v60 = vsel %vm7074_vm0, %v2802_v52, %v2814_v53  ;;  %v2830_v2 = vsel %vm7075_vm1, %v2814_v53, %v2802_v52  ;;  %v2812_v4 = vpop.permute.xlu1 %2811  ;;  %3165 = vmatprep.subr.bf16.mxu1 %v2573_v25  ;;  %v4018_v52 = vld [vmem:[%s6777_s7 + $0x2c] ss:$16 sps:$4 sm:$0xff]   ;;  %v4022_v53 = vld [vmem:[%s6777_s7 + $0x44] ss:$16 sps:$4 sm:$0xff]  }
 0x740   : >> { %v2850_v13 = vmul.f32 %v2841_v36, %v2824_v60  ;;  %v2851_v7 = vmul.f32 %v2845_v6, %v2830_v2  ;;  %v2823_v63 = vsel %vm7076_vm13, %v2800_v8, %v2812_v4  ;;  %v2829_v14 = vsel %vm7077_vm14, %v2812_v4, %v2800_v8  ;;  %v4010_v8 = vld [vmem:[%s6777_s7] ss:$16 sps:$4 sm:$0xff]   ;;  %v4027_v60 = vld [vmem:[%s6777_s7 + $0x48] ss:$16 sps:$4 sm:$0xff]   ;;  %v4030_v2 = vld [vmem:[%s6777_s7 + $0x6c] ss:$16 sps:$4 sm:$0xff]  }
 0x741   : >> { %v2848_v11 = vmul.f32 %v2841_v36, %v2823_v63  ;;  %v2849_v54 = vmul.f32 %v2845_v6, %v2829_v14  ;;  %v4026_v4 = vld [vmem:[%s6777_s7 + $0x40] ss:$16 sps:$4 sm:$0xff]   ;;  %v4036_v63 = vld [vmem:[%s6777_s7 + $0x8c] ss:$16 sps:$4 sm:$0xff]  }
 0x742   : >> { %v2806_v55 = vpop.permute.xlu0 %2805  ;;  %3166 = vmatpush1.bf16.msra.mxu1 %v2572_v47  ;;  %v4032_v14 = vld [vmem:[%s6777_s7 + $0x60] ss:$16 sps:$4 sm:$0xff]  }
 0x743   : >> { %v2860_v31 = vpack.c.bf16 %v2850_v13, %v2848_v11  ;;  %v2861_v30 = vpack.c.bf16 %v2851_v7, %v2849_v54  ;;  %v2804_v61 = vpop.permute.xlu1 %2803  ;;  %v4028_v13 = vld [vmem:[%s6777_s7 + $0x64] ss:$16 sps:$4 sm:$0xff]   ;;  %v4033_v7 = vld [vmem:[%s6777_s7 + $0x68] ss:$16 sps:$4 sm:$0xff]  }
 0x744   : >> { %v4034_v11 = vld [vmem:[%s6777_s7 + $0x84] ss:$16 sps:$4 sm:$0xff]   ;;  %v4039_v54 = vld [vmem:[%s6777_s7 + $0x88] ss:$16 sps:$4 sm:$0xff]  }
 0x745   : >> { %3266 = vmatprep.subr.bf16.mxu0 %v2861_v30  ;;  %v4040_v30 = vld [vmem:[%s6777_s7 + $0xa4] ss:$16 sps:$4 sm:$0xff]  }
 0x746   : >> { %v2818_v18 = vpop.permute.xlu0 %2817  ;;  %3267 = vmatpush1.bf16.msra.mxu0 %v2860_v31  ;;  %v4038_v31 = vld [vmem:[%s6777_s7 + $0x80] ss:$16 sps:$4 sm:$0xff]  }
 0x747   : >> { %v2826_v20 = vsel %vm7078_vm11, %v2806_v55, %v2818_v18  ;;  %v2832_v25 = vsel %vm7079_vm12, %v2818_v18, %v2806_v55  ;;  %v2816_v32 = vpop.permute.xlu1 %2815  ;;  %v4042_v55 = vld [vmem:[%s6777_s7 + $0xac] ss:$16 sps:$4 sm:$0xff]  }
 0x748   : >> { %v2854_v37 = vmul.f32 %v2841_v36, %v2826_v20  ;;  %v2855_v0 = vmul.f32 %v2845_v6, %v2832_v25  ;;  %v2825_v28 = vsel %vm7080_vm15, %v2804_v61, %v2816_v32  ;;  %v2831_v35 = vsel %vm7081_vm9, %v2816_v32, %v2804_v61  ;;  %v4045_v61 = vld [vmem:[%s6777_s7 + $0xa8] ss:$16 sps:$4 sm:$0xff]   ;;  %v4048_v18 = vld [vmem:[%s6777_s7 + $0xcc] ss:$16 sps:$4 sm:$0xff]   ;;  %v4044_v20 = vld [vmem:[%s6777_s7 + $0xa0] ss:$16 sps:$4 sm:$0xff]  }
 0x749   : >> { %v2852_v27 = vmul.f32 %v2841_v36, %v2825_v28  ;;  %v2853_v47 = vmul.f32 %v2845_v6, %v2831_v35  ;;  %v4046_v25 = vld [vmem:[%s6777_s7 + $0xc4] ss:$16 sps:$4 sm:$0xff]   ;;  %v4051_v32 = vld [vmem:[%s6777_s7 + $0xc8] ss:$16 sps:$4 sm:$0xff]  }
 0x74a   : >> { %v2810_v24 = vpop.permute.xlu0 %2809  ;;  %v4052_v28 = vld [vmem:[%s6777_s7 + $0xe4] ss:$16 sps:$4 sm:$0xff]   ;;  %v4057_v35 = vld [vmem:[%s6777_s7 + $0xe8] ss:$16 sps:$4 sm:$0xff]  }
 0x74b   : >> { %v2862_v43 = vpack.c.bf16 %v2854_v37, %v2852_v27  ;;  %v2863_v41 = vpack.c.bf16 %v2855_v0, %v2853_v47  ;;  %v2808_v58 = vpop.permute.xlu1 %2807  ;;  %v4054_v37 = vld [vmem:[%s6777_s7 + $0xec] ss:$16 sps:$4 sm:$0xff]   ;;  %v4050_v0 = vld [vmem:[%s6777_s7 + $0xc0] ss:$16 sps:$4 sm:$0xff]  }
 0x74c   : >> { %v4056_v27 = vld [vmem:[%s6777_s7 + $0xe0] ss:$16 sps:$4 sm:$0xff]  }
 0x74d   : >> { %3268 = vmatprep.subr.bf16.mxu0 %v2863_v41 }
 0x74e   : >> { %v2822_v12 = vpop.permute.xlu0 %2821  ;;  %3269 = vmatpush1.bf16.msra.mxu0 %v2862_v43 }
 0x74f   : >> { %v2828_v15 = vsel %vm7082_vm2, %v2810_v24, %v2822_v12  ;;  %v2834_v17 = vsel %vm7083_vm3, %v2822_v12, %v2810_v24  ;;  %v2820_v42 = vpop.permute.xlu1 %2819 }
 0x750   : >> { %v2858_v23 = vmul.f32 %v2841_v36, %v2828_v15  ;;  %v2859_v44 = vmul.f32 %v2845_v6, %v2834_v17  ;;  %v2827_v57 = vsel %vm7084_vm6, %v2808_v58, %v2820_v42  ;;  %v2833_v56 = vsel %vm7085_vm7, %v2820_v42, %v2808_v58 }
 0x751   : >> { %v2856_v29 = vmul.f32 %v2841_v36, %v2827_v57  ;;  %v2857_v40 = vmul.f32 %v2845_v6, %v2833_v56  ;;  %v4024_v36 = vld [vmem:[%s6777_s7 + $0x4c] ss:$16 sps:$4 sm:$0xff]   ;;  %v4020_v6 = vld [vmem:[%s6777_s7 + $0x20] ss:$16 sps:$4 sm:$0xff]  }
 0x752   : >> { %v2583_v50 = vpop.permute.xlu0 %2582 }
 0x753   : >> { %v2864_v48 = vpack.c.bf16 %v2858_v23, %v2856_v29  ;;  %v2865_v21 = vpack.c.bf16 %v2859_v44, %v2857_v40  ;;  %v2581_v39 = vpop.permute.xlu1 %2580 }
 0x755   : >> { %3270 = vmatprep.subr.bf16.mxu0 %v2865_v21 }
 0x756   : >> { %v2595_v38 = vpop.permute.xlu0 %2594  ;;  %3271 = vmatpush1.bf16.msra.mxu0 %v2864_v48 }
 0x757   : >> { %v2605_v5 = vsel %vm1635_vm5, %v2583_v50, %v2595_v38  ;;  %v2611_v46 = vsel %vm1635_vm5, %v2595_v38, %v2583_v50  ;;  %v2593_v34 = vpop.permute.xlu1 %2592  ;;  %3272 = vmatprep.subr.bf16.mxu0 %v2959_v26 }
 0x758   : >> { %v2631_v19 = vmul.f32 %v6346_v51, %v2605_v5  ;;  %v2632_v1 = vmul.f32 %v6349_v16, %v2611_v46  ;;  %v2604_v9 = vsel %vm1635_vm5, %v2581_v39, %v2593_v34  ;;  %v2610_v22 = vsel %vm1635_vm5, %v2593_v34, %v2581_v39 }
 0x759   : >> { %v2629_v10 = vmul.f32 %v6346_v51, %v2604_v9  ;;  %v2630_v49 = vmul.f32 %v6349_v16, %v2610_v22  ;;  %v4016_v51 = vld [vmem:[%s6777_s7 + $0x24] ss:$16 sps:$4 sm:$0xff]   ;;  %v4021_v16 = vld [vmem:[%s6777_s7 + $0x28] ss:$16 sps:$4 sm:$0xff]  }
 0x75a   : >> { %3273 = vmatpush1.bf16.msra.mxu0 %v2958_v33 }
 0x75b   : >> { %v2641_v45 = vpack.c.bf16 %v2631_v19, %v2629_v10  ;;  %v2642_v62 = vpack.c.bf16 %v2632_v1, %v2630_v49 }
 0x75d   : >> { %3167 = vmatprep.subr.bf16.mxu1 %v2642_v62  ;;  %3283 = vmatmul.mubr.bf16.vlgmr.msra.gmra.mrb[8].mxu0 %v4013_v59 }
 0x75e   : >> { %3168 = vmatpush1.bf16.msra.mxu1 %v2641_v45  ;;  %3784 = vmatprep.mubr.msk.bf16.mxu0 %vm3112_vm10, %v4018_v52 }
 0x761   : >> { %3170 = vmatmul.mubr.bf16.vlgmr.msra.gmra.mrb[0].mxu1 %v4010_v8 }
 0x762   : >> { %3179 = vmatprep.mubr.bf16.mxu1 %v4016_v51 }
 0x765   : >> { %3293 = vmatmul.mubr.bf16.gmra.mrb[12].mxu0 %v4021_v16 }
 0x766   : >> { %3785 = vmatprep.mubr.msk.bf16.mxu0 %vm3112_vm10, %v4024_v36 }
 0x769   : >> { %3180 = vmatmul.mubr.bf16.gmra.mrb[4].mxu1 %v4020_v6 }
 0x76a   : >> { %3189 = vmatprep.mubr.bf16.mxu1 %v4022_v53 }
 0x76d   : >> { %3303 = vmatmul.mubr.bf16.gmra.mrb[16].mxu0 %v4027_v60 }
 0x76e   : >> { %3786 = vmatprep.mubr.msk.bf16.mxu0 %vm3112_vm10, %v4030_v2 }
 0x771   : >> { %3190 = vmatmul.mubr.bf16.gmra.mrb[8].mxu1 %v4026_v4 }
 0x772   : >> { %3199 = vmatprep.mubr.bf16.mxu1 %v4028_v13 }
 0x775   : >> { %3313 = vmatmul.mubr.bf16.gmra.mrb[20].mxu0 %v4033_v7 }
 0x776   : >> { %3787 = vmatprep.mubr.msk.bf16.mxu0 %vm3112_vm10, %v4036_v63 }
 0x779   : >> { %3200 = vmatmul.mubr.bf16.gmra.mrb[12].mxu1 %v4032_v14 }
 0x77a   : >> { %3209 = vmatprep.mubr.bf16.mxu1 %v4034_v11 }
 0x77d   : >> { %3323 = vmatmul.mubr.bf16.gmra.mrb[24].mxu0 %v4039_v54 }
 0x77e   : >> { %3788 = vmatprep.mubr.msk.bf16.mxu0 %vm3112_vm10, %v4042_v55 }
 0x781   : >> { %3210 = vmatmul.mubr.bf16.gmra.mrb[16].mxu1 %v4038_v31 }
 0x782   : >> { %3219 = vmatprep.mubr.bf16.mxu1 %v4040_v30 }
 0x785   : >> { %3333 = vmatmul.mubr.bf16.gmra.mrb[28].mxu0 %v4045_v61 }
 0x786   : >> { %3789 = vmatprep.mubr.msk.bf16.mxu0 %vm3112_vm10, %v4048_v18 }
 0x789   : >> { %3220 = vmatmul.mubr.bf16.gmra.mrb[20].mxu1 %v4044_v20 }
 0x78a   : >> { %3229 = vmatprep.mubr.bf16.mxu1 %v4046_v25 }
 0x78d   : >> { %3343 = vmatmul.mubr.bf16.gmra.mrb[32].mxu0 %v4051_v32 }
 0x78e   : >> { %3790 = vmatprep.mubr.msk.bf16.mxu0 %vm3112_vm10, %v4054_v37 }
 0x791   : >> { %3230 = vmatmul.mubr.bf16.gmra.mrb[24].mxu1 %v4050_v0 }
 0x792   : >> { %3239 = vmatprep.mubr.bf16.mxu1 %v4052_v28 }
 0x795   : >> { %3353 = vmatmul.mubr.bf16.gmra.mrb[36].mxu0 %v4057_v35 }
 0x799   : >> { %3240 = vmatmul.mubr.bf16.gmra.mrb[28].mxu1 %v4056_v27 }
 0x830   : >> { %v3284_v47 = vpop.f32.mrb[8].mxu0 }
 0x831   : >> { %v3286_v24 = vpop.f32.mrb[9].mxu0 }
 0x832   : >> { %v3288_v43 = vpop.f32.mrb[10].mxu0 }
 0x833   : >> { %v3290_v41 = vpop.f32.mrb[11].mxu0 }
 0x834   : >> { %v3171_v58 = vpop.f32.mrb[0].mxu1 }
 0x835   : >> { %v3285_v12 = vadd.f32 %v3284_v47, %v3171_v58  ;;  %v3173_v15 = vpop.f32.mrb[1].mxu1 }
 0x836   : >> { %v3287_v17 = vadd.f32 %v3286_v24, %v3173_v15  ;;  %v3175_v42 = vpop.f32.mrb[2].mxu1 }
 0x837   : >> { %v3791_v23 = vmul.f32 -1.442695, %v3285_v12  ;;  %v3289_v44 = vadd.f32 %v3288_v43, %v3175_v42  ;;  %v3177_v57 = vpop.f32.mrb[3].mxu1 }
 0x838   : >> { %v3792_v56 = vmul.f32 -1.442695, %v3287_v17  ;;  %v3291_v29 = vadd.f32 %v3290_v41, %v3177_v57  ;;  %v3294_v40 = vpop.f32.mrb[12].mxu0 }
 0x839   : >> { %4138 = vpow2.f32 %v3791_v23  ;;  %v3793_v50 = vmul.f32 -1.442695, %v3289_v44  ;;  %v3296_v48 = vpop.f32.mrb[13].mxu0 }
 0x83a   : >> { %4140 = vpow2.f32 %v3792_v56  ;;  %v3794_v21 = vmul.f32 -1.442695, %v3291_v29  ;;  %v3298_v39 = vpop.f32.mrb[14].mxu0 }
 0x83b   : >> { %4142 = vpow2.f32 %v3793_v50  ;;  %v3300_v26 = vpop.f32.mrb[15].mxu0 }
 0x83c   : >> { %v3181_v38 = vpop.f32.mrb[4].mxu1  ;;  %4144 = vpow2.f32 %v3794_v21 }
 0x83d   : >> { %v3295_v5 = vadd.f32 %v3294_v40, %v3181_v38  ;;  %v3183_v46 = vpop.f32.mrb[5].mxu1 }
 0x83e   : >> { %v3297_v34 = vadd.f32 %v3296_v48, %v3183_v46  ;;  %v3185_v33 = vpop.f32.mrb[6].mxu1 }
 0x83f   : >> { %v3795_v19 = vmul.f32 -1.442695, %v3295_v5  ;;  %v3299_v1 = vadd.f32 %v3298_v39, %v3185_v33  ;;  %v3187_v9 = vpop.f32.mrb[7].mxu1 }
 0x840   : >> { %v3796_v22 = vmul.f32 -1.442695, %v3297_v34  ;;  %v3301_v10 = vadd.f32 %v3300_v26, %v3187_v9  ;;  %v3304_v49 = vpop.f32.mrb[16].mxu0 }
 0x841   : >> { %4146 = vpow2.f32 %v3795_v19  ;;  %v3797_v59 = vmul.f32 -1.442695, %v3299_v1  ;;  %v3306_v52 = vpop.f32.mrb[17].mxu0 }
 0x842   : >> { %4148 = vpow2.f32 %v3796_v22  ;;  %v3798_v45 = vmul.f32 -1.442695, %v3301_v10  ;;  %v3308_v62 = vpop.f32.mrb[18].mxu0 }
 0x843   : >> { %v4139_v8 = vpop.eup %4138  ;;  %4150 = vpow2.f32 %v3797_v59  ;;  %v3310_v51 = vpop.f32.mrb[19].mxu0 }
 0x844   : >> { %v4141_v16 = vpop.eup %4140  ;;  %v3387_v36 = vadd.f32 1.0, %v4139_v8  ;;  %v3191_v6 = vpop.f32.mrb[8].mxu1  ;;  %4152 = vpow2.f32 %v3798_v45 }
 0x845   : >> { %v4143_v53 = vpop.eup %4142  ;;  %v3388_v60 = vadd.f32 1.0, %v4141_v16  ;;  %v3305_v2 = vadd.f32 %v3304_v49, %v3191_v6  ;;  %v3193_v4 = vpop.f32.mrb[9].mxu1 }
 0x846   : >> { %v3389_v13 = vadd.f32 1.0, %v4143_v53  ;;  %v3307_v7 = vadd.f32 %v3306_v52, %v3193_v4  ;;  %v3195_v63 = vpop.f32.mrb[10].mxu1  ;;  %v4145_v14 = vpop.eup %4144  ;;  %4154 = vrcp.f32 %v3387_v36 }
 0x847   : >> { %v3799_v11 = vmul.f32 -1.442695, %v3305_v2  ;;  %v3309_v54 = vadd.f32 %v3308_v62, %v3195_v63  ;;  %v3197_v55 = vpop.f32.mrb[11].mxu1  ;;  %4156 = vrcp.f32 %v3388_v60  ;;  %v3390_v25 = vadd.f32 1.0, %v4145_v14 }
 0x848   : >> { %v3800_v31 = vmul.f32 -1.442695, %v3307_v7  ;;  %v3311_v30 = vadd.f32 %v3310_v51, %v3197_v55  ;;  %v3314_v61 = vpop.f32.mrb[20].mxu0  ;;  %4158 = vrcp.f32 %v3389_v13 }
 0x849   : >> { %v3801_v18 = vmul.f32 -1.442695, %v3309_v54  ;;  %v3316_v20 = vpop.f32.mrb[21].mxu0  ;;  %4160 = vpow2.f32 %v3799_v11 }
 0x84a   : >> { %v3802_v32 = vmul.f32 -1.442695, %v3311_v30  ;;  %v3318_v37 = vpop.f32.mrb[22].mxu0  ;;  %4162 = vpow2.f32 %v3800_v31 }
 0x84b   : >> { %v4147_v0 = vpop.eup %4146  ;;  %v3320_v28 = vpop.f32.mrb[23].mxu0  ;;  %4164 = vpow2.f32 %v3801_v18 }
 0x84c   : >> { %v4149_v35 = vpop.eup %4148  ;;  %v3391_v27 = vadd.f32 1.0, %v4147_v0  ;;  %v3201_v47 = vpop.f32.mrb[12].mxu1  ;;  %4166 = vpow2.f32 %v3802_v32 }
 0x84d   : >> { %v4151_v24 = vpop.eup %4150  ;;  %v3392_v43 = vadd.f32 1.0, %v4149_v35  ;;  %v3315_v41 = vadd.f32 %v3314_v61, %v3201_v47  ;;  %v3203_v58 = vpop.f32.mrb[13].mxu1  ;;  %4168 = vrcp.f32 %v3390_v25 }
 0x84e   : >> { %v3393_v12 = vadd.f32 1.0, %v4151_v24  ;;  %v3317_v15 = vadd.f32 %v3316_v20, %v3203_v58  ;;  %v3205_v17 = vpop.f32.mrb[14].mxu1  ;;  %v4153_v42 = vpop.eup %4152  ;;  %4170 = vrcp.f32 %v3391_v27  ;;  %v426_v24 = vld [vmem:[#allocation3] sm:$0xff] }
 0x84f   : >> { %v3803_v23 = vmul.f32 -1.442695, %v3315_v41  ;;  %v3319_v44 = vadd.f32 %v3318_v37, %v3205_v17  ;;  %v3207_v57 = vpop.f32.mrb[15].mxu1  ;;  %4172 = vrcp.f32 %v3392_v43  ;;  %v3394_v26 = vadd.f32 1.0, %v4153_v42  ;;  %v427_v17 = vld [vmem:[#allocation3 + $0x8] sm:$0xff] }
 0x850   : >> { %v3804_v56 = vmul.f32 -1.442695, %v3317_v15  ;;  %v3321_v29 = vadd.f32 %v3320_v28, %v3207_v57  ;;  %v3324_v40 = vpop.f32.mrb[24].mxu0  ;;  %v4155_v50 = vpop.eup %4154  ;;  %4174 = vrcp.f32 %v3393_v12 }
 0x851   : >> { %v3805_v48 = vmul.f32 -1.442695, %v3319_v44  ;;  %v3326_v21 = vpop.f32.mrb[25].mxu0  ;;  %v4157_v39 = vpop.eup %4156  ;;  %4176 = vpow2.f32 %v3803_v23 }
 0x852   : >> { %v3806_v38 = vmul.f32 -1.442695, %v3321_v29  ;;  %v3328_v5 = vpop.f32.mrb[26].mxu0  ;;  %v4159_v46 = vpop.eup %4158  ;;  %4178 = vpow2.f32 %v3804_v56  ;;  %v428_v56 = vld [vmem:[#allocation3 + $0x10] sm:$0xff] }
 0x853   : >> { %v3330_v34 = vpop.f32.mrb[27].mxu0  ;;  %v4161_v33 = vpop.eup %4160  ;;  %4180 = vpow2.f32 %v3805_v48 }
 0x854   : >> { %v3211_v19 = vpop.f32.mrb[16].mxu1  ;;  %v4163_v1 = vpop.eup %4162  ;;  %v3435_v9 = vadd.f32 1.0, %v4161_v33  ;;  %4182 = vpow2.f32 %v3806_v38 }
 0x855   : >> { %v3325_v22 = vadd.f32 %v3324_v40, %v3211_v19  ;;  %v3213_v10 = vpop.f32.mrb[17].mxu1  ;;  %v4165_v49 = vpop.eup %4164  ;;  %4184 = vrcp.f32 %v3394_v26  ;;  %v3436_v59 = vadd.f32 1.0, %v4163_v1 }
 0x856   : >> { %v3327_v52 = vadd.f32 %v3326_v21, %v3213_v10  ;;  %v3215_v45 = vpop.f32.mrb[18].mxu1  ;;  %v4167_v62 = vpop.eup %4166  ;;  %4186 = vrcp.f32 %v3435_v9  ;;  %v3437_v8 = vadd.f32 1.0, %v4165_v49  ;;  %v429_v21 = vld [vmem:[#allocation3 + $0x18] sm:$0xff] }
 0x857   : >> { %v3515_v51 = vmul.f32 %v4155_v50, %v3325_v22  ;;  %v3329_v16 = vadd.f32 %v3328_v5, %v3215_v45  ;;  %v3217_v36 = vpop.f32.mrb[19].mxu1  ;;  %v4169_v6 = vpop.eup %4168  ;;  %4188 = vrcp.f32 %v3436_v59  ;;  %v3438_v53 = vadd.f32 1.0, %v4167_v62 }
 0x858   : >> { %v3516_v60 = vmul.f32 %v4157_v39, %v3327_v52  ;;  %v3331_v2 = vadd.f32 %v3330_v34, %v3217_v36  ;;  %v3334_v4 = vpop.f32.mrb[28].mxu0  ;;  %v4171_v13 = vpop.eup %4170  ;;  %4190 = vrcp.f32 %v3437_v8  ;;  %v430_v8 = vld [vmem:[#allocation3 + $0x20] sm:$0xff] }
 0x859   : >> { %v3517_v7 = vmul.f32 %v4159_v46, %v3329_v16  ;;  %v3336_v63 = vpop.f32.mrb[29].mxu0  ;;  %v4173_v14 = vpop.eup %4172  ;;  %4192 = vrcp.f32 %v3438_v53  ;;  %v431_v53 = vld [vmem:[#allocation3 + $0x28] sm:$0xff] }
 0x85a   : >> { %v3518_v11 = vmul.f32 %v4169_v6, %v3331_v2  ;;  %v3338_v54 = vpop.f32.mrb[30].mxu0  ;;  %v4175_v55 = vpop.eup %4174 }
 0x85b   : >> { %v3340_v31 = vpop.f32.mrb[31].mxu0  ;;  %v4177_v30 = vpop.eup %4176 }
 0x85c   : >> { %v3221_v61 = vpop.f32.mrb[20].mxu1  ;;  %v4179_v18 = vpop.eup %4178  ;;  %v3439_v20 = vadd.f32 1.0, %v4177_v30 }
 0x85d   : >> { %v3335_v25 = vadd.f32 %v3334_v4, %v3221_v61  ;;  %v3223_v32 = vpop.f32.mrb[21].mxu1  ;;  %v4181_v37 = vpop.eup %4180  ;;  %v3440_v0 = vadd.f32 1.0, %v4179_v18 }
 0x85e   : >> { %v3337_v28 = vadd.f32 %v3336_v63, %v3223_v32  ;;  %v3225_v35 = vpop.f32.mrb[22].mxu1  ;;  %v4183_v27 = vpop.eup %4182  ;;  %4194 = vrcp.f32 %v3439_v20  ;;  %v3441_v47 = vadd.f32 1.0, %v4181_v37 }
 0x85f   : >> { %v6749_v43 = vmul.f32 %v4171_v13, %v3335_v25  ;;  %v3339_v41 = vadd.f32 %v3338_v54, %v3225_v35  ;;  %v3227_v58 = vpop.f32.mrb[23].mxu1  ;;  %v4185_v12 = vpop.eup %4184  ;;  %4196 = vrcp.f32 %v3440_v0  ;;  %v3442_v15 = vadd.f32 1.0, %v4183_v27 }
 0x860   : >> { %v3520_v42 = vmul.f32 %v4173_v14, %v3337_v28  ;;  %v3341_v23 = vadd.f32 %v3340_v31, %v3227_v58  ;;  %v3344_v44 = vpop.f32.mrb[32].mxu0  ;;  %v4187_v57 = vpop.eup %4186  ;;  %4198 = vrcp.f32 %v3441_v47 }
 0x861   : >> { %v3521_v29 = vmul.f32 %v4175_v55, %v3339_v41  ;;  %v3346_v40 = vpop.f32.mrb[33].mxu0  ;;  %v4189_v50 = vpop.eup %4188  ;;  %4200 = vrcp.f32 %v3442_v15  ;;  %v3507_v48 = vmul.f32 %v4187_v57, %v426_v24  ;;  %v433_v55 = vld [vmem:[#allocation3 + $0x38] sm:$0xff] }
 0x862   : >> { %v3522_v39 = vmul.f32 %v4185_v12, %v3341_v23  ;;  %v3348_v26 = vpop.f32.mrb[34].mxu0  ;;  %v4191_v38 = vpop.eup %4190  ;;  %v3508_v5 = vmul.f32 %v4189_v50, %v427_v17 }
 0x863   : >> { %v3350_v46 = vpop.f32.mrb[35].mxu0  ;;  %v4193_v34 = vpop.eup %4192  ;;  %v3523_v33 = vadd.f32 %v3515_v51, %v3507_v48  ;;  %v3509_v19 = vmul.f32 %v4191_v38, %v428_v56 }
 0x864   : >> { %v3231_v1 = vpop.f32.mrb[24].mxu1  ;;  %v3524_v9 = vadd.f32 %v3516_v60, %v3508_v5  ;;  %v3510_v22 = vmul.f32 %v4193_v34, %v429_v21  ;;  %v432_v60 = vld [vmem:[#allocation3 + $0x30] sm:$0xff] }
 0x865   : >> { %v3345_v10 = vadd.f32 %v3344_v44, %v3231_v1  ;;  %v3233_v49 = vpop.f32.mrb[25].mxu1  ;;  %3566 = vst [vmem:[#allocation3] sm:$0xff] %v3523_v33  ;;  %v3525_v59 = vadd.f32 %v3517_v7, %v3509_v19 }
 0x866   : >> { %v3347_v52 = vadd.f32 %v3346_v40, %v3233_v49  ;;  %v3235_v45 = vpop.f32.mrb[26].mxu1  ;;  %3567 = vst [vmem:[#allocation3 + $0x8] sm:$0xff] %v3524_v9  ;;  %v3526_v62 = vadd.f32 %v3518_v11, %v3510_v22 }
 0x867   : >> { %v3807_v16 = vmul.f32 -1.442695, %v3345_v10  ;;  %v3349_v36 = vadd.f32 %v3348_v26, %v3235_v45  ;;  %v3237_v6 = vpop.f32.mrb[27].mxu1  ;;  %3568 = vst [vmem:[#allocation3 + $0x10] sm:$0xff] %v3525_v59 }
 0x868   : >> { %v3808_v2 = vmul.f32 -1.442695, %v3347_v52  ;;  %v3351_v51 = vadd.f32 %v3350_v46, %v3237_v6  ;;  %v3354_v4 = vpop.f32.mrb[36].mxu0  ;;  %v4195_v13 = vpop.eup %4194  ;;  %3569 = vst [vmem:[#allocation3 + $0x18] sm:$0xff] %v3526_v62 }
 0x869   : >> { %v3809_v63 = vmul.f32 -1.442695, %v3349_v36  ;;  %v3356_v14 = vpop.f32.mrb[37].mxu0  ;;  %v4197_v54 = vpop.eup %4196  ;;  %v3511_v7 = vmul.f32 %v4195_v13, %v430_v8  ;;  %4202 = vpow2.f32 %v3807_v16 }
 0x86a   : >> { %v3810_v31 = vmul.f32 -1.442695, %v3351_v51  ;;  %v3358_v11 = vpop.f32.mrb[38].mxu0  ;;  %v4199_v30 = vpop.eup %4198  ;;  %v3512_v61 = vmul.f32 %v4197_v54, %v431_v53  ;;  %4204 = vpow2.f32 %v3808_v2 }
 0x86b   : >> { %v3360_v18 = vpop.f32.mrb[39].mxu0  ;;  %v4201_v20 = vpop.eup %4200  ;;  %v3527_v25 = vadd.f32 %v6749_v43, %v3511_v7  ;;  %v3513_v32 = vmul.f32 %v4199_v30, %v432_v60  ;;  %4206 = vpow2.f32 %v3809_v63 }
 0x86c   : >> { %v3241_v37 = vpop.f32.mrb[28].mxu1  ;;  %v3528_v0 = vadd.f32 %v3520_v42, %v3512_v61  ;;  %v3514_v28 = vmul.f32 %v4201_v20, %v433_v55  ;;  %4208 = vpow2.f32 %v3810_v31 }
 0x86d   : >> { %v3355_v35 = vadd.f32 %v3354_v4, %v3241_v37  ;;  %v3243_v27 = vpop.f32.mrb[29].mxu1  ;;  %3570 = vst [vmem:[#allocation3 + $0x20] sm:$0xff] %v3527_v25  ;;  %v3529_v47 = vadd.f32 %v3521_v29, %v3513_v32  ;;  %4210 = vtanh.f32 %v3523_v33 }
 0x86e   : >> { %v3357_v24 = vadd.f32 %v3356_v14, %v3243_v27  ;;  %v3245_v41 = vpop.f32.mrb[30].mxu1  ;;  %3571 = vst [vmem:[#allocation3 + $0x28] sm:$0xff] %v3528_v0  ;;  %v3530_v58 = vadd.f32 %v3522_v39, %v3514_v28  ;;  %4212 = vtanh.f32 %v3524_v9 }
 0x86f   : >> { %v3811_v12 = vmul.f32 -1.442695, %v3355_v35  ;;  %v3359_v15 = vadd.f32 %v3358_v11, %v3245_v41  ;;  %v3247_v17 = vpop.f32.mrb[31].mxu1  ;;  %3572 = vst [vmem:[#allocation3 + $0x30] sm:$0xff] %v3529_v47  ;;  %4214 = vtanh.f32 %v3525_v59 }
 0x870   : >> { %v3812_v43 = vmul.f32 -1.442695, %v3357_v24  ;;  %v3361_v23 = vadd.f32 %v3360_v18, %v3247_v17  ;;  %3573 = vst [vmem:[#allocation3 + $0x38] sm:$0xff] %v3530_v58 }
 0x871   : >> { %v3813_v42 = vmul.f32 -1.442695, %v3359_v15  ;;  %4216 = vpow2.f32 %v3811_v12 }
 0x872   : >> { %v3814_v44 = vmul.f32 -1.442695, %v3361_v23  ;;  %4218 = vpow2.f32 %v3812_v43 }
 0x873   : >> { %v4203_v57 = vpop.eup %4202  ;;  %4220 = vpow2.f32 %v3813_v42 }
 0x874   : >> { %v4205_v56 = vpop.eup %4204  ;;  %v3483_v29 = vadd.f32 1.0, %v4203_v57  ;;  %4222 = vpow2.f32 %v3814_v44 }
 0x875   : >> { %v4207_v40 = vpop.eup %4206  ;;  %4224 = vtanh.f32 %v3526_v62  ;;  %v3484_v50 = vadd.f32 1.0, %v4205_v56 }
 0x876   : >> { %v4209_v48 = vpop.eup %4208  ;;  %4226 = vrcp.f32 %v3483_v29  ;;  %v3485_v21 = vadd.f32 1.0, %v4207_v40 }
 0x877   : >> { %4228 = vrcp.f32 %v3484_v50  ;;  %v3486_v39 = vadd.f32 1.0, %v4209_v48  ;;  %v4211_v26 = vpop.eup %4210 }
 0x878   : >> { %4230 = vrcp.f32 %v3485_v21  ;;  %v4213_v38 = vpop.eup %4212 }
 0x879   : >> { %4232 = vrcp.f32 %v3486_v39  ;;  %v4215_v5 = vpop.eup %4214 }
 0x87a   : >> { %4234 = vtanh.f32 %v3527_v25 }
 0x87b   : >> { %v4217_v46 = vpop.eup %4216  ;;  %4236 = vtanh.f32 %v3528_v0 }
 0x87c   : >> { %v4219_v34 = vpop.eup %4218  ;;  %4238 = vtanh.f32 %v3529_v47  ;;  %v3487_v33 = vadd.f32 1.0, %v4217_v46 }
 0x87d   : >> { %v4221_v19 = vpop.eup %4220  ;;  %4240 = vtanh.f32 %v3530_v58  ;;  %v3488_v1 = vadd.f32 1.0, %v4219_v34 }
 0x87e   : >> { %v4223_v9 = vpop.eup %4222  ;;  %4242 = vrcp.f32 %v3487_v33  ;;  %v3489_v22 = vadd.f32 1.0, %v4221_v19 }
 0x87f   : >> { %v4225_v10 = vpop.eup %4224  ;;  %4244 = vrcp.f32 %v3488_v1  ;;  %v3490_v49 = vadd.f32 1.0, %v4223_v9 }
 0x880   : >> { %v4227_v59 = vpop.eup %4226  ;;  %4246 = vrcp.f32 %v3489_v22 }
 0x881   : >> { %v4229_v52 = vpop.eup %4228  ;;  %v3539_v45 = vmul.f32 %v4227_v59, %v4211_v26  ;;  %4248 = vrcp.f32 %v3490_v49 }
 0x882   : >> { %v4231_v62 = vpop.eup %4230  ;;  %v3540_v8 = vmul.f32 %v4229_v52, %v4213_v38 }
 0x883   : >> { %v4233_v16 = vpop.eup %4232  ;;  %3550 = vst [vmem:[%s6754_s25] sm:$0xff] %v3539_v45  ;;  %3558 = vst [vmem:[#allocation2 + $0x20] sm:$0xff] %v3539_v45  ;;  %v3541_v36 = vmul.f32 %v4231_v62, %v4215_v5 }
 0x884   : >> { %v4235_v6 = vpop.eup %4234  ;;  %3551 = vst [vmem:[%s6754_s25 + $0x8] sm:$0xff] %v3540_v8  ;;  %3559 = vst [vmem:[#allocation2 + $0x28] sm:$0xff] %v3540_v8  ;;  %v3542_v53 = vmul.f32 %v4233_v16, %v4225_v10 }
 0x885   : >> { %v4237_v2 = vpop.eup %4236  ;;  %3552 = vst [vmem:[%s6754_s25 + $0x10] sm:$0xff] %v3541_v36  ;;  %3560 = vst [vmem:[#allocation2 + $0x30] sm:$0xff] %v3541_v36 }
 0x886   : >> { %v4239_v51 = vpop.eup %4238  ;;  %3553 = vst [vmem:[%s6754_s25 + $0x18] sm:$0xff] %v3542_v53  ;;  %3561 = vst [vmem:[#allocation2 + $0x38] sm:$0xff] %v3542_v53 }
 0x887   : >> { %v4241_v4 = vpop.eup %4240 }
 0x888   : >> { %v4243_v13 = vpop.eup %4242 }
 0x889   : >> { %v4245_v60 = vpop.eup %4244  ;;  %v3543_v63 = vmul.f32 %v4243_v13, %v4235_v6 }
 0x88a   : >> { %v4247_v14 = vpop.eup %4246  ;;  %v3544_v54 = vmul.f32 %v4245_v60, %v4237_v2  ;;  %405 = sbr.rel (!%p403_p2) target bundleno = 98 (0x62), region = 160 }
 0x88b   : >> { %v4249_v7 = vpop.eup %4248  ;;  %3554 = vst [vmem:[%s6754_s25 + $0x20] sm:$0xff] %v3543_v63  ;;  %3562 = vst [vmem:[#allocation2 + $0x40] sm:$0xff] %v3543_v63  ;;  %v3545_v55 = vmul.f32 %v4247_v14, %v4239_v51 }
 0x88c   : >> { %3555 = vst [vmem:[%s6754_s25 + $0x28] sm:$0xff] %v3544_v54  ;;  %3563 = vst [vmem:[#allocation2 + $0x48] sm:$0xff] %v3544_v54  ;;  %v3546_v31 = vmul.f32 %v4249_v7, %v4241_v4 }
 0x88d   : >> { %3556 = vst [vmem:[%s6754_s25 + $0x30] sm:$0xff] %v3545_v55  ;;  %3564 = vst [vmem:[#allocation2 + $0x50] sm:$0xff] %v3545_v55 }
 0x88e   : >> { %3557 = vst [vmem:[%s6754_s25 + $0x38] sm:$0xff] %v3546_v31  ;;  %3565 = vst [vmem:[#allocation2 + $0x58] sm:$0xff] %v3546_v31 }
 0x891 PF: > { %s20_s27 = sadd.s32 1, %s4352_s27  }
 0x892   : > { %p17_p3 = scmp.ge.s32.totalorder %s20_s27, 4  }
 0x894   :  { %19 = sbr.rel (!%p17_p3) target bundleno = 2 (0x2), region = 171 }
 0x89b   :  { %3595 = vsyncpa [#allocation6], 1 }
 0x89c   :  { %3597 = vsyncpa [#allocation6 + $0x1], 1 }
 0x89d   :  { %3598 = vsyncpa [#allocation8], 1 }

</bundles_post_ra>
